<compile_context>
chip_gen: v6e
topology: v6e:2x2x1
jax: 0.10.0
libtpu: 0.0.40
codegen_flags: <defaults>
</compile_context>

<pallas_src>
import functools
from typing import NamedTuple

import jax
import jax.numpy as jnp
from jax.experimental import pallas as pl
from jax.experimental.pallas import tpu as pltpu


class Fragments(NamedTuple):
    pix_to_face: jax.Array
    zbuf: jax.Array
    bary_coords: jax.Array
    dists: jax.Array


_K_EPS = 1e-8   # kEpsilon in PyTorch3D's rasterize_meshes
_LANES = 128    # TPU lane width


def _raster_kernel(fv_ref, p2f_ref, fslab_ref, *, H, W, F, TS,
                   perspective_correct, cull_backfaces):
    b = pl.program_id(0)   # mesh index
    t = pl.program_id(1)   # pixel-tile index

    # ---- pixel coordinates for this (TS, 128) lane-dense tile ----------------
    row = jax.lax.broadcasted_iota(jnp.int32, (TS, _LANES), 0) + t * TS
    lane = jax.lax.broadcasted_iota(jnp.int32, (TS, _LANES), 1)
    idx = (row * _LANES + lane).astype(jnp.float32)   # linear pixel index (exact < 2^24)
    # Unflatten y = idx // W, x = idx % W via f32 (avoids integer-div lowering);
    # the +0.5 keeps the floor exact for integer multiples of W.
    y = jnp.floor((idx + 0.5) / W)
    x = idx - y * W
    # PyTorch3D NDC pixel centers: +X points left, +Y points up, (0,0) top-left.
    yf = 1.0 - (2.0 * y + 1.0) / H
    xf = 1.0 - (2.0 * x + 1.0) / W

    neg = jnp.full((TS, _LANES), -1.0, jnp.float32)
    init = (
        jnp.full((TS, _LANES), jnp.inf, jnp.float32),   # best z
        jnp.full((TS, _LANES), -1, jnp.int32),          # best face index (per mesh)
        neg, neg, neg,                                  # best barycentrics
        neg,                                            # best squared distance
    )
    base_b = b * (F * 9)

    def body(f, carry):
        best_z, best_f, bw0, bw1, bw2, bd = carry
        base = base_b + f * 9
        x0 = fv_ref[base + 0]; y0 = fv_ref[base + 1]; z0 = fv_ref[base + 2]
        x1 = fv_ref[base + 3]; y1 = fv_ref[base + 4]; z1 = fv_ref[base + 5]
        x2 = fv_ref[base + 6]; y2 = fv_ref[base + 7]; z2 = fv_ref[base + 8]

        # ---- per-face scalar precomputation (scalar unit; no vector divides) --
        ex01 = x1 - x0; ey01 = y1 - y0
        ex02 = x2 - x0; ey02 = y2 - y0
        ex12 = x2 - x1; ey12 = y2 - y1
        # face_area = edge_function(v2, v0, v1)
        area = ex02 * ey01 - ey02 * ex01
        inv_denom = 1.0 / (area + _K_EPS)            # exact scalar reciprocal
        l2_01 = ex01 * ex01 + ey01 * ey01
        l2_02 = ex02 * ex02 + ey02 * ey02
        l2_12 = ex12 * ex12 + ey12 * ey12
        deg01 = l2_01 <= _K_EPS
        deg02 = l2_02 <= _K_EPS
        deg12 = l2_12 <= _K_EPS
        inv_l2_01 = 1.0 / jnp.where(deg01, jnp.float32(1.0), l2_01)
        inv_l2_02 = 1.0 / jnp.where(deg02, jnp.float32(1.0), l2_02)
        inv_l2_12 = 1.0 / jnp.where(deg12, jnp.float32(1.0), l2_12)

        # ---- vector work (shared deltas reused by edges + distances) ----------
        dx0 = xf - x0; dy0 = yf - y0
        dx1 = xf - x1; dy1 = yf - y1
        dx2 = xf - x2; dy2 = yf - y2

        # unnormalised edge functions
        e0 = dx1 * ey12 - dy1 * ex12            # edge_fn(p, v1, v2)
        e1 = dy2 * ex02 - dx2 * ey02            # edge_fn(p, v2, v0)
        e2 = dx0 * ey01 - dy0 * ex01            # edge_fn(p, v0, v1)

        w0 = e0 * inv_denom
        w1 = e1 * inv_denom
        w2 = e2 * inv_denom

        if perspective_correct:
            z1z2 = z1 * z2; z0z2 = z0 * z2; z0z1 = z0 * z1     # scalars
            t0 = w0 * z1z2; t1 = w1 * z0z2; t2 = w2 * z0z1
            inv_bot = 1.0 / (t0 + t1 + t2)                     # single vector divide
            w0 = t0 * inv_bot; w1 = t1 * inv_bot; w2 = t2 * inv_bot

        inside = (w0 > 0.0) & (w1 > 0.0) & (w2 > 0.0)
        # TODO(synk): clip_barycentric_coords path (only active for blur_radius > 0)
        # is not implemented.
        pz = w0 * z0 + w1 * z1 + w2 * z2

        # squared distances to the three edges, reusing e0/e1/e2 and the deltas
        q0 = dx0 * dx0 + dy0 * dy0
        q1 = dx1 * dx1 + dy1 * dy1
        q2 = dx2 * dx2 + dy2 * dy2

        def seg_dist(e, dax, day, qa, qb, vx, vy, inv_l2, deg):
            tpar = (dax * vx + day * vy) * inv_l2
            d_perp = (e * e) * inv_l2             # perpendicular dist^2 = edge^2 / l2
            d = jnp.where(tpar <= 0.0, qa, jnp.where(tpar >= 1.0, qb, d_perp))
            return jnp.where(deg, qb, d)          # degenerate edge -> dist to 2nd vertex

        d01 = seg_dist(e2, dx0, dy0, q0, q1, ex01, ey01, inv_l2_01, deg01)
        d02 = seg_dist(e1, dx0, dy0, q0, q2, ex02, ey02, inv_l2_02, deg02)
        d12 = seg_dist(e0, dx1, dy1, q1, q2, ex12, ey12, inv_l2_12, deg12)
        dist = jnp.minimum(jnp.minimum(d01, d02), d12)

        # blur_radius == 0.0  =>  only pixels strictly inside a non-degenerate,
        # in-front-of-camera face survive (matches CheckPixelInsideFace).
        not_degenerate = jnp.abs(area) > _K_EPS
        valid = inside & (pz >= 0.0) & not_degenerate
        if cull_backfaces:
            valid = valid & (area >= 0.0)

        # z-buffer: smallest z wins; ties go to the lower face index because
        # faces are visited in increasing order with a strict '<'.
        better = valid & (pz < best_z)
        best_z = jnp.where(better, pz, best_z)
        best_f = jnp.where(better, f, best_f)
        bw0 = jnp.where(better, w0, bw0)
        bw1 = jnp.where(better, w1, bw1)
        bw2 = jnp.where(better, w2, bw2)
        bd = jnp.where(better, dist, bd)
        return best_z, best_f, bw0, bw1, bw2, bd

    best_z, best_f, bw0, bw1, bw2, bd = jax.lax.fori_loop(
        0, F, body, init, unroll=max(1, min(F, 8)))

    found = best_f >= 0
    # pix_to_face uses packed (global) face indices: b * F + f.
    p2f_ref[0] = jnp.where(found, b * F + best_f, -1)
    fslab_ref[0, 0] = jnp.where(found, best_z, -1.0)
    fslab_ref[0, 1] = jnp.where(found, bw0, -1.0)
    fslab_ref[0, 2] = jnp.where(found, bw1, -1.0)
    fslab_ref[0, 3] = jnp.where(found, bw2, -1.0)
    fslab_ref[0, 4] = jnp.where(found, -bd, -1.0)   # inside => negative squared dist


def mesh_rasterizer_forward(verts, faces, *, image_size=16, faces_per_pixel=1,
                            blur_radius=0.0, perspective_correct=False,
                            cull_backfaces=False):
    # TODO(synk): faces_per_pixel > 1 (z-sorted top-K buffer) and blur_radius > 0
    # are not implemented.
    assert faces_per_pixel == 1
    assert blur_radius == 0.0
    if isinstance(image_size, int):
        H = W = image_size
    else:
        H, W = image_size

    B = verts.shape[0]
    F = faces.shape[0]
    HW = H * W

    # Lane/sublane-dense pixel layout: pad H*W up to (R, 128) with R a multiple
    # of the sublane tile TS (8 or 16 rows -> 1-2 vregs per carry array).
    rows_raw = -(-HW // _LANES)
    TS = 16 if rows_raw >= 16 else 8
    R = -(-rows_raw // TS) * TS
    n_tiles = R // TS

    # Glue: gather per-face vertex coords (Meshes.verts_padded()[faces]).
    face_verts = verts[:, faces, :]                              # (B, F, 3, 3)
    fv_flat = face_verts.astype(jnp.float32).reshape(-1)         # SMEM scalar table
    # TODO(synk): for large B*F the flat SMEM face table should become a
    # face-chunk grid axis with a VMEM BlockSpec (and an MXU edge-function
    # formulation); fine for small meshes.

    kernel = functools.partial(
        _raster_kernel, H=H, W=W, F=F, TS=TS,
        perspective_correct=perspective_correct,
        cull_backfaces=cull_backfaces)

    out_shapes = (
        jax.ShapeDtypeStruct((B, R, _LANES), jnp.int32),        # pix_to_face
        jax.ShapeDtypeStruct((B, 5, R, _LANES), jnp.float32),   # z, w0, w1, w2, dist
    )
    out_specs = (
        pl.BlockSpec((1, TS, _LANES), lambda b, t: (b, t, 0)),
        pl.BlockSpec((1, 5, TS, _LANES), lambda b, t: (b, 0, t, 0)),
    )

    p2f_flat, fslab = pl.pallas_call(
        kernel,
        grid=(B, n_tiles),
        in_specs=[pl.BlockSpec(memory_space=pltpu.MemorySpace.SMEM)],
        out_specs=out_specs,
        out_shape=out_shapes,
        compiler_params=pltpu.CompilerParams(
            dimension_semantics=("parallel", "parallel")),
    )(fv_flat)

    # Wrapper-side un-padding / un-flattening (pure layout plumbing).
    p2f = p2f_flat.reshape(B, R * _LANES)[:, :HW].reshape(B, H, W)
    fimg = fslab.reshape(B, 5, R * _LANES)[:, :, :HW].reshape(B, 5, H, W)
    zbuf = fimg[:, 0]
    bary = jnp.stack([fimg[:, 1], fimg[:, 2], fimg[:, 3]], axis=-1)  # (B, H, W, 3)
    dists = fimg[:, 4]

    return Fragments(
        pix_to_face=p2f[..., None],                              # (B, H, W, 1) int32
        zbuf=zbuf[..., None],                                    # (B, H, W, 1)
        bary_coords=bary[:, :, :, None, :],                      # (B, H, W, 1, 3)
        dists=dists[..., None],                                  # (B, H, W, 1)
    )


if __name__ == "__main__":
    key = jax.random.PRNGKey(0)
    B, V, F = 2, 12, 8
    image_size = 16

    k1, k2, k3 = jax.random.split(key, 3)
    xy = jax.random.uniform(k1, (B, V, 2), minval=-0.9, maxval=0.9)
    z = jax.random.uniform(k2, (B, V, 1), minval=0.5, maxval=2.0)
    verts = jnp.concatenate([xy, z], axis=-1).astype(jnp.float32)   # screen-space verts
    faces = jax.random.randint(k3, (F, 3), 0, V).astype(jnp.int32)

    frags = mesh_rasterizer_forward(verts, faces, image_size=image_size)
    frags = jax.block_until_ready(frags)

    assert frags.pix_to_face.shape == (B, image_size, image_size, 1)
    assert frags.pix_to_face.dtype == jnp.int32
    assert frags.zbuf.shape == (B, image_size, image_size, 1)
    assert frags.bary_coords.shape == (B, image_size, image_size, 1, 3)
    assert frags.dists.shape == (B, image_size, image_size, 1)
    assert bool(jnp.all(jnp.isfinite(frags.zbuf)))

    print("KERNEL_OK")
</pallas_src>

<mosaic_0001>
module attributes {stable_mosaic.version = 11 : i64} {
  func.func @_raster_kernel(%arg0: i32, %arg1: i32, %arg2: memref<144xf32, #tpu.memory_space<smem>>, %arg3: memref<1x8x128xi32, #tpu.memory_space<vmem>>, %arg4: memref<1x5x8x128xf32, #tpu.memory_space<vmem>>) attributes {dimension_semantics = [#tpu.dimension_semantics<parallel>, #tpu.dimension_semantics<parallel>], iteration_bounds = array<i64: 2, 1>, scalar_prefetch = 0 : i64, scratch_operands = 0 : i64, tpu.core_type = #tpu.core_type<tc>, window_params = [{transform_indices = @transform_0, window_bounds = array<i64: 144>}, {transform_indices = @transform_1, window_bounds = array<i64: 1, 8, 128>}, {transform_indices = @transform_2, window_bounds = array<i64: 1, 5, 8, 128>}]} {
    %0 = tpu.iota {dimensions = array<i32: 0>} : vector<8x128xi32>
    %c8_i32 = arith.constant 8 : i32
    %1 = arith.muli %arg1, %c8_i32 : i32
    %2 = vector.broadcast %1 : i32 to vector<8x128xi32>
    %3 = arith.addi %0, %2 : vector<8x128xi32>
    %4 = tpu.iota {dimensions = array<i32: 1>} : vector<8x128xi32>
    %c128_i32 = arith.constant 128 : i32
    %5 = vector.broadcast %c128_i32 : i32 to vector<8x128xi32>
    %6 = arith.muli %3, %5 : vector<8x128xi32>
    %7 = arith.addi %6, %4 : vector<8x128xi32>
    %8 = arith.sitofp %7 : vector<8x128xi32> to vector<8x128xf32>
    %cst = arith.constant 5.000000e-01 : f32
    %9 = vector.broadcast %cst : f32 to vector<8x128xf32>
    %10 = arith.addf %8, %9 : vector<8x128xf32>
    %cst_0 = arith.constant 1.600000e+01 : f32
    %11 = vector.broadcast %cst_0 : f32 to vector<8x128xf32>
    %12 = arith.divf %10, %11 : vector<8x128xf32>
    %13 = math.floor %12 : vector<8x128xf32>
    %cst_1 = arith.constant 1.600000e+01 : f32
    %14 = vector.broadcast %cst_1 : f32 to vector<8x128xf32>
    %15 = arith.mulf %13, %14 : vector<8x128xf32>
    %16 = arith.subf %8, %15 : vector<8x128xf32>
    %cst_2 = arith.constant 2.000000e+00 : f32
    %17 = vector.broadcast %cst_2 : f32 to vector<8x128xf32>
    %18 = arith.mulf %17, %13 : vector<8x128xf32>
    %cst_3 = arith.constant 1.000000e+00 : f32
    %19 = vector.broadcast %cst_3 : f32 to vector<8x128xf32>
    %20 = arith.addf %18, %19 : vector<8x128xf32>
    %cst_4 = arith.constant 1.600000e+01 : f32
    %21 = vector.broadcast %cst_4 : f32 to vector<8x128xf32>
    %22 = arith.divf %20, %21 : vector<8x128xf32>
    %cst_5 = arith.constant 1.000000e+00 : f32
    %23 = vector.broadcast %cst_5 : f32 to vector<8x128xf32>
    %24 = arith.subf %23, %22 : vector<8x128xf32>
    %cst_6 = arith.constant 2.000000e+00 : f32
    %25 = vector.broadcast %cst_6 : f32 to vector<8x128xf32>
    %26 = arith.mulf %25, %16 : vector<8x128xf32>
    %cst_7 = arith.constant 1.000000e+00 : f32
    %27 = vector.broadcast %cst_7 : f32 to vector<8x128xf32>
    %28 = arith.addf %26, %27 : vector<8x128xf32>
    %cst_8 = arith.constant 1.600000e+01 : f32
    %29 = vector.broadcast %cst_8 : f32 to vector<8x128xf32>
    %30 = arith.divf %28, %29 : vector<8x128xf32>
    %cst_9 = arith.constant 1.000000e+00 : f32
    %31 = vector.broadcast %cst_9 : f32 to vector<8x128xf32>
    %32 = arith.subf %31, %30 : vector<8x128xf32>
    %cst_10 = arith.constant -1.000000e+00 : f32
    %33 = vector.broadcast %cst_10 : f32 to vector<8x128xf32>
    %cst_11 = arith.constant 0x7F800000 : f32
    %34 = vector.broadcast %cst_11 : f32 to vector<8x128xf32>
    %c-1_i32 = arith.constant -1 : i32
    %35 = vector.broadcast %c-1_i32 : i32 to vector<8x128xi32>
    %c72_i32 = arith.constant 72 : i32
    %36 = arith.muli %arg0, %c72_i32 : i32
    %c0_i32 = arith.constant 0 : i32
    %c9_i32 = arith.constant 9 : i32
    %37 = arith.muli %c0_i32, %c9_i32 : i32
    %38 = arith.addi %36, %37 : i32
    %c0_i32_12 = arith.constant 0 : i32
    %39 = arith.addi %38, %c0_i32_12 : i32
    %40 = arith.index_cast %39 : i32 to index
    %41 = memref.load %arg2[%40] : memref<144xf32, #tpu.memory_space<smem>>
    %c1_i32 = arith.constant 1 : i32
    %42 = arith.addi %38, %c1_i32 : i32
    %43 = arith.index_cast %42 : i32 to index
    %44 = memref.load %arg2[%43] : memref<144xf32, #tpu.memory_space<smem>>
    %c2_i32 = arith.constant 2 : i32
    %45 = arith.addi %38, %c2_i32 : i32
    %46 = arith.index_cast %45 : i32 to index
    %47 = memref.load %arg2[%46] : memref<144xf32, #tpu.memory_space<smem>>
    %c3_i32 = arith.constant 3 : i32
    %48 = arith.addi %38, %c3_i32 : i32
    %49 = arith.index_cast %48 : i32 to index
    %50 = memref.load %arg2[%49] : memref<144xf32, #tpu.memory_space<smem>>
    %c4_i32 = arith.constant 4 : i32
    %51 = arith.addi %38, %c4_i32 : i32
    %52 = arith.index_cast %51 : i32 to index
    %53 = memref.load %arg2[%52] : memref<144xf32, #tpu.memory_space<smem>>
    %c5_i32 = arith.constant 5 : i32
    %54 = arith.addi %38, %c5_i32 : i32
    %55 = arith.index_cast %54 : i32 to index
    %56 = memref.load %arg2[%55] : memref<144xf32, #tpu.memory_space<smem>>
    %c6_i32 = arith.constant 6 : i32
    %57 = arith.addi %38, %c6_i32 : i32
    %58 = arith.index_cast %57 : i32 to index
    %59 = memref.load %arg2[%58] : memref<144xf32, #tpu.memory_space<smem>>
    %c7_i32 = arith.constant 7 : i32
    %60 = arith.addi %38, %c7_i32 : i32
    %61 = arith.index_cast %60 : i32 to index
    %62 = memref.load %arg2[%61] : memref<144xf32, #tpu.memory_space<smem>>
    %c8_i32_13 = arith.constant 8 : i32
    %63 = arith.addi %38, %c8_i32_13 : i32
    %64 = arith.index_cast %63 : i32 to index
    %65 = memref.load %arg2[%64] : memref<144xf32, #tpu.memory_space<smem>>
    %66 = arith.subf %50, %41 : f32
    %67 = arith.subf %53, %44 : f32
    %68 = arith.subf %59, %41 : f32
    %69 = arith.subf %62, %44 : f32
    %70 = arith.subf %59, %50 : f32
    %71 = arith.subf %62, %53 : f32
    %72 = arith.mulf %68, %67 : f32
    %73 = arith.mulf %69, %66 : f32
    %74 = arith.subf %72, %73 : f32
    %cst_14 = arith.constant 9.99999993E-9 : f32
    %75 = arith.addf %74, %cst_14 : f32
    %cst_15 = arith.constant 1.000000e+00 : f32
    %76 = arith.divf %cst_15, %75 : f32
    %77 = arith.mulf %66, %66 : f32
    %78 = arith.mulf %67, %67 : f32
    %79 = arith.addf %77, %78 : f32
    %80 = arith.mulf %68, %68 : f32
    %81 = arith.mulf %69, %69 : f32
    %82 = arith.addf %80, %81 : f32
    %83 = arith.mulf %70, %70 : f32
    %84 = arith.mulf %71, %71 : f32
    %85 = arith.addf %83, %84 : f32
    %cst_16 = arith.constant 9.99999993E-9 : f32
    %86 = arith.cmpf ole, %79, %cst_16 : f32
    %cst_17 = arith.constant 9.99999993E-9 : f32
    %87 = arith.cmpf ole, %82, %cst_17 : f32
    %cst_18 = arith.constant 9.99999993E-9 : f32
    %88 = arith.cmpf ole, %85, %cst_18 : f32
    %cst_19 = arith.constant 1.000000e+00 : f32
    %89 = arith.select %86, %cst_19, %79 : f32
    %cst_20 = arith.constant 1.000000e+00 : f32
    %90 = arith.divf %cst_20, %89 : f32
    %cst_21 = arith.constant 1.000000e+00 : f32
    %91 = arith.select %87, %cst_21, %82 : f32
    %cst_22 = arith.constant 1.000000e+00 : f32
    %92 = arith.divf %cst_22, %91 : f32
    %cst_23 = arith.constant 1.000000e+00 : f32
    %93 = arith.select %88, %cst_23, %85 : f32
    %cst_24 = arith.constant 1.000000e+00 : f32
    %94 = arith.divf %cst_24, %93 : f32
    %95 = vector.broadcast %41 : f32 to vector<8x128xf32>
    %96 = arith.subf %32, %95 : vector<8x128xf32>
    %97 = vector.broadcast %44 : f32 to vector<8x128xf32>
    %98 = arith.subf %24, %97 : vector<8x128xf32>
    %99 = vector.broadcast %50 : f32 to vector<8x128xf32>
    %100 = arith.subf %32, %99 : vector<8x128xf32>
    %101 = vector.broadcast %53 : f32 to vector<8x128xf32>
    %102 = arith.subf %24, %101 : vector<8x128xf32>
    %103 = vector.broadcast %59 : f32 to vector<8x128xf32>
    %104 = arith.subf %32, %103 : vector<8x128xf32>
    %105 = vector.broadcast %62 : f32 to vector<8x128xf32>
    %106 = arith.subf %24, %105 : vector<8x128xf32>
    %107 = vector.broadcast %71 : f32 to vector<8x128xf32>
    %108 = arith.mulf %100, %107 : vector<8x128xf32>
    %109 = vector.broadcast %70 : f32 to vector<8x128xf32>
    %110 = arith.mulf %102, %109 : vector<8x128xf32>
    %111 = arith.subf %108, %110 : vector<8x128xf32>
    %112 = vector.broadcast %68 : f32 to vector<8x128xf32>
    %113 = arith.mulf %106, %112 : vector<8x128xf32>
    %114 = vector.broadcast %69 : f32 to vector<8x128xf32>
    %115 = arith.mulf %104, %114 : vector<8x128xf32>
    %116 = arith.subf %113, %115 : vector<8x128xf32>
    %117 = vector.broadcast %67 : f32 to vector<8x128xf32>
    %118 = arith.mulf %96, %117 : vector<8x128xf32>
    %119 = vector.broadcast %66 : f32 to vector<8x128xf32>
    %120 = arith.mulf %98, %119 : vector<8x128xf32>
    %121 = arith.subf %118, %120 : vector<8x128xf32>
    %122 = vector.broadcast %76 : f32 to vector<8x128xf32>
    %123 = arith.mulf %111, %122 : vector<8x128xf32>
    %124 = vector.broadcast %76 : f32 to vector<8x128xf32>
    %125 = arith.mulf %116, %124 : vector<8x128xf32>
    %126 = vector.broadcast %76 : f32 to vector<8x128xf32>
    %127 = arith.mulf %121, %126 : vector<8x128xf32>
    %cst_25 = arith.constant 0.000000e+00 : f32
    %128 = vector.broadcast %cst_25 : f32 to vector<8x128xf32>
    %129 = arith.cmpf ogt, %123, %128 : vector<8x128xf32>
    %cst_26 = arith.constant 0.000000e+00 : f32
    %130 = vector.broadcast %cst_26 : f32 to vector<8x128xf32>
    %131 = arith.cmpf ogt, %125, %130 : vector<8x128xf32>
    %132 = arith.andi %129, %131 : vector<8x128xi1>
    %cst_27 = arith.constant 0.000000e+00 : f32
    %133 = vector.broadcast %cst_27 : f32 to vector<8x128xf32>
    %134 = arith.cmpf ogt, %127, %133 : vector<8x128xf32>
    %135 = arith.andi %132, %134 : vector<8x128xi1>
    %136 = vector.broadcast %47 : f32 to vector<8x128xf32>
    %137 = arith.mulf %123, %136 : vector<8x128xf32>
    %138 = vector.broadcast %56 : f32 to vector<8x128xf32>
    %139 = arith.mulf %125, %138 : vector<8x128xf32>
    %140 = arith.addf %137, %139 : vector<8x128xf32>
    %141 = vector.broadcast %65 : f32 to vector<8x128xf32>
    %142 = arith.mulf %127, %141 : vector<8x128xf32>
    %143 = arith.addf %140, %142 : vector<8x128xf32>
    %144 = arith.mulf %96, %96 : vector<8x128xf32>
    %145 = arith.mulf %98, %98 : vector<8x128xf32>
    %146 = arith.addf %144, %145 : vector<8x128xf32>
    %147 = arith.mulf %100, %100 : vector<8x128xf32>
    %148 = arith.mulf %102, %102 : vector<8x128xf32>
    %149 = arith.addf %147, %148 : vector<8x128xf32>
    %150 = arith.mulf %104, %104 : vector<8x128xf32>
    %151 = arith.mulf %106, %106 : vector<8x128xf32>
    %152 = arith.addf %150, %151 : vector<8x128xf32>
    %153 = vector.broadcast %66 : f32 to vector<8x128xf32>
    %154 = arith.mulf %96, %153 : vector<8x128xf32>
    %155 = vector.broadcast %67 : f32 to vector<8x128xf32>
    %156 = arith.mulf %98, %155 : vector<8x128xf32>
    %157 = arith.addf %154, %156 : vector<8x128xf32>
    %158 = vector.broadcast %90 : f32 to vector<8x128xf32>
    %159 = arith.mulf %157, %158 : vector<8x128xf32>
    %160 = arith.mulf %121, %121 : vector<8x128xf32>
    %161 = vector.broadcast %90 : f32 to vector<8x128xf32>
    %162 = arith.mulf %160, %161 : vector<8x128xf32>
    %cst_28 = arith.constant 0.000000e+00 : f32
    %163 = vector.broadcast %cst_28 : f32 to vector<8x128xf32>
    %164 = arith.cmpf ole, %159, %163 : vector<8x128xf32>
    %cst_29 = arith.constant 1.000000e+00 : f32
    %165 = vector.broadcast %cst_29 : f32 to vector<8x128xf32>
    %166 = arith.cmpf oge, %159, %165 : vector<8x128xf32>
    %167 = arith.select %166, %149, %162 : vector<8x128xi1>, vector<8x128xf32>
    %168 = arith.select %164, %146, %167 : vector<8x128xi1>, vector<8x128xf32>
    %169 = arith.select %86, %149, %168 : vector<8x128xf32>
    %170 = vector.broadcast %68 : f32 to vector<8x128xf32>
    %171 = arith.mulf %96, %170 : vector<8x128xf32>
    %172 = vector.broadcast %69 : f32 to vector<8x128xf32>
    %173 = arith.mulf %98, %172 : vector<8x128xf32>
    %174 = arith.addf %171, %173 : vector<8x128xf32>
    %175 = vector.broadcast %92 : f32 to vector<8x128xf32>
    %176 = arith.mulf %174, %175 : vector<8x128xf32>
    %177 = arith.mulf %116, %116 : vector<8x128xf32>
    %178 = vector.broadcast %92 : f32 to vector<8x128xf32>
    %179 = arith.mulf %177, %178 : vector<8x128xf32>
    %cst_30 = arith.constant 0.000000e+00 : f32
    %180 = vector.broadcast %cst_30 : f32 to vector<8x128xf32>
    %181 = arith.cmpf ole, %176, %180 : vector<8x128xf32>
    %cst_31 = arith.constant 1.000000e+00 : f32
    %182 = vector.broadcast %cst_31 : f32 to vector<8x128xf32>
    %183 = arith.cmpf oge, %176, %182 : vector<8x128xf32>
    %184 = arith.select %183, %152, %179 : vector<8x128xi1>, vector<8x128xf32>
    %185 = arith.select %181, %146, %184 : vector<8x128xi1>, vector<8x128xf32>
    %186 = arith.select %87, %152, %185 : vector<8x128xf32>
    %187 = vector.broadcast %70 : f32 to vector<8x128xf32>
    %188 = arith.mulf %100, %187 : vector<8x128xf32>
    %189 = vector.broadcast %71 : f32 to vector<8x128xf32>
    %190 = arith.mulf %102, %189 : vector<8x128xf32>
    %191 = arith.addf %188, %190 : vector<8x128xf32>
    %192 = vector.broadcast %94 : f32 to vector<8x128xf32>
    %193 = arith.mulf %191, %192 : vector<8x128xf32>
    %194 = arith.mulf %111, %111 : vector<8x128xf32>
    %195 = vector.broadcast %94 : f32 to vector<8x128xf32>
    %196 = arith.mulf %194, %195 : vector<8x128xf32>
    %cst_32 = arith.constant 0.000000e+00 : f32
    %197 = vector.broadcast %cst_32 : f32 to vector<8x128xf32>
    %198 = arith.cmpf ole, %193, %197 : vector<8x128xf32>
    %cst_33 = arith.constant 1.000000e+00 : f32
    %199 = vector.broadcast %cst_33 : f32 to vector<8x128xf32>
    %200 = arith.cmpf oge, %193, %199 : vector<8x128xf32>
    %201 = arith.select %200, %152, %196 : vector<8x128xi1>, vector<8x128xf32>
    %202 = arith.select %198, %149, %201 : vector<8x128xi1>, vector<8x128xf32>
    %203 = arith.select %88, %152, %202 : vector<8x128xf32>
    %204 = arith.minimumf %169, %186 : vector<8x128xf32>
    %205 = arith.minimumf %204, %203 : vector<8x128xf32>
    %206 = math.absf %74 : f32
    %cst_34 = arith.constant 9.99999993E-9 : f32
    %207 = arith.cmpf ogt, %206, %cst_34 : f32
    %cst_35 = arith.constant 0.000000e+00 : f32
    %208 = vector.broadcast %cst_35 : f32 to vector<8x128xf32>
    %209 = arith.cmpf oge, %143, %208 : vector<8x128xf32>
    %210 = arith.andi %135, %209 : vector<8x128xi1>
    %211 = vector.broadcast %207 : i1 to vector<8x128xi1>
    %212 = arith.andi %210, %211 : vector<8x128xi1>
    %213 = arith.cmpf olt, %143, %34 : vector<8x128xf32>
    %214 = arith.andi %212, %213 : vector<8x128xi1>
    %215 = arith.select %214, %143, %34 : vector<8x128xi1>, vector<8x128xf32>
    %216 = vector.broadcast %c0_i32 : i32 to vector<8x128xi32>
    %217 = arith.select %214, %216, %35 : vector<8x128xi1>, vector<8x128xi32>
    %218 = arith.select %214, %123, %33 : vector<8x128xi1>, vector<8x128xf32>
    %219 = arith.select %214, %125, %33 : vector<8x128xi1>, vector<8x128xf32>
    %220 = arith.select %214, %127, %33 : vector<8x128xi1>, vector<8x128xf32>
    %221 = arith.select %214, %205, %33 : vector<8x128xi1>, vector<8x128xf32>
    %c1_i32_36 = arith.constant 1 : i32
    %c9_i32_37 = arith.constant 9 : i32
    %222 = arith.muli %c1_i32_36, %c9_i32_37 : i32
    %223 = arith.addi %36, %222 : i32
    %c0_i32_38 = arith.constant 0 : i32
    %224 = arith.addi %223, %c0_i32_38 : i32
    %225 = arith.index_cast %224 : i32 to index
    %226 = memref.load %arg2[%225] : memref<144xf32, #tpu.memory_space<smem>>
    %c1_i32_39 = arith.constant 1 : i32
    %227 = arith.addi %223, %c1_i32_39 : i32
    %228 = arith.index_cast %227 : i32 to index
    %229 = memref.load %arg2[%228] : memref<144xf32, #tpu.memory_space<smem>>
    %c2_i32_40 = arith.constant 2 : i32
    %230 = arith.addi %223, %c2_i32_40 : i32
    %231 = arith.index_cast %230 : i32 to index
    %232 = memref.load %arg2[%231] : memref<144xf32, #tpu.memory_space<smem>>
    %c3_i32_41 = arith.constant 3 : i32
    %233 = arith.addi %223, %c3_i32_41 : i32
    %234 = arith.index_cast %233 : i32 to index
    %235 = memref.load %arg2[%234] : memref<144xf32, #tpu.memory_space<smem>>
    %c4_i32_42 = arith.constant 4 : i32
    %236 = arith.addi %223, %c4_i32_42 : i32
    %237 = arith.index_cast %236 : i32 to index
    %238 = memref.load %arg2[%237] : memref<144xf32, #tpu.memory_space<smem>>
    %c5_i32_43 = arith.constant 5 : i32
    %239 = arith.addi %223, %c5_i32_43 : i32
    %240 = arith.index_cast %239 : i32 to index
    %241 = memref.load %arg2[%240] : memref<144xf32, #tpu.memory_space<smem>>
    %c6_i32_44 = arith.constant 6 : i32
    %242 = arith.addi %223, %c6_i32_44 : i32
    %243 = arith.index_cast %242 : i32 to index
    %244 = memref.load %arg2[%243] : memref<144xf32, #tpu.memory_space<smem>>
    %c7_i32_45 = arith.constant 7 : i32
    %245 = arith.addi %223, %c7_i32_45 : i32
    %246 = arith.index_cast %245 : i32 to index
    %247 = memref.load %arg2[%246] : memref<144xf32, #tpu.memory_space<smem>>
    %c8_i32_46 = arith.constant 8 : i32
    %248 = arith.addi %223, %c8_i32_46 : i32
    %249 = arith.index_cast %248 : i32 to index
    %250 = memref.load %arg2[%249] : memref<144xf32, #tpu.memory_space<smem>>
    %251 = arith.subf %235, %226 : f32
    %252 = arith.subf %238, %229 : f32
    %253 = arith.subf %244, %226 : f32
    %254 = arith.subf %247, %229 : f32
    %255 = arith.subf %244, %235 : f32
    %256 = arith.subf %247, %238 : f32
    %257 = arith.mulf %253, %252 : f32
    %258 = arith.mulf %254, %251 : f32
    %259 = arith.subf %257, %258 : f32
    %cst_47 = arith.constant 9.99999993E-9 : f32
    %260 = arith.addf %259, %cst_47 : f32
    %cst_48 = arith.constant 1.000000e+00 : f32
    %261 = arith.divf %cst_48, %260 : f32
    %262 = arith.mulf %251, %251 : f32
    %263 = arith.mulf %252, %252 : f32
    %264 = arith.addf %262, %263 : f32
    %265 = arith.mulf %253, %253 : f32
    %266 = arith.mulf %254, %254 : f32
    %267 = arith.addf %265, %266 : f32
    %268 = arith.mulf %255, %255 : f32
    %269 = arith.mulf %256, %256 : f32
    %270 = arith.addf %268, %269 : f32
    %cst_49 = arith.constant 9.99999993E-9 : f32
    %271 = arith.cmpf ole, %264, %cst_49 : f32
    %cst_50 = arith.constant 9.99999993E-9 : f32
    %272 = arith.cmpf ole, %267, %cst_50 : f32
    %cst_51 = arith.constant 9.99999993E-9 : f32
    %273 = arith.cmpf ole, %270, %cst_51 : f32
    %cst_52 = arith.constant 1.000000e+00 : f32
    %274 = arith.select %271, %cst_52, %264 : f32
    %cst_53 = arith.constant 1.000000e+00 : f32
    %275 = arith.divf %cst_53, %274 : f32
    %cst_54 = arith.constant 1.000000e+00 : f32
    %276 = arith.select %272, %cst_54, %267 : f32
    %cst_55 = arith.constant 1.000000e+00 : f32
    %277 = arith.divf %cst_55, %276 : f32
    %cst_56 = arith.constant 1.000000e+00 : f32
    %278 = arith.select %273, %cst_56, %270 : f32
    %cst_57 = arith.constant 1.000000e+00 : f32
    %279 = arith.divf %cst_57, %278 : f32
    %280 = vector.broadcast %226 : f32 to vector<8x128xf32>
    %281 = arith.subf %32, %280 : vector<8x128xf32>
    %282 = vector.broadcast %229 : f32 to vector<8x128xf32>
    %283 = arith.subf %24, %282 : vector<8x128xf32>
    %284 = vector.broadcast %235 : f32 to vector<8x128xf32>
    %285 = arith.subf %32, %284 : vector<8x128xf32>
    %286 = vector.broadcast %238 : f32 to vector<8x128xf32>
    %287 = arith.subf %24, %286 : vector<8x128xf32>
    %288 = vector.broadcast %244 : f32 to vector<8x128xf32>
    %289 = arith.subf %32, %288 : vector<8x128xf32>
    %290 = vector.broadcast %247 : f32 to vector<8x128xf32>
    %291 = arith.subf %24, %290 : vector<8x128xf32>
    %292 = vector.broadcast %256 : f32 to vector<8x128xf32>
    %293 = arith.mulf %285, %292 : vector<8x128xf32>
    %294 = vector.broadcast %255 : f32 to vector<8x128xf32>
    %295 = arith.mulf %287, %294 : vector<8x128xf32>
    %296 = arith.subf %293, %295 : vector<8x128xf32>
    %297 = vector.broadcast %253 : f32 to vector<8x128xf32>
    %298 = arith.mulf %291, %297 : vector<8x128xf32>
    %299 = vector.broadcast %254 : f32 to vector<8x128xf32>
    %300 = arith.mulf %289, %299 : vector<8x128xf32>
    %301 = arith.subf %298, %300 : vector<8x128xf32>
    %302 = vector.broadcast %252 : f32 to vector<8x128xf32>
    %303 = arith.mulf %281, %302 : vector<8x128xf32>
    %304 = vector.broadcast %251 : f32 to vector<8x128xf32>
    %305 = arith.mulf %283, %304 : vector<8x128xf32>
    %306 = arith.subf %303, %305 : vector<8x128xf32>
    %307 = vector.broadcast %261 : f32 to vector<8x128xf32>
    %308 = arith.mulf %296, %307 : vector<8x128xf32>
    %309 = vector.broadcast %261 : f32 to vector<8x128xf32>
    %310 = arith.mulf %301, %309 : vector<8x128xf32>
    %311 = vector.broadcast %261 : f32 to vector<8x128xf32>
    %312 = arith.mulf %306, %311 : vector<8x128xf32>
    %cst_58 = arith.constant 0.000000e+00 : f32
    %313 = vector.broadcast %cst_58 : f32 to vector<8x128xf32>
    %314 = arith.cmpf ogt, %308, %313 : vector<8x128xf32>
    %cst_59 = arith.constant 0.000000e+00 : f32
    %315 = vector.broadcast %cst_59 : f32 to vector<8x128xf32>
    %316 = arith.cmpf ogt, %310, %315 : vector<8x128xf32>
    %317 = arith.andi %314, %316 : vector<8x128xi1>
    %cst_60 = arith.constant 0.000000e+00 : f32
    %318 = vector.broadcast %cst_60 : f32 to vector<8x128xf32>
    %319 = arith.cmpf ogt, %312, %318 : vector<8x128xf32>
    %320 = arith.andi %317, %319 : vector<8x128xi1>
    %321 = vector.broadcast %232 : f32 to vector<8x128xf32>
    %322 = arith.mulf %308, %321 : vector<8x128xf32>
    %323 = vector.broadcast %241 : f32 to vector<8x128xf32>
    %324 = arith.mulf %310, %323 : vector<8x128xf32>
    %325 = arith.addf %322, %324 : vector<8x128xf32>
    %326 = vector.broadcast %250 : f32 to vector<8x128xf32>
    %327 = arith.mulf %312, %326 : vector<8x128xf32>
    %328 = arith.addf %325, %327 : vector<8x128xf32>
    %329 = arith.mulf %281, %281 : vector<8x128xf32>
    %330 = arith.mulf %283, %283 : vector<8x128xf32>
    %331 = arith.addf %329, %330 : vector<8x128xf32>
    %332 = arith.mulf %285, %285 : vector<8x128xf32>
    %333 = arith.mulf %287, %287 : vector<8x128xf32>
    %334 = arith.addf %332, %333 : vector<8x128xf32>
    %335 = arith.mulf %289, %289 : vector<8x128xf32>
    %336 = arith.mulf %291, %291 : vector<8x128xf32>
    %337 = arith.addf %335, %336 : vector<8x128xf32>
    %338 = vector.broadcast %251 : f32 to vector<8x128xf32>
    %339 = arith.mulf %281, %338 : vector<8x128xf32>
    %340 = vector.broadcast %252 : f32 to vector<8x128xf32>
    %341 = arith.mulf %283, %340 : vector<8x128xf32>
    %342 = arith.addf %339, %341 : vector<8x128xf32>
    %343 = vector.broadcast %275 : f32 to vector<8x128xf32>
    %344 = arith.mulf %342, %343 : vector<8x128xf32>
    %345 = arith.mulf %306, %306 : vector<8x128xf32>
    %346 = vector.broadcast %275 : f32 to vector<8x128xf32>
    %347 = arith.mulf %345, %346 : vector<8x128xf32>
    %cst_61 = arith.constant 0.000000e+00 : f32
    %348 = vector.broadcast %cst_61 : f32 to vector<8x128xf32>
    %349 = arith.cmpf ole, %344, %348 : vector<8x128xf32>
    %cst_62 = arith.constant 1.000000e+00 : f32
    %350 = vector.broadcast %cst_62 : f32 to vector<8x128xf32>
    %351 = arith.cmpf oge, %344, %350 : vector<8x128xf32>
    %352 = arith.select %351, %334, %347 : vector<8x128xi1>, vector<8x128xf32>
    %353 = arith.select %349, %331, %352 : vector<8x128xi1>, vector<8x128xf32>
    %354 = arith.select %271, %334, %353 : vector<8x128xf32>
    %355 = vector.broadcast %253 : f32 to vector<8x128xf32>
    %356 = arith.mulf %281, %355 : vector<8x128xf32>
    %357 = vector.broadcast %254 : f32 to vector<8x128xf32>
    %358 = arith.mulf %283, %357 : vector<8x128xf32>
    %359 = arith.addf %356, %358 : vector<8x128xf32>
    %360 = vector.broadcast %277 : f32 to vector<8x128xf32>
    %361 = arith.mulf %359, %360 : vector<8x128xf32>
    %362 = arith.mulf %301, %301 : vector<8x128xf32>
    %363 = vector.broadcast %277 : f32 to vector<8x128xf32>
    %364 = arith.mulf %362, %363 : vector<8x128xf32>
    %cst_63 = arith.constant 0.000000e+00 : f32
    %365 = vector.broadcast %cst_63 : f32 to vector<8x128xf32>
    %366 = arith.cmpf ole, %361, %365 : vector<8x128xf32>
    %cst_64 = arith.constant 1.000000e+00 : f32
    %367 = vector.broadcast %cst_64 : f32 to vector<8x128xf32>
    %368 = arith.cmpf oge, %361, %367 : vector<8x128xf32>
    %369 = arith.select %368, %337, %364 : vector<8x128xi1>, vector<8x128xf32>
    %370 = arith.select %366, %331, %369 : vector<8x128xi1>, vector<8x128xf32>
    %371 = arith.select %272, %337, %370 : vector<8x128xf32>
    %372 = vector.broadcast %255 : f32 to vector<8x128xf32>
    %373 = arith.mulf %285, %372 : vector<8x128xf32>
    %374 = vector.broadcast %256 : f32 to vector<8x128xf32>
    %375 = arith.mulf %287, %374 : vector<8x128xf32>
    %376 = arith.addf %373, %375 : vector<8x128xf32>
    %377 = vector.broadcast %279 : f32 to vector<8x128xf32>
    %378 = arith.mulf %376, %377 : vector<8x128xf32>
    %379 = arith.mulf %296, %296 : vector<8x128xf32>
    %380 = vector.broadcast %279 : f32 to vector<8x128xf32>
    %381 = arith.mulf %379, %380 : vector<8x128xf32>
    %cst_65 = arith.constant 0.000000e+00 : f32
    %382 = vector.broadcast %cst_65 : f32 to vector<8x128xf32>
    %383 = arith.cmpf ole, %378, %382 : vector<8x128xf32>
    %cst_66 = arith.constant 1.000000e+00 : f32
    %384 = vector.broadcast %cst_66 : f32 to vector<8x128xf32>
    %385 = arith.cmpf oge, %378, %384 : vector<8x128xf32>
    %386 = arith.select %385, %337, %381 : vector<8x128xi1>, vector<8x128xf32>
    %387 = arith.select %383, %334, %386 : vector<8x128xi1>, vector<8x128xf32>
    %388 = arith.select %273, %337, %387 : vector<8x128xf32>
    %389 = arith.minimumf %354, %371 : vector<8x128xf32>
    %390 = arith.minimumf %389, %388 : vector<8x128xf32>
    %391 = math.absf %259 : f32
    %cst_67 = arith.constant 9.99999993E-9 : f32
    %392 = arith.cmpf ogt, %391, %cst_67 : f32
    %cst_68 = arith.constant 0.000000e+00 : f32
    %393 = vector.broadcast %cst_68 : f32 to vector<8x128xf32>
    %394 = arith.cmpf oge, %328, %393 : vector<8x128xf32>
    %395 = arith.andi %320, %394 : vector<8x128xi1>
    %396 = vector.broadcast %392 : i1 to vector<8x128xi1>
    %397 = arith.andi %395, %396 : vector<8x128xi1>
    %398 = arith.cmpf olt, %328, %215 : vector<8x128xf32>
    %399 = arith.andi %397, %398 : vector<8x128xi1>
    %400 = arith.select %399, %328, %215 : vector<8x128xi1>, vector<8x128xf32>
    %401 = vector.broadcast %c1_i32_36 : i32 to vector<8x128xi32>
    %402 = arith.select %399, %401, %217 : vector<8x128xi1>, vector<8x128xi32>
    %403 = arith.select %399, %308, %218 : vector<8x128xi1>, vector<8x128xf32>
    %404 = arith.select %399, %310, %219 : vector<8x128xi1>, vector<8x128xf32>
    %405 = arith.select %399, %312, %220 : vector<8x128xi1>, vector<8x128xf32>
    %406 = arith.select %399, %390, %221 : vector<8x128xi1>, vector<8x128xf32>
    %c2_i32_69 = arith.constant 2 : i32
    %c9_i32_70 = arith.constant 9 : i32
    %407 = arith.muli %c2_i32_69, %c9_i32_70 : i32
    %408 = arith.addi %36, %407 : i32
    %c0_i32_71 = arith.constant 0 : i32
    %409 = arith.addi %408, %c0_i32_71 : i32
    %410 = arith.index_cast %409 : i32 to index
    %411 = memref.load %arg2[%410] : memref<144xf32, #tpu.memory_space<smem>>
    %c1_i32_72 = arith.constant 1 : i32
    %412 = arith.addi %408, %c1_i32_72 : i32
    %413 = arith.index_cast %412 : i32 to index
    %414 = memref.load %arg2[%413] : memref<144xf32, #tpu.memory_space<smem>>
    %c2_i32_73 = arith.constant 2 : i32
    %415 = arith.addi %408, %c2_i32_73 : i32
    %416 = arith.index_cast %415 : i32 to index
    %417 = memref.load %arg2[%416] : memref<144xf32, #tpu.memory_space<smem>>
    %c3_i32_74 = arith.constant 3 : i32
    %418 = arith.addi %408, %c3_i32_74 : i32
    %419 = arith.index_cast %418 : i32 to index
    %420 = memref.load %arg2[%419] : memref<144xf32, #tpu.memory_space<smem>>
    %c4_i32_75 = arith.constant 4 : i32
    %421 = arith.addi %408, %c4_i32_75 : i32
    %422 = arith.index_cast %421 : i32 to index
    %423 = memref.load %arg2[%422] : memref<144xf32, #tpu.memory_space<smem>>
    %c5_i32_76 = arith.constant 5 : i32
    %424 = arith.addi %408, %c5_i32_76 : i32
    %425 = arith.index_cast %424 : i32 to index
    %426 = memref.load %arg2[%425] : memref<144xf32, #tpu.memory_space<smem>>
    %c6_i32_77 = arith.constant 6 : i32
    %427 = arith.addi %408, %c6_i32_77 : i32
    %428 = arith.index_cast %427 : i32 to index
    %429 = memref.load %arg2[%428] : memref<144xf32, #tpu.memory_space<smem>>
    %c7_i32_78 = arith.constant 7 : i32
    %430 = arith.addi %408, %c7_i32_78 : i32
    %431 = arith.index_cast %430 : i32 to index
    %432 = memref.load %arg2[%431] : memref<144xf32, #tpu.memory_space<smem>>
    %c8_i32_79 = arith.constant 8 : i32
    %433 = arith.addi %408, %c8_i32_79 : i32
    %434 = arith.index_cast %433 : i32 to index
    %435 = memref.load %arg2[%434] : memref<144xf32, #tpu.memory_space<smem>>
    %436 = arith.subf %420, %411 : f32
    %437 = arith.subf %423, %414 : f32
    %438 = arith.subf %429, %411 : f32
    %439 = arith.subf %432, %414 : f32
    %440 = arith.subf %429, %420 : f32
    %441 = arith.subf %432, %423 : f32
    %442 = arith.mulf %438, %437 : f32
    %443 = arith.mulf %439, %436 : f32
    %444 = arith.subf %442, %443 : f32
    %cst_80 = arith.constant 9.99999993E-9 : f32
    %445 = arith.addf %444, %cst_80 : f32
    %cst_81 = arith.constant 1.000000e+00 : f32
    %446 = arith.divf %cst_81, %445 : f32
    %447 = arith.mulf %436, %436 : f32
    %448 = arith.mulf %437, %437 : f32
    %449 = arith.addf %447, %448 : f32
    %450 = arith.mulf %438, %438 : f32
    %451 = arith.mulf %439, %439 : f32
    %452 = arith.addf %450, %451 : f32
    %453 = arith.mulf %440, %440 : f32
    %454 = arith.mulf %441, %441 : f32
    %455 = arith.addf %453, %454 : f32
    %cst_82 = arith.constant 9.99999993E-9 : f32
    %456 = arith.cmpf ole, %449, %cst_82 : f32
    %cst_83 = arith.constant 9.99999993E-9 : f32
    %457 = arith.cmpf ole, %452, %cst_83 : f32
    %cst_84 = arith.constant 9.99999993E-9 : f32
    %458 = arith.cmpf ole, %455, %cst_84 : f32
    %cst_85 = arith.constant 1.000000e+00 : f32
    %459 = arith.select %456, %cst_85, %449 : f32
    %cst_86 = arith.constant 1.000000e+00 : f32
    %460 = arith.divf %cst_86, %459 : f32
    %cst_87 = arith.constant 1.000000e+00 : f32
    %461 = arith.select %457, %cst_87, %452 : f32
    %cst_88 = arith.constant 1.000000e+00 : f32
    %462 = arith.divf %cst_88, %461 : f32
    %cst_89 = arith.constant 1.000000e+00 : f32
    %463 = arith.select %458, %cst_89, %455 : f32
    %cst_90 = arith.constant 1.000000e+00 : f32
    %464 = arith.divf %cst_90, %463 : f32
    %465 = vector.broadcast %411 : f32 to vector<8x128xf32>
    %466 = arith.subf %32, %465 : vector<8x128xf32>
    %467 = vector.broadcast %414 : f32 to vector<8x128xf32>
    %468 = arith.subf %24, %467 : vector<8x128xf32>
    %469 = vector.broadcast %420 : f32 to vector<8x128xf32>
    %470 = arith.subf %32, %469 : vector<8x128xf32>
    %471 = vector.broadcast %423 : f32 to vector<8x128xf32>
    %472 = arith.subf %24, %471 : vector<8x128xf32>
    %473 = vector.broadcast %429 : f32 to vector<8x128xf32>
    %474 = arith.subf %32, %473 : vector<8x128xf32>
    %475 = vector.broadcast %432 : f32 to vector<8x128xf32>
    %476 = arith.subf %24, %475 : vector<8x128xf32>
    %477 = vector.broadcast %441 : f32 to vector<8x128xf32>
    %478 = arith.mulf %470, %477 : vector<8x128xf32>
    %479 = vector.broadcast %440 : f32 to vector<8x128xf32>
    %480 = arith.mulf %472, %479 : vector<8x128xf32>
    %481 = arith.subf %478, %480 : vector<8x128xf32>
    %482 = vector.broadcast %438 : f32 to vector<8x128xf32>
    %483 = arith.mulf %476, %482 : vector<8x128xf32>
    %484 = vector.broadcast %439 : f32 to vector<8x128xf32>
    %485 = arith.mulf %474, %484 : vector<8x128xf32>
    %486 = arith.subf %483, %485 : vector<8x128xf32>
    %487 = vector.broadcast %437 : f32 to vector<8x128xf32>
    %488 = arith.mulf %466, %487 : vector<8x128xf32>
    %489 = vector.broadcast %436 : f32 to vector<8x128xf32>
    %490 = arith.mulf %468, %489 : vector<8x128xf32>
    %491 = arith.subf %488, %490 : vector<8x128xf32>
    %492 = vector.broadcast %446 : f32 to vector<8x128xf32>
    %493 = arith.mulf %481, %492 : vector<8x128xf32>
    %494 = vector.broadcast %446 : f32 to vector<8x128xf32>
    %495 = arith.mulf %486, %494 : vector<8x128xf32>
    %496 = vector.broadcast %446 : f32 to vector<8x128xf32>
    %497 = arith.mulf %491, %496 : vector<8x128xf32>
    %cst_91 = arith.constant 0.000000e+00 : f32
    %498 = vector.broadcast %cst_91 : f32 to vector<8x128xf32>
    %499 = arith.cmpf ogt, %493, %498 : vector<8x128xf32>
    %cst_92 = arith.constant 0.000000e+00 : f32
    %500 = vector.broadcast %cst_92 : f32 to vector<8x128xf32>
    %501 = arith.cmpf ogt, %495, %500 : vector<8x128xf32>
    %502 = arith.andi %499, %501 : vector<8x128xi1>
    %cst_93 = arith.constant 0.000000e+00 : f32
    %503 = vector.broadcast %cst_93 : f32 to vector<8x128xf32>
    %504 = arith.cmpf ogt, %497, %503 : vector<8x128xf32>
    %505 = arith.andi %502, %504 : vector<8x128xi1>
    %506 = vector.broadcast %417 : f32 to vector<8x128xf32>
    %507 = arith.mulf %493, %506 : vector<8x128xf32>
    %508 = vector.broadcast %426 : f32 to vector<8x128xf32>
    %509 = arith.mulf %495, %508 : vector<8x128xf32>
    %510 = arith.addf %507, %509 : vector<8x128xf32>
    %511 = vector.broadcast %435 : f32 to vector<8x128xf32>
    %512 = arith.mulf %497, %511 : vector<8x128xf32>
    %513 = arith.addf %510, %512 : vector<8x128xf32>
    %514 = arith.mulf %466, %466 : vector<8x128xf32>
    %515 = arith.mulf %468, %468 : vector<8x128xf32>
    %516 = arith.addf %514, %515 : vector<8x128xf32>
    %517 = arith.mulf %470, %470 : vector<8x128xf32>
    %518 = arith.mulf %472, %472 : vector<8x128xf32>
    %519 = arith.addf %517, %518 : vector<8x128xf32>
    %520 = arith.mulf %474, %474 : vector<8x128xf32>
    %521 = arith.mulf %476, %476 : vector<8x128xf32>
    %522 = arith.addf %520, %521 : vector<8x128xf32>
    %523 = vector.broadcast %436 : f32 to vector<8x128xf32>
    %524 = arith.mulf %466, %523 : vector<8x128xf32>
    %525 = vector.broadcast %437 : f32 to vector<8x128xf32>
    %526 = arith.mulf %468, %525 : vector<8x128xf32>
    %527 = arith.addf %524, %526 : vector<8x128xf32>
    %528 = vector.broadcast %460 : f32 to vector<8x128xf32>
    %529 = arith.mulf %527, %528 : vector<8x128xf32>
    %530 = arith.mulf %491, %491 : vector<8x128xf32>
    %531 = vector.broadcast %460 : f32 to vector<8x128xf32>
    %532 = arith.mulf %530, %531 : vector<8x128xf32>
    %cst_94 = arith.constant 0.000000e+00 : f32
    %533 = vector.broadcast %cst_94 : f32 to vector<8x128xf32>
    %534 = arith.cmpf ole, %529, %533 : vector<8x128xf32>
    %cst_95 = arith.constant 1.000000e+00 : f32
    %535 = vector.broadcast %cst_95 : f32 to vector<8x128xf32>
    %536 = arith.cmpf oge, %529, %535 : vector<8x128xf32>
    %537 = arith.select %536, %519, %532 : vector<8x128xi1>, vector<8x128xf32>
    %538 = arith.select %534, %516, %537 : vector<8x128xi1>, vector<8x128xf32>
    %539 = arith.select %456, %519, %538 : vector<8x128xf32>
    %540 = vector.broadcast %438 : f32 to vector<8x128xf32>
    %541 = arith.mulf %466, %540 : vector<8x128xf32>
    %542 = vector.broadcast %439 : f32 to vector<8x128xf32>
    %543 = arith.mulf %468, %542 : vector<8x128xf32>
    %544 = arith.addf %541, %543 : vector<8x128xf32>
    %545 = vector.broadcast %462 : f32 to vector<8x128xf32>
    %546 = arith.mulf %544, %545 : vector<8x128xf32>
    %547 = arith.mulf %486, %486 : vector<8x128xf32>
    %548 = vector.broadcast %462 : f32 to vector<8x128xf32>
    %549 = arith.mulf %547, %548 : vector<8x128xf32>
    %cst_96 = arith.constant 0.000000e+00 : f32
    %550 = vector.broadcast %cst_96 : f32 to vector<8x128xf32>
    %551 = arith.cmpf ole, %546, %550 : vector<8x128xf32>
    %cst_97 = arith.constant 1.000000e+00 : f32
    %552 = vector.broadcast %cst_97 : f32 to vector<8x128xf32>
    %553 = arith.cmpf oge, %546, %552 : vector<8x128xf32>
    %554 = arith.select %553, %522, %549 : vector<8x128xi1>, vector<8x128xf32>
    %555 = arith.select %551, %516, %554 : vector<8x128xi1>, vector<8x128xf32>
    %556 = arith.select %457, %522, %555 : vector<8x128xf32>
    %557 = vector.broadcast %440 : f32 to vector<8x128xf32>
    %558 = arith.mulf %470, %557 : vector<8x128xf32>
    %559 = vector.broadcast %441 : f32 to vector<8x128xf32>
    %560 = arith.mulf %472, %559 : vector<8x128xf32>
    %561 = arith.addf %558, %560 : vector<8x128xf32>
    %562 = vector.broadcast %464 : f32 to vector<8x128xf32>
    %563 = arith.mulf %561, %562 : vector<8x128xf32>
    %564 = arith.mulf %481, %481 : vector<8x128xf32>
    %565 = vector.broadcast %464 : f32 to vector<8x128xf32>
    %566 = arith.mulf %564, %565 : vector<8x128xf32>
    %cst_98 = arith.constant 0.000000e+00 : f32
    %567 = vector.broadcast %cst_98 : f32 to vector<8x128xf32>
    %568 = arith.cmpf ole, %563, %567 : vector<8x128xf32>
    %cst_99 = arith.constant 1.000000e+00 : f32
    %569 = vector.broadcast %cst_99 : f32 to vector<8x128xf32>
    %570 = arith.cmpf oge, %563, %569 : vector<8x128xf32>
    %571 = arith.select %570, %522, %566 : vector<8x128xi1>, vector<8x128xf32>
    %572 = arith.select %568, %519, %571 : vector<8x128xi1>, vector<8x128xf32>
    %573 = arith.select %458, %522, %572 : vector<8x128xf32>
    %574 = arith.minimumf %539, %556 : vector<8x128xf32>
    %575 = arith.minimumf %574, %573 : vector<8x128xf32>
    %576 = math.absf %444 : f32
    %cst_100 = arith.constant 9.99999993E-9 : f32
    %577 = arith.cmpf ogt, %576, %cst_100 : f32
    %cst_101 = arith.constant 0.000000e+00 : f32
    %578 = vector.broadcast %cst_101 : f32 to vector<8x128xf32>
    %579 = arith.cmpf oge, %513, %578 : vector<8x128xf32>
    %580 = arith.andi %505, %579 : vector<8x128xi1>
    %581 = vector.broadcast %577 : i1 to vector<8x128xi1>
    %582 = arith.andi %580, %581 : vector<8x128xi1>
    %583 = arith.cmpf olt, %513, %400 : vector<8x128xf32>
    %584 = arith.andi %582, %583 : vector<8x128xi1>
    %585 = arith.select %584, %513, %400 : vector<8x128xi1>, vector<8x128xf32>
    %586 = vector.broadcast %c2_i32_69 : i32 to vector<8x128xi32>
    %587 = arith.select %584, %586, %402 : vector<8x128xi1>, vector<8x128xi32>
    %588 = arith.select %584, %493, %403 : vector<8x128xi1>, vector<8x128xf32>
    %589 = arith.select %584, %495, %404 : vector<8x128xi1>, vector<8x128xf32>
    %590 = arith.select %584, %497, %405 : vector<8x128xi1>, vector<8x128xf32>
    %591 = arith.select %584, %575, %406 : vector<8x128xi1>, vector<8x128xf32>
    %c3_i32_102 = arith.constant 3 : i32
    %c9_i32_103 = arith.constant 9 : i32
    %592 = arith.muli %c3_i32_102, %c9_i32_103 : i32
    %593 = arith.addi %36, %592 : i32
    %c0_i32_104 = arith.constant 0 : i32
    %594 = arith.addi %593, %c0_i32_104 : i32
    %595 = arith.index_cast %594 : i32 to index
    %596 = memref.load %arg2[%595] : memref<144xf32, #tpu.memory_space<smem>>
    %c1_i32_105 = arith.constant 1 : i32
    %597 = arith.addi %593, %c1_i32_105 : i32
    %598 = arith.index_cast %597 : i32 to index
    %599 = memref.load %arg2[%598] : memref<144xf32, #tpu.memory_space<smem>>
    %c2_i32_106 = arith.constant 2 : i32
    %600 = arith.addi %593, %c2_i32_106 : i32
    %601 = arith.index_cast %600 : i32 to index
    %602 = memref.load %arg2[%601] : memref<144xf32, #tpu.memory_space<smem>>
    %c3_i32_107 = arith.constant 3 : i32
    %603 = arith.addi %593, %c3_i32_107 : i32
    %604 = arith.index_cast %603 : i32 to index
    %605 = memref.load %arg2[%604] : memref<144xf32, #tpu.memory_space<smem>>
    %c4_i32_108 = arith.constant 4 : i32
    %606 = arith.addi %593, %c4_i32_108 : i32
    %607 = arith.index_cast %606 : i32 to index
    %608 = memref.load %arg2[%607] : memref<144xf32, #tpu.memory_space<smem>>
    %c5_i32_109 = arith.constant 5 : i32
    %609 = arith.addi %593, %c5_i32_109 : i32
    %610 = arith.index_cast %609 : i32 to index
    %611 = memref.load %arg2[%610] : memref<144xf32, #tpu.memory_space<smem>>
    %c6_i32_110 = arith.constant 6 : i32
    %612 = arith.addi %593, %c6_i32_110 : i32
    %613 = arith.index_cast %612 : i32 to index
    %614 = memref.load %arg2[%613] : memref<144xf32, #tpu.memory_space<smem>>
    %c7_i32_111 = arith.constant 7 : i32
    %615 = arith.addi %593, %c7_i32_111 : i32
    %616 = arith.index_cast %615 : i32 to index
    %617 = memref.load %arg2[%616] : memref<144xf32, #tpu.memory_space<smem>>
    %c8_i32_112 = arith.constant 8 : i32
    %618 = arith.addi %593, %c8_i32_112 : i32
    %619 = arith.index_cast %618 : i32 to index
    %620 = memref.load %arg2[%619] : memref<144xf32, #tpu.memory_space<smem>>
    %621 = arith.subf %605, %596 : f32
    %622 = arith.subf %608, %599 : f32
    %623 = arith.subf %614, %596 : f32
    %624 = arith.subf %617, %599 : f32
    %625 = arith.subf %614, %605 : f32
    %626 = arith.subf %617, %608 : f32
    %627 = arith.mulf %623, %622 : f32
    %628 = arith.mulf %624, %621 : f32
    %629 = arith.subf %627, %628 : f32
    %cst_113 = arith.constant 9.99999993E-9 : f32
    %630 = arith.addf %629, %cst_113 : f32
    %cst_114 = arith.constant 1.000000e+00 : f32
    %631 = arith.divf %cst_114, %630 : f32
    %632 = arith.mulf %621, %621 : f32
    %633 = arith.mulf %622, %622 : f32
    %634 = arith.addf %632, %633 : f32
    %635 = arith.mulf %623, %623 : f32
    %636 = arith.mulf %624, %624 : f32
    %637 = arith.addf %635, %636 : f32
    %638 = arith.mulf %625, %625 : f32
    %639 = arith.mulf %626, %626 : f32
    %640 = arith.addf %638, %639 : f32
    %cst_115 = arith.constant 9.99999993E-9 : f32
    %641 = arith.cmpf ole, %634, %cst_115 : f32
    %cst_116 = arith.constant 9.99999993E-9 : f32
    %642 = arith.cmpf ole, %637, %cst_116 : f32
    %cst_117 = arith.constant 9.99999993E-9 : f32
    %643 = arith.cmpf ole, %640, %cst_117 : f32
    %cst_118 = arith.constant 1.000000e+00 : f32
    %644 = arith.select %641, %cst_118, %634 : f32
    %cst_119 = arith.constant 1.000000e+00 : f32
    %645 = arith.divf %cst_119, %644 : f32
    %cst_120 = arith.constant 1.000000e+00 : f32
    %646 = arith.select %642, %cst_120, %637 : f32
    %cst_121 = arith.constant 1.000000e+00 : f32
    %647 = arith.divf %cst_121, %646 : f32
    %cst_122 = arith.constant 1.000000e+00 : f32
    %648 = arith.select %643, %cst_122, %640 : f32
    %cst_123 = arith.constant 1.000000e+00 : f32
    %649 = arith.divf %cst_123, %648 : f32
    %650 = vector.broadcast %596 : f32 to vector<8x128xf32>
    %651 = arith.subf %32, %650 : vector<8x128xf32>
    %652 = vector.broadcast %599 : f32 to vector<8x128xf32>
    %653 = arith.subf %24, %652 : vector<8x128xf32>
    %654 = vector.broadcast %605 : f32 to vector<8x128xf32>
    %655 = arith.subf %32, %654 : vector<8x128xf32>
    %656 = vector.broadcast %608 : f32 to vector<8x128xf32>
    %657 = arith.subf %24, %656 : vector<8x128xf32>
    %658 = vector.broadcast %614 : f32 to vector<8x128xf32>
    %659 = arith.subf %32, %658 : vector<8x128xf32>
    %660 = vector.broadcast %617 : f32 to vector<8x128xf32>
    %661 = arith.subf %24, %660 : vector<8x128xf32>
    %662 = vector.broadcast %626 : f32 to vector<8x128xf32>
    %663 = arith.mulf %655, %662 : vector<8x128xf32>
    %664 = vector.broadcast %625 : f32 to vector<8x128xf32>
    %665 = arith.mulf %657, %664 : vector<8x128xf32>
    %666 = arith.subf %663, %665 : vector<8x128xf32>
    %667 = vector.broadcast %623 : f32 to vector<8x128xf32>
    %668 = arith.mulf %661, %667 : vector<8x128xf32>
    %669 = vector.broadcast %624 : f32 to vector<8x128xf32>
    %670 = arith.mulf %659, %669 : vector<8x128xf32>
    %671 = arith.subf %668, %670 : vector<8x128xf32>
    %672 = vector.broadcast %622 : f32 to vector<8x128xf32>
    %673 = arith.mulf %651, %672 : vector<8x128xf32>
    %674 = vector.broadcast %621 : f32 to vector<8x128xf32>
    %675 = arith.mulf %653, %674 : vector<8x128xf32>
    %676 = arith.subf %673, %675 : vector<8x128xf32>
    %677 = vector.broadcast %631 : f32 to vector<8x128xf32>
    %678 = arith.mulf %666, %677 : vector<8x128xf32>
    %679 = vector.broadcast %631 : f32 to vector<8x128xf32>
    %680 = arith.mulf %671, %679 : vector<8x128xf32>
    %681 = vector.broadcast %631 : f32 to vector<8x128xf32>
    %682 = arith.mulf %676, %681 : vector<8x128xf32>
    %cst_124 = arith.constant 0.000000e+00 : f32
    %683 = vector.broadcast %cst_124 : f32 to vector<8x128xf32>
    %684 = arith.cmpf ogt, %678, %683 : vector<8x128xf32>
    %cst_125 = arith.constant 0.000000e+00 : f32
    %685 = vector.broadcast %cst_125 : f32 to vector<8x128xf32>
    %686 = arith.cmpf ogt, %680, %685 : vector<8x128xf32>
    %687 = arith.andi %684, %686 : vector<8x128xi1>
    %cst_126 = arith.constant 0.000000e+00 : f32
    %688 = vector.broadcast %cst_126 : f32 to vector<8x128xf32>
    %689 = arith.cmpf ogt, %682, %688 : vector<8x128xf32>
    %690 = arith.andi %687, %689 : vector<8x128xi1>
    %691 = vector.broadcast %602 : f32 to vector<8x128xf32>
    %692 = arith.mulf %678, %691 : vector<8x128xf32>
    %693 = vector.broadcast %611 : f32 to vector<8x128xf32>
    %694 = arith.mulf %680, %693 : vector<8x128xf32>
    %695 = arith.addf %692, %694 : vector<8x128xf32>
    %696 = vector.broadcast %620 : f32 to vector<8x128xf32>
    %697 = arith.mulf %682, %696 : vector<8x128xf32>
    %698 = arith.addf %695, %697 : vector<8x128xf32>
    %699 = arith.mulf %651, %651 : vector<8x128xf32>
    %700 = arith.mulf %653, %653 : vector<8x128xf32>
    %701 = arith.addf %699, %700 : vector<8x128xf32>
    %702 = arith.mulf %655, %655 : vector<8x128xf32>
    %703 = arith.mulf %657, %657 : vector<8x128xf32>
    %704 = arith.addf %702, %703 : vector<8x128xf32>
    %705 = arith.mulf %659, %659 : vector<8x128xf32>
    %706 = arith.mulf %661, %661 : vector<8x128xf32>
    %707 = arith.addf %705, %706 : vector<8x128xf32>
    %708 = vector.broadcast %621 : f32 to vector<8x128xf32>
    %709 = arith.mulf %651, %708 : vector<8x128xf32>
    %710 = vector.broadcast %622 : f32 to vector<8x128xf32>
    %711 = arith.mulf %653, %710 : vector<8x128xf32>
    %712 = arith.addf %709, %711 : vector<8x128xf32>
    %713 = vector.broadcast %645 : f32 to vector<8x128xf32>
    %714 = arith.mulf %712, %713 : vector<8x128xf32>
    %715 = arith.mulf %676, %676 : vector<8x128xf32>
    %716 = vector.broadcast %645 : f32 to vector<8x128xf32>
    %717 = arith.mulf %715, %716 : vector<8x128xf32>
    %cst_127 = arith.constant 0.000000e+00 : f32
    %718 = vector.broadcast %cst_127 : f32 to vector<8x128xf32>
    %719 = arith.cmpf ole, %714, %718 : vector<8x128xf32>
    %cst_128 = arith.constant 1.000000e+00 : f32
    %720 = vector.broadcast %cst_128 : f32 to vector<8x128xf32>
    %721 = arith.cmpf oge, %714, %720 : vector<8x128xf32>
    %722 = arith.select %721, %704, %717 : vector<8x128xi1>, vector<8x128xf32>
    %723 = arith.select %719, %701, %722 : vector<8x128xi1>, vector<8x128xf32>
    %724 = arith.select %641, %704, %723 : vector<8x128xf32>
    %725 = vector.broadcast %623 : f32 to vector<8x128xf32>
    %726 = arith.mulf %651, %725 : vector<8x128xf32>
    %727 = vector.broadcast %624 : f32 to vector<8x128xf32>
    %728 = arith.mulf %653, %727 : vector<8x128xf32>
    %729 = arith.addf %726, %728 : vector<8x128xf32>
    %730 = vector.broadcast %647 : f32 to vector<8x128xf32>
    %731 = arith.mulf %729, %730 : vector<8x128xf32>
    %732 = arith.mulf %671, %671 : vector<8x128xf32>
    %733 = vector.broadcast %647 : f32 to vector<8x128xf32>
    %734 = arith.mulf %732, %733 : vector<8x128xf32>
    %cst_129 = arith.constant 0.000000e+00 : f32
    %735 = vector.broadcast %cst_129 : f32 to vector<8x128xf32>
    %736 = arith.cmpf ole, %731, %735 : vector<8x128xf32>
    %cst_130 = arith.constant 1.000000e+00 : f32
    %737 = vector.broadcast %cst_130 : f32 to vector<8x128xf32>
    %738 = arith.cmpf oge, %731, %737 : vector<8x128xf32>
    %739 = arith.select %738, %707, %734 : vector<8x128xi1>, vector<8x128xf32>
    %740 = arith.select %736, %701, %739 : vector<8x128xi1>, vector<8x128xf32>
    %741 = arith.select %642, %707, %740 : vector<8x128xf32>
    %742 = vector.broadcast %625 : f32 to vector<8x128xf32>
    %743 = arith.mulf %655, %742 : vector<8x128xf32>
    %744 = vector.broadcast %626 : f32 to vector<8x128xf32>
    %745 = arith.mulf %657, %744 : vector<8x128xf32>
    %746 = arith.addf %743, %745 : vector<8x128xf32>
    %747 = vector.broadcast %649 : f32 to vector<8x128xf32>
    %748 = arith.mulf %746, %747 : vector<8x128xf32>
    %749 = arith.mulf %666, %666 : vector<8x128xf32>
    %750 = vector.broadcast %649 : f32 to vector<8x128xf32>
    %751 = arith.mulf %749, %750 : vector<8x128xf32>
    %cst_131 = arith.constant 0.000000e+00 : f32
    %752 = vector.broadcast %cst_131 : f32 to vector<8x128xf32>
    %753 = arith.cmpf ole, %748, %752 : vector<8x128xf32>
    %cst_132 = arith.constant 1.000000e+00 : f32
    %754 = vector.broadcast %cst_132 : f32 to vector<8x128xf32>
    %755 = arith.cmpf oge, %748, %754 : vector<8x128xf32>
    %756 = arith.select %755, %707, %751 : vector<8x128xi1>, vector<8x128xf32>
    %757 = arith.select %753, %704, %756 : vector<8x128xi1>, vector<8x128xf32>
    %758 = arith.select %643, %707, %757 : vector<8x128xf32>
    %759 = arith.minimumf %724, %741 : vector<8x128xf32>
    %760 = arith.minimumf %759, %758 : vector<8x128xf32>
    %761 = math.absf %629 : f32
    %cst_133 = arith.constant 9.99999993E-9 : f32
    %762 = arith.cmpf ogt, %761, %cst_133 : f32
    %cst_134 = arith.constant 0.000000e+00 : f32
    %763 = vector.broadcast %cst_134 : f32 to vector<8x128xf32>
    %764 = arith.cmpf oge, %698, %763 : vector<8x128xf32>
    %765 = arith.andi %690, %764 : vector<8x128xi1>
    %766 = vector.broadcast %762 : i1 to vector<8x128xi1>
    %767 = arith.andi %765, %766 : vector<8x128xi1>
    %768 = arith.cmpf olt, %698, %585 : vector<8x128xf32>
    %769 = arith.andi %767, %768 : vector<8x128xi1>
    %770 = arith.select %769, %698, %585 : vector<8x128xi1>, vector<8x128xf32>
    %771 = vector.broadcast %c3_i32_102 : i32 to vector<8x128xi32>
    %772 = arith.select %769, %771, %587 : vector<8x128xi1>, vector<8x128xi32>
    %773 = arith.select %769, %678, %588 : vector<8x128xi1>, vector<8x128xf32>
    %774 = arith.select %769, %680, %589 : vector<8x128xi1>, vector<8x128xf32>
    %775 = arith.select %769, %682, %590 : vector<8x128xi1>, vector<8x128xf32>
    %776 = arith.select %769, %760, %591 : vector<8x128xi1>, vector<8x128xf32>
    %c4_i32_135 = arith.constant 4 : i32
    %c9_i32_136 = arith.constant 9 : i32
    %777 = arith.muli %c4_i32_135, %c9_i32_136 : i32
    %778 = arith.addi %36, %777 : i32
    %c0_i32_137 = arith.constant 0 : i32
    %779 = arith.addi %778, %c0_i32_137 : i32
    %780 = arith.index_cast %779 : i32 to index
    %781 = memref.load %arg2[%780] : memref<144xf32, #tpu.memory_space<smem>>
    %c1_i32_138 = arith.constant 1 : i32
    %782 = arith.addi %778, %c1_i32_138 : i32
    %783 = arith.index_cast %782 : i32 to index
    %784 = memref.load %arg2[%783] : memref<144xf32, #tpu.memory_space<smem>>
    %c2_i32_139 = arith.constant 2 : i32
    %785 = arith.addi %778, %c2_i32_139 : i32
    %786 = arith.index_cast %785 : i32 to index
    %787 = memref.load %arg2[%786] : memref<144xf32, #tpu.memory_space<smem>>
    %c3_i32_140 = arith.constant 3 : i32
    %788 = arith.addi %778, %c3_i32_140 : i32
    %789 = arith.index_cast %788 : i32 to index
    %790 = memref.load %arg2[%789] : memref<144xf32, #tpu.memory_space<smem>>
    %c4_i32_141 = arith.constant 4 : i32
    %791 = arith.addi %778, %c4_i32_141 : i32
    %792 = arith.index_cast %791 : i32 to index
    %793 = memref.load %arg2[%792] : memref<144xf32, #tpu.memory_space<smem>>
    %c5_i32_142 = arith.constant 5 : i32
    %794 = arith.addi %778, %c5_i32_142 : i32
    %795 = arith.index_cast %794 : i32 to index
    %796 = memref.load %arg2[%795] : memref<144xf32, #tpu.memory_space<smem>>
    %c6_i32_143 = arith.constant 6 : i32
    %797 = arith.addi %778, %c6_i32_143 : i32
    %798 = arith.index_cast %797 : i32 to index
    %799 = memref.load %arg2[%798] : memref<144xf32, #tpu.memory_space<smem>>
    %c7_i32_144 = arith.constant 7 : i32
    %800 = arith.addi %778, %c7_i32_144 : i32
    %801 = arith.index_cast %800 : i32 to index
    %802 = memref.load %arg2[%801] : memref<144xf32, #tpu.memory_space<smem>>
    %c8_i32_145 = arith.constant 8 : i32
    %803 = arith.addi %778, %c8_i32_145 : i32
    %804 = arith.index_cast %803 : i32 to index
    %805 = memref.load %arg2[%804] : memref<144xf32, #tpu.memory_space<smem>>
    %806 = arith.subf %790, %781 : f32
    %807 = arith.subf %793, %784 : f32
    %808 = arith.subf %799, %781 : f32
    %809 = arith.subf %802, %784 : f32
    %810 = arith.subf %799, %790 : f32
    %811 = arith.subf %802, %793 : f32
    %812 = arith.mulf %808, %807 : f32
    %813 = arith.mulf %809, %806 : f32
    %814 = arith.subf %812, %813 : f32
    %cst_146 = arith.constant 9.99999993E-9 : f32
    %815 = arith.addf %814, %cst_146 : f32
    %cst_147 = arith.constant 1.000000e+00 : f32
    %816 = arith.divf %cst_147, %815 : f32
    %817 = arith.mulf %806, %806 : f32
    %818 = arith.mulf %807, %807 : f32
    %819 = arith.addf %817, %818 : f32
    %820 = arith.mulf %808, %808 : f32
    %821 = arith.mulf %809, %809 : f32
    %822 = arith.addf %820, %821 : f32
    %823 = arith.mulf %810, %810 : f32
    %824 = arith.mulf %811, %811 : f32
    %825 = arith.addf %823, %824 : f32
    %cst_148 = arith.constant 9.99999993E-9 : f32
    %826 = arith.cmpf ole, %819, %cst_148 : f32
    %cst_149 = arith.constant 9.99999993E-9 : f32
    %827 = arith.cmpf ole, %822, %cst_149 : f32
    %cst_150 = arith.constant 9.99999993E-9 : f32
    %828 = arith.cmpf ole, %825, %cst_150 : f32
    %cst_151 = arith.constant 1.000000e+00 : f32
    %829 = arith.select %826, %cst_151, %819 : f32
    %cst_152 = arith.constant 1.000000e+00 : f32
    %830 = arith.divf %cst_152, %829 : f32
    %cst_153 = arith.constant 1.000000e+00 : f32
    %831 = arith.select %827, %cst_153, %822 : f32
    %cst_154 = arith.constant 1.000000e+00 : f32
    %832 = arith.divf %cst_154, %831 : f32
    %cst_155 = arith.constant 1.000000e+00 : f32
    %833 = arith.select %828, %cst_155, %825 : f32
    %cst_156 = arith.constant 1.000000e+00 : f32
    %834 = arith.divf %cst_156, %833 : f32
    %835 = vector.broadcast %781 : f32 to vector<8x128xf32>
    %836 = arith.subf %32, %835 : vector<8x128xf32>
    %837 = vector.broadcast %784 : f32 to vector<8x128xf32>
    %838 = arith.subf %24, %837 : vector<8x128xf32>
    %839 = vector.broadcast %790 : f32 to vector<8x128xf32>
    %840 = arith.subf %32, %839 : vector<8x128xf32>
    %841 = vector.broadcast %793 : f32 to vector<8x128xf32>
    %842 = arith.subf %24, %841 : vector<8x128xf32>
    %843 = vector.broadcast %799 : f32 to vector<8x128xf32>
    %844 = arith.subf %32, %843 : vector<8x128xf32>
    %845 = vector.broadcast %802 : f32 to vector<8x128xf32>
    %846 = arith.subf %24, %845 : vector<8x128xf32>
    %847 = vector.broadcast %811 : f32 to vector<8x128xf32>
    %848 = arith.mulf %840, %847 : vector<8x128xf32>
    %849 = vector.broadcast %810 : f32 to vector<8x128xf32>
    %850 = arith.mulf %842, %849 : vector<8x128xf32>
    %851 = arith.subf %848, %850 : vector<8x128xf32>
    %852 = vector.broadcast %808 : f32 to vector<8x128xf32>
    %853 = arith.mulf %846, %852 : vector<8x128xf32>
    %854 = vector.broadcast %809 : f32 to vector<8x128xf32>
    %855 = arith.mulf %844, %854 : vector<8x128xf32>
    %856 = arith.subf %853, %855 : vector<8x128xf32>
    %857 = vector.broadcast %807 : f32 to vector<8x128xf32>
    %858 = arith.mulf %836, %857 : vector<8x128xf32>
    %859 = vector.broadcast %806 : f32 to vector<8x128xf32>
    %860 = arith.mulf %838, %859 : vector<8x128xf32>
    %861 = arith.subf %858, %860 : vector<8x128xf32>
    %862 = vector.broadcast %816 : f32 to vector<8x128xf32>
    %863 = arith.mulf %851, %862 : vector<8x128xf32>
    %864 = vector.broadcast %816 : f32 to vector<8x128xf32>
    %865 = arith.mulf %856, %864 : vector<8x128xf32>
    %866 = vector.broadcast %816 : f32 to vector<8x128xf32>
    %867 = arith.mulf %861, %866 : vector<8x128xf32>
    %cst_157 = arith.constant 0.000000e+00 : f32
    %868 = vector.broadcast %cst_157 : f32 to vector<8x128xf32>
    %869 = arith.cmpf ogt, %863, %868 : vector<8x128xf32>
    %cst_158 = arith.constant 0.000000e+00 : f32
    %870 = vector.broadcast %cst_158 : f32 to vector<8x128xf32>
    %871 = arith.cmpf ogt, %865, %870 : vector<8x128xf32>
    %872 = arith.andi %869, %871 : vector<8x128xi1>
    %cst_159 = arith.constant 0.000000e+00 : f32
    %873 = vector.broadcast %cst_159 : f32 to vector<8x128xf32>
    %874 = arith.cmpf ogt, %867, %873 : vector<8x128xf32>
    %875 = arith.andi %872, %874 : vector<8x128xi1>
    %876 = vector.broadcast %787 : f32 to vector<8x128xf32>
    %877 = arith.mulf %863, %876 : vector<8x128xf32>
    %878 = vector.broadcast %796 : f32 to vector<8x128xf32>
    %879 = arith.mulf %865, %878 : vector<8x128xf32>
    %880 = arith.addf %877, %879 : vector<8x128xf32>
    %881 = vector.broadcast %805 : f32 to vector<8x128xf32>
    %882 = arith.mulf %867, %881 : vector<8x128xf32>
    %883 = arith.addf %880, %882 : vector<8x128xf32>
    %884 = arith.mulf %836, %836 : vector<8x128xf32>
    %885 = arith.mulf %838, %838 : vector<8x128xf32>
    %886 = arith.addf %884, %885 : vector<8x128xf32>
    %887 = arith.mulf %840, %840 : vector<8x128xf32>
    %888 = arith.mulf %842, %842 : vector<8x128xf32>
    %889 = arith.addf %887, %888 : vector<8x128xf32>
    %890 = arith.mulf %844, %844 : vector<8x128xf32>
    %891 = arith.mulf %846, %846 : vector<8x128xf32>
    %892 = arith.addf %890, %891 : vector<8x128xf32>
    %893 = vector.broadcast %806 : f32 to vector<8x128xf32>
    %894 = arith.mulf %836, %893 : vector<8x128xf32>
    %895 = vector.broadcast %807 : f32 to vector<8x128xf32>
    %896 = arith.mulf %838, %895 : vector<8x128xf32>
    %897 = arith.addf %894, %896 : vector<8x128xf32>
    %898 = vector.broadcast %830 : f32 to vector<8x128xf32>
    %899 = arith.mulf %897, %898 : vector<8x128xf32>
    %900 = arith.mulf %861, %861 : vector<8x128xf32>
    %901 = vector.broadcast %830 : f32 to vector<8x128xf32>
    %902 = arith.mulf %900, %901 : vector<8x128xf32>
    %cst_160 = arith.constant 0.000000e+00 : f32
    %903 = vector.broadcast %cst_160 : f32 to vector<8x128xf32>
    %904 = arith.cmpf ole, %899, %903 : vector<8x128xf32>
    %cst_161 = arith.constant 1.000000e+00 : f32
    %905 = vector.broadcast %cst_161 : f32 to vector<8x128xf32>
    %906 = arith.cmpf oge, %899, %905 : vector<8x128xf32>
    %907 = arith.select %906, %889, %902 : vector<8x128xi1>, vector<8x128xf32>
    %908 = arith.select %904, %886, %907 : vector<8x128xi1>, vector<8x128xf32>
    %909 = arith.select %826, %889, %908 : vector<8x128xf32>
    %910 = vector.broadcast %808 : f32 to vector<8x128xf32>
    %911 = arith.mulf %836, %910 : vector<8x128xf32>
    %912 = vector.broadcast %809 : f32 to vector<8x128xf32>
    %913 = arith.mulf %838, %912 : vector<8x128xf32>
    %914 = arith.addf %911, %913 : vector<8x128xf32>
    %915 = vector.broadcast %832 : f32 to vector<8x128xf32>
    %916 = arith.mulf %914, %915 : vector<8x128xf32>
    %917 = arith.mulf %856, %856 : vector<8x128xf32>
    %918 = vector.broadcast %832 : f32 to vector<8x128xf32>
    %919 = arith.mulf %917, %918 : vector<8x128xf32>
    %cst_162 = arith.constant 0.000000e+00 : f32
    %920 = vector.broadcast %cst_162 : f32 to vector<8x128xf32>
    %921 = arith.cmpf ole, %916, %920 : vector<8x128xf32>
    %cst_163 = arith.constant 1.000000e+00 : f32
    %922 = vector.broadcast %cst_163 : f32 to vector<8x128xf32>
    %923 = arith.cmpf oge, %916, %922 : vector<8x128xf32>
    %924 = arith.select %923, %892, %919 : vector<8x128xi1>, vector<8x128xf32>
    %925 = arith.select %921, %886, %924 : vector<8x128xi1>, vector<8x128xf32>
    %926 = arith.select %827, %892, %925 : vector<8x128xf32>
    %927 = vector.broadcast %810 : f32 to vector<8x128xf32>
    %928 = arith.mulf %840, %927 : vector<8x128xf32>
    %929 = vector.broadcast %811 : f32 to vector<8x128xf32>
    %930 = arith.mulf %842, %929 : vector<8x128xf32>
    %931 = arith.addf %928, %930 : vector<8x128xf32>
    %932 = vector.broadcast %834 : f32 to vector<8x128xf32>
    %933 = arith.mulf %931, %932 : vector<8x128xf32>
    %934 = arith.mulf %851, %851 : vector<8x128xf32>
    %935 = vector.broadcast %834 : f32 to vector<8x128xf32>
    %936 = arith.mulf %934, %935 : vector<8x128xf32>
    %cst_164 = arith.constant 0.000000e+00 : f32
    %937 = vector.broadcast %cst_164 : f32 to vector<8x128xf32>
    %938 = arith.cmpf ole, %933, %937 : vector<8x128xf32>
    %cst_165 = arith.constant 1.000000e+00 : f32
    %939 = vector.broadcast %cst_165 : f32 to vector<8x128xf32>
    %940 = arith.cmpf oge, %933, %939 : vector<8x128xf32>
    %941 = arith.select %940, %892, %936 : vector<8x128xi1>, vector<8x128xf32>
    %942 = arith.select %938, %889, %941 : vector<8x128xi1>, vector<8x128xf32>
    %943 = arith.select %828, %892, %942 : vector<8x128xf32>
    %944 = arith.minimumf %909, %926 : vector<8x128xf32>
    %945 = arith.minimumf %944, %943 : vector<8x128xf32>
    %946 = math.absf %814 : f32
    %cst_166 = arith.constant 9.99999993E-9 : f32
    %947 = arith.cmpf ogt, %946, %cst_166 : f32
    %cst_167 = arith.constant 0.000000e+00 : f32
    %948 = vector.broadcast %cst_167 : f32 to vector<8x128xf32>
    %949 = arith.cmpf oge, %883, %948 : vector<8x128xf32>
    %950 = arith.andi %875, %949 : vector<8x128xi1>
    %951 = vector.broadcast %947 : i1 to vector<8x128xi1>
    %952 = arith.andi %950, %951 : vector<8x128xi1>
    %953 = arith.cmpf olt, %883, %770 : vector<8x128xf32>
    %954 = arith.andi %952, %953 : vector<8x128xi1>
    %955 = arith.select %954, %883, %770 : vector<8x128xi1>, vector<8x128xf32>
    %956 = vector.broadcast %c4_i32_135 : i32 to vector<8x128xi32>
    %957 = arith.select %954, %956, %772 : vector<8x128xi1>, vector<8x128xi32>
    %958 = arith.select %954, %863, %773 : vector<8x128xi1>, vector<8x128xf32>
    %959 = arith.select %954, %865, %774 : vector<8x128xi1>, vector<8x128xf32>
    %960 = arith.select %954, %867, %775 : vector<8x128xi1>, vector<8x128xf32>
    %961 = arith.select %954, %945, %776 : vector<8x128xi1>, vector<8x128xf32>
    %c5_i32_168 = arith.constant 5 : i32
    %c9_i32_169 = arith.constant 9 : i32
    %962 = arith.muli %c5_i32_168, %c9_i32_169 : i32
    %963 = arith.addi %36, %962 : i32
    %c0_i32_170 = arith.constant 0 : i32
    %964 = arith.addi %963, %c0_i32_170 : i32
    %965 = arith.index_cast %964 : i32 to index
    %966 = memref.load %arg2[%965] : memref<144xf32, #tpu.memory_space<smem>>
    %c1_i32_171 = arith.constant 1 : i32
    %967 = arith.addi %963, %c1_i32_171 : i32
    %968 = arith.index_cast %967 : i32 to index
    %969 = memref.load %arg2[%968] : memref<144xf32, #tpu.memory_space<smem>>
    %c2_i32_172 = arith.constant 2 : i32
    %970 = arith.addi %963, %c2_i32_172 : i32
    %971 = arith.index_cast %970 : i32 to index
    %972 = memref.load %arg2[%971] : memref<144xf32, #tpu.memory_space<smem>>
    %c3_i32_173 = arith.constant 3 : i32
    %973 = arith.addi %963, %c3_i32_173 : i32
    %974 = arith.index_cast %973 : i32 to index
    %975 = memref.load %arg2[%974] : memref<144xf32, #tpu.memory_space<smem>>
    %c4_i32_174 = arith.constant 4 : i32
    %976 = arith.addi %963, %c4_i32_174 : i32
    %977 = arith.index_cast %976 : i32 to index
    %978 = memref.load %arg2[%977] : memref<144xf32, #tpu.memory_space<smem>>
    %c5_i32_175 = arith.constant 5 : i32
    %979 = arith.addi %963, %c5_i32_175 : i32
    %980 = arith.index_cast %979 : i32 to index
    %981 = memref.load %arg2[%980] : memref<144xf32, #tpu.memory_space<smem>>
    %c6_i32_176 = arith.constant 6 : i32
    %982 = arith.addi %963, %c6_i32_176 : i32
    %983 = arith.index_cast %982 : i32 to index
    %984 = memref.load %arg2[%983] : memref<144xf32, #tpu.memory_space<smem>>
    %c7_i32_177 = arith.constant 7 : i32
    %985 = arith.addi %963, %c7_i32_177 : i32
    %986 = arith.index_cast %985 : i32 to index
    %987 = memref.load %arg2[%986] : memref<144xf32, #tpu.memory_space<smem>>
    %c8_i32_178 = arith.constant 8 : i32
    %988 = arith.addi %963, %c8_i32_178 : i32
    %989 = arith.index_cast %988 : i32 to index
    %990 = memref.load %arg2[%989] : memref<144xf32, #tpu.memory_space<smem>>
    %991 = arith.subf %975, %966 : f32
    %992 = arith.subf %978, %969 : f32
    %993 = arith.subf %984, %966 : f32
    %994 = arith.subf %987, %969 : f32
    %995 = arith.subf %984, %975 : f32
    %996 = arith.subf %987, %978 : f32
    %997 = arith.mulf %993, %992 : f32
    %998 = arith.mulf %994, %991 : f32
    %999 = arith.subf %997, %998 : f32
    %cst_179 = arith.constant 9.99999993E-9 : f32
    %1000 = arith.addf %999, %cst_179 : f32
    %cst_180 = arith.constant 1.000000e+00 : f32
    %1001 = arith.divf %cst_180, %1000 : f32
    %1002 = arith.mulf %991, %991 : f32
    %1003 = arith.mulf %992, %992 : f32
    %1004 = arith.addf %1002, %1003 : f32
    %1005 = arith.mulf %993, %993 : f32
    %1006 = arith.mulf %994, %994 : f32
    %1007 = arith.addf %1005, %1006 : f32
    %1008 = arith.mulf %995, %995 : f32
    %1009 = arith.mulf %996, %996 : f32
    %1010 = arith.addf %1008, %1009 : f32
    %cst_181 = arith.constant 9.99999993E-9 : f32
    %1011 = arith.cmpf ole, %1004, %cst_181 : f32
    %cst_182 = arith.constant 9.99999993E-9 : f32
    %1012 = arith.cmpf ole, %1007, %cst_182 : f32
    %cst_183 = arith.constant 9.99999993E-9 : f32
    %1013 = arith.cmpf ole, %1010, %cst_183 : f32
    %cst_184 = arith.constant 1.000000e+00 : f32
    %1014 = arith.select %1011, %cst_184, %1004 : f32
    %cst_185 = arith.constant 1.000000e+00 : f32
    %1015 = arith.divf %cst_185, %1014 : f32
    %cst_186 = arith.constant 1.000000e+00 : f32
    %1016 = arith.select %1012, %cst_186, %1007 : f32
    %cst_187 = arith.constant 1.000000e+00 : f32
    %1017 = arith.divf %cst_187, %1016 : f32
    %cst_188 = arith.constant 1.000000e+00 : f32
    %1018 = arith.select %1013, %cst_188, %1010 : f32
    %cst_189 = arith.constant 1.000000e+00 : f32
    %1019 = arith.divf %cst_189, %1018 : f32
    %1020 = vector.broadcast %966 : f32 to vector<8x128xf32>
    %1021 = arith.subf %32, %1020 : vector<8x128xf32>
    %1022 = vector.broadcast %969 : f32 to vector<8x128xf32>
    %1023 = arith.subf %24, %1022 : vector<8x128xf32>
    %1024 = vector.broadcast %975 : f32 to vector<8x128xf32>
    %1025 = arith.subf %32, %1024 : vector<8x128xf32>
    %1026 = vector.broadcast %978 : f32 to vector<8x128xf32>
    %1027 = arith.subf %24, %1026 : vector<8x128xf32>
    %1028 = vector.broadcast %984 : f32 to vector<8x128xf32>
    %1029 = arith.subf %32, %1028 : vector<8x128xf32>
    %1030 = vector.broadcast %987 : f32 to vector<8x128xf32>
    %1031 = arith.subf %24, %1030 : vector<8x128xf32>
    %1032 = vector.broadcast %996 : f32 to vector<8x128xf32>
    %1033 = arith.mulf %1025, %1032 : vector<8x128xf32>
    %1034 = vector.broadcast %995 : f32 to vector<8x128xf32>
    %1035 = arith.mulf %1027, %1034 : vector<8x128xf32>
    %1036 = arith.subf %1033, %1035 : vector<8x128xf32>
    %1037 = vector.broadcast %993 : f32 to vector<8x128xf32>
    %1038 = arith.mulf %1031, %1037 : vector<8x128xf32>
    %1039 = vector.broadcast %994 : f32 to vector<8x128xf32>
    %1040 = arith.mulf %1029, %1039 : vector<8x128xf32>
    %1041 = arith.subf %1038, %1040 : vector<8x128xf32>
    %1042 = vector.broadcast %992 : f32 to vector<8x128xf32>
    %1043 = arith.mulf %1021, %1042 : vector<8x128xf32>
    %1044 = vector.broadcast %991 : f32 to vector<8x128xf32>
    %1045 = arith.mulf %1023, %1044 : vector<8x128xf32>
    %1046 = arith.subf %1043, %1045 : vector<8x128xf32>
    %1047 = vector.broadcast %1001 : f32 to vector<8x128xf32>
    %1048 = arith.mulf %1036, %1047 : vector<8x128xf32>
    %1049 = vector.broadcast %1001 : f32 to vector<8x128xf32>
    %1050 = arith.mulf %1041, %1049 : vector<8x128xf32>
    %1051 = vector.broadcast %1001 : f32 to vector<8x128xf32>
    %1052 = arith.mulf %1046, %1051 : vector<8x128xf32>
    %cst_190 = arith.constant 0.000000e+00 : f32
    %1053 = vector.broadcast %cst_190 : f32 to vector<8x128xf32>
    %1054 = arith.cmpf ogt, %1048, %1053 : vector<8x128xf32>
    %cst_191 = arith.constant 0.000000e+00 : f32
    %1055 = vector.broadcast %cst_191 : f32 to vector<8x128xf32>
    %1056 = arith.cmpf ogt, %1050, %1055 : vector<8x128xf32>
    %1057 = arith.andi %1054, %1056 : vector<8x128xi1>
    %cst_192 = arith.constant 0.000000e+00 : f32
    %1058 = vector.broadcast %cst_192 : f32 to vector<8x128xf32>
    %1059 = arith.cmpf ogt, %1052, %1058 : vector<8x128xf32>
    %1060 = arith.andi %1057, %1059 : vector<8x128xi1>
    %1061 = vector.broadcast %972 : f32 to vector<8x128xf32>
    %1062 = arith.mulf %1048, %1061 : vector<8x128xf32>
    %1063 = vector.broadcast %981 : f32 to vector<8x128xf32>
    %1064 = arith.mulf %1050, %1063 : vector<8x128xf32>
    %1065 = arith.addf %1062, %1064 : vector<8x128xf32>
    %1066 = vector.broadcast %990 : f32 to vector<8x128xf32>
    %1067 = arith.mulf %1052, %1066 : vector<8x128xf32>
    %1068 = arith.addf %1065, %1067 : vector<8x128xf32>
    %1069 = arith.mulf %1021, %1021 : vector<8x128xf32>
    %1070 = arith.mulf %1023, %1023 : vector<8x128xf32>
    %1071 = arith.addf %1069, %1070 : vector<8x128xf32>
    %1072 = arith.mulf %1025, %1025 : vector<8x128xf32>
    %1073 = arith.mulf %1027, %1027 : vector<8x128xf32>
    %1074 = arith.addf %1072, %1073 : vector<8x128xf32>
    %1075 = arith.mulf %1029, %1029 : vector<8x128xf32>
    %1076 = arith.mulf %1031, %1031 : vector<8x128xf32>
    %1077 = arith.addf %1075, %1076 : vector<8x128xf32>
    %1078 = vector.broadcast %991 : f32 to vector<8x128xf32>
    %1079 = arith.mulf %1021, %1078 : vector<8x128xf32>
    %1080 = vector.broadcast %992 : f32 to vector<8x128xf32>
    %1081 = arith.mulf %1023, %1080 : vector<8x128xf32>
    %1082 = arith.addf %1079, %1081 : vector<8x128xf32>
    %1083 = vector.broadcast %1015 : f32 to vector<8x128xf32>
    %1084 = arith.mulf %1082, %1083 : vector<8x128xf32>
    %1085 = arith.mulf %1046, %1046 : vector<8x128xf32>
    %1086 = vector.broadcast %1015 : f32 to vector<8x128xf32>
    %1087 = arith.mulf %1085, %1086 : vector<8x128xf32>
    %cst_193 = arith.constant 0.000000e+00 : f32
    %1088 = vector.broadcast %cst_193 : f32 to vector<8x128xf32>
    %1089 = arith.cmpf ole, %1084, %1088 : vector<8x128xf32>
    %cst_194 = arith.constant 1.000000e+00 : f32
    %1090 = vector.broadcast %cst_194 : f32 to vector<8x128xf32>
    %1091 = arith.cmpf oge, %1084, %1090 : vector<8x128xf32>
    %1092 = arith.select %1091, %1074, %1087 : vector<8x128xi1>, vector<8x128xf32>
    %1093 = arith.select %1089, %1071, %1092 : vector<8x128xi1>, vector<8x128xf32>
    %1094 = arith.select %1011, %1074, %1093 : vector<8x128xf32>
    %1095 = vector.broadcast %993 : f32 to vector<8x128xf32>
    %1096 = arith.mulf %1021, %1095 : vector<8x128xf32>
    %1097 = vector.broadcast %994 : f32 to vector<8x128xf32>
    %1098 = arith.mulf %1023, %1097 : vector<8x128xf32>
    %1099 = arith.addf %1096, %1098 : vector<8x128xf32>
    %1100 = vector.broadcast %1017 : f32 to vector<8x128xf32>
    %1101 = arith.mulf %1099, %1100 : vector<8x128xf32>
    %1102 = arith.mulf %1041, %1041 : vector<8x128xf32>
    %1103 = vector.broadcast %1017 : f32 to vector<8x128xf32>
    %1104 = arith.mulf %1102, %1103 : vector<8x128xf32>
    %cst_195 = arith.constant 0.000000e+00 : f32
    %1105 = vector.broadcast %cst_195 : f32 to vector<8x128xf32>
    %1106 = arith.cmpf ole, %1101, %1105 : vector<8x128xf32>
    %cst_196 = arith.constant 1.000000e+00 : f32
    %1107 = vector.broadcast %cst_196 : f32 to vector<8x128xf32>
    %1108 = arith.cmpf oge, %1101, %1107 : vector<8x128xf32>
    %1109 = arith.select %1108, %1077, %1104 : vector<8x128xi1>, vector<8x128xf32>
    %1110 = arith.select %1106, %1071, %1109 : vector<8x128xi1>, vector<8x128xf32>
    %1111 = arith.select %1012, %1077, %1110 : vector<8x128xf32>
    %1112 = vector.broadcast %995 : f32 to vector<8x128xf32>
    %1113 = arith.mulf %1025, %1112 : vector<8x128xf32>
    %1114 = vector.broadcast %996 : f32 to vector<8x128xf32>
    %1115 = arith.mulf %1027, %1114 : vector<8x128xf32>
    %1116 = arith.addf %1113, %1115 : vector<8x128xf32>
    %1117 = vector.broadcast %1019 : f32 to vector<8x128xf32>
    %1118 = arith.mulf %1116, %1117 : vector<8x128xf32>
    %1119 = arith.mulf %1036, %1036 : vector<8x128xf32>
    %1120 = vector.broadcast %1019 : f32 to vector<8x128xf32>
    %1121 = arith.mulf %1119, %1120 : vector<8x128xf32>
    %cst_197 = arith.constant 0.000000e+00 : f32
    %1122 = vector.broadcast %cst_197 : f32 to vector<8x128xf32>
    %1123 = arith.cmpf ole, %1118, %1122 : vector<8x128xf32>
    %cst_198 = arith.constant 1.000000e+00 : f32
    %1124 = vector.broadcast %cst_198 : f32 to vector<8x128xf32>
    %1125 = arith.cmpf oge, %1118, %1124 : vector<8x128xf32>
    %1126 = arith.select %1125, %1077, %1121 : vector<8x128xi1>, vector<8x128xf32>
    %1127 = arith.select %1123, %1074, %1126 : vector<8x128xi1>, vector<8x128xf32>
    %1128 = arith.select %1013, %1077, %1127 : vector<8x128xf32>
    %1129 = arith.minimumf %1094, %1111 : vector<8x128xf32>
    %1130 = arith.minimumf %1129, %1128 : vector<8x128xf32>
    %1131 = math.absf %999 : f32
    %cst_199 = arith.constant 9.99999993E-9 : f32
    %1132 = arith.cmpf ogt, %1131, %cst_199 : f32
    %cst_200 = arith.constant 0.000000e+00 : f32
    %1133 = vector.broadcast %cst_200 : f32 to vector<8x128xf32>
    %1134 = arith.cmpf oge, %1068, %1133 : vector<8x128xf32>
    %1135 = arith.andi %1060, %1134 : vector<8x128xi1>
    %1136 = vector.broadcast %1132 : i1 to vector<8x128xi1>
    %1137 = arith.andi %1135, %1136 : vector<8x128xi1>
    %1138 = arith.cmpf olt, %1068, %955 : vector<8x128xf32>
    %1139 = arith.andi %1137, %1138 : vector<8x128xi1>
    %1140 = arith.select %1139, %1068, %955 : vector<8x128xi1>, vector<8x128xf32>
    %1141 = vector.broadcast %c5_i32_168 : i32 to vector<8x128xi32>
    %1142 = arith.select %1139, %1141, %957 : vector<8x128xi1>, vector<8x128xi32>
    %1143 = arith.select %1139, %1048, %958 : vector<8x128xi1>, vector<8x128xf32>
    %1144 = arith.select %1139, %1050, %959 : vector<8x128xi1>, vector<8x128xf32>
    %1145 = arith.select %1139, %1052, %960 : vector<8x128xi1>, vector<8x128xf32>
    %1146 = arith.select %1139, %1130, %961 : vector<8x128xi1>, vector<8x128xf32>
    %c6_i32_201 = arith.constant 6 : i32
    %c9_i32_202 = arith.constant 9 : i32
    %1147 = arith.muli %c6_i32_201, %c9_i32_202 : i32
    %1148 = arith.addi %36, %1147 : i32
    %c0_i32_203 = arith.constant 0 : i32
    %1149 = arith.addi %1148, %c0_i32_203 : i32
    %1150 = arith.index_cast %1149 : i32 to index
    %1151 = memref.load %arg2[%1150] : memref<144xf32, #tpu.memory_space<smem>>
    %c1_i32_204 = arith.constant 1 : i32
    %1152 = arith.addi %1148, %c1_i32_204 : i32
    %1153 = arith.index_cast %1152 : i32 to index
    %1154 = memref.load %arg2[%1153] : memref<144xf32, #tpu.memory_space<smem>>
    %c2_i32_205 = arith.constant 2 : i32
    %1155 = arith.addi %1148, %c2_i32_205 : i32
    %1156 = arith.index_cast %1155 : i32 to index
    %1157 = memref.load %arg2[%1156] : memref<144xf32, #tpu.memory_space<smem>>
    %c3_i32_206 = arith.constant 3 : i32
    %1158 = arith.addi %1148, %c3_i32_206 : i32
    %1159 = arith.index_cast %1158 : i32 to index
    %1160 = memref.load %arg2[%1159] : memref<144xf32, #tpu.memory_space<smem>>
    %c4_i32_207 = arith.constant 4 : i32
    %1161 = arith.addi %1148, %c4_i32_207 : i32
    %1162 = arith.index_cast %1161 : i32 to index
    %1163 = memref.load %arg2[%1162] : memref<144xf32, #tpu.memory_space<smem>>
    %c5_i32_208 = arith.constant 5 : i32
    %1164 = arith.addi %1148, %c5_i32_208 : i32
    %1165 = arith.index_cast %1164 : i32 to index
    %1166 = memref.load %arg2[%1165] : memref<144xf32, #tpu.memory_space<smem>>
    %c6_i32_209 = arith.constant 6 : i32
    %1167 = arith.addi %1148, %c6_i32_209 : i32
    %1168 = arith.index_cast %1167 : i32 to index
    %1169 = memref.load %arg2[%1168] : memref<144xf32, #tpu.memory_space<smem>>
    %c7_i32_210 = arith.constant 7 : i32
    %1170 = arith.addi %1148, %c7_i32_210 : i32
    %1171 = arith.index_cast %1170 : i32 to index
    %1172 = memref.load %arg2[%1171] : memref<144xf32, #tpu.memory_space<smem>>
    %c8_i32_211 = arith.constant 8 : i32
    %1173 = arith.addi %1148, %c8_i32_211 : i32
    %1174 = arith.index_cast %1173 : i32 to index
    %1175 = memref.load %arg2[%1174] : memref<144xf32, #tpu.memory_space<smem>>
    %1176 = arith.subf %1160, %1151 : f32
    %1177 = arith.subf %1163, %1154 : f32
    %1178 = arith.subf %1169, %1151 : f32
    %1179 = arith.subf %1172, %1154 : f32
    %1180 = arith.subf %1169, %1160 : f32
    %1181 = arith.subf %1172, %1163 : f32
    %1182 = arith.mulf %1178, %1177 : f32
    %1183 = arith.mulf %1179, %1176 : f32
    %1184 = arith.subf %1182, %1183 : f32
    %cst_212 = arith.constant 9.99999993E-9 : f32
    %1185 = arith.addf %1184, %cst_212 : f32
    %cst_213 = arith.constant 1.000000e+00 : f32
    %1186 = arith.divf %cst_213, %1185 : f32
    %1187 = arith.mulf %1176, %1176 : f32
    %1188 = arith.mulf %1177, %1177 : f32
    %1189 = arith.addf %1187, %1188 : f32
    %1190 = arith.mulf %1178, %1178 : f32
    %1191 = arith.mulf %1179, %1179 : f32
    %1192 = arith.addf %1190, %1191 : f32
    %1193 = arith.mulf %1180, %1180 : f32
    %1194 = arith.mulf %1181, %1181 : f32
    %1195 = arith.addf %1193, %1194 : f32
    %cst_214 = arith.constant 9.99999993E-9 : f32
    %1196 = arith.cmpf ole, %1189, %cst_214 : f32
    %cst_215 = arith.constant 9.99999993E-9 : f32
    %1197 = arith.cmpf ole, %1192, %cst_215 : f32
    %cst_216 = arith.constant 9.99999993E-9 : f32
    %1198 = arith.cmpf ole, %1195, %cst_216 : f32
    %cst_217 = arith.constant 1.000000e+00 : f32
    %1199 = arith.select %1196, %cst_217, %1189 : f32
    %cst_218 = arith.constant 1.000000e+00 : f32
    %1200 = arith.divf %cst_218, %1199 : f32
    %cst_219 = arith.constant 1.000000e+00 : f32
    %1201 = arith.select %1197, %cst_219, %1192 : f32
    %cst_220 = arith.constant 1.000000e+00 : f32
    %1202 = arith.divf %cst_220, %1201 : f32
    %cst_221 = arith.constant 1.000000e+00 : f32
    %1203 = arith.select %1198, %cst_221, %1195 : f32
    %cst_222 = arith.constant 1.000000e+00 : f32
    %1204 = arith.divf %cst_222, %1203 : f32
    %1205 = vector.broadcast %1151 : f32 to vector<8x128xf32>
    %1206 = arith.subf %32, %1205 : vector<8x128xf32>
    %1207 = vector.broadcast %1154 : f32 to vector<8x128xf32>
    %1208 = arith.subf %24, %1207 : vector<8x128xf32>
    %1209 = vector.broadcast %1160 : f32 to vector<8x128xf32>
    %1210 = arith.subf %32, %1209 : vector<8x128xf32>
    %1211 = vector.broadcast %1163 : f32 to vector<8x128xf32>
    %1212 = arith.subf %24, %1211 : vector<8x128xf32>
    %1213 = vector.broadcast %1169 : f32 to vector<8x128xf32>
    %1214 = arith.subf %32, %1213 : vector<8x128xf32>
    %1215 = vector.broadcast %1172 : f32 to vector<8x128xf32>
    %1216 = arith.subf %24, %1215 : vector<8x128xf32>
    %1217 = vector.broadcast %1181 : f32 to vector<8x128xf32>
    %1218 = arith.mulf %1210, %1217 : vector<8x128xf32>
    %1219 = vector.broadcast %1180 : f32 to vector<8x128xf32>
    %1220 = arith.mulf %1212, %1219 : vector<8x128xf32>
    %1221 = arith.subf %1218, %1220 : vector<8x128xf32>
    %1222 = vector.broadcast %1178 : f32 to vector<8x128xf32>
    %1223 = arith.mulf %1216, %1222 : vector<8x128xf32>
    %1224 = vector.broadcast %1179 : f32 to vector<8x128xf32>
    %1225 = arith.mulf %1214, %1224 : vector<8x128xf32>
    %1226 = arith.subf %1223, %1225 : vector<8x128xf32>
    %1227 = vector.broadcast %1177 : f32 to vector<8x128xf32>
    %1228 = arith.mulf %1206, %1227 : vector<8x128xf32>
    %1229 = vector.broadcast %1176 : f32 to vector<8x128xf32>
    %1230 = arith.mulf %1208, %1229 : vector<8x128xf32>
    %1231 = arith.subf %1228, %1230 : vector<8x128xf32>
    %1232 = vector.broadcast %1186 : f32 to vector<8x128xf32>
    %1233 = arith.mulf %1221, %1232 : vector<8x128xf32>
    %1234 = vector.broadcast %1186 : f32 to vector<8x128xf32>
    %1235 = arith.mulf %1226, %1234 : vector<8x128xf32>
    %1236 = vector.broadcast %1186 : f32 to vector<8x128xf32>
    %1237 = arith.mulf %1231, %1236 : vector<8x128xf32>
    %cst_223 = arith.constant 0.000000e+00 : f32
    %1238 = vector.broadcast %cst_223 : f32 to vector<8x128xf32>
    %1239 = arith.cmpf ogt, %1233, %1238 : vector<8x128xf32>
    %cst_224 = arith.constant 0.000000e+00 : f32
    %1240 = vector.broadcast %cst_224 : f32 to vector<8x128xf32>
    %1241 = arith.cmpf ogt, %1235, %1240 : vector<8x128xf32>
    %1242 = arith.andi %1239, %1241 : vector<8x128xi1>
    %cst_225 = arith.constant 0.000000e+00 : f32
    %1243 = vector.broadcast %cst_225 : f32 to vector<8x128xf32>
    %1244 = arith.cmpf ogt, %1237, %1243 : vector<8x128xf32>
    %1245 = arith.andi %1242, %1244 : vector<8x128xi1>
    %1246 = vector.broadcast %1157 : f32 to vector<8x128xf32>
    %1247 = arith.mulf %1233, %1246 : vector<8x128xf32>
    %1248 = vector.broadcast %1166 : f32 to vector<8x128xf32>
    %1249 = arith.mulf %1235, %1248 : vector<8x128xf32>
    %1250 = arith.addf %1247, %1249 : vector<8x128xf32>
    %1251 = vector.broadcast %1175 : f32 to vector<8x128xf32>
    %1252 = arith.mulf %1237, %1251 : vector<8x128xf32>
    %1253 = arith.addf %1250, %1252 : vector<8x128xf32>
    %1254 = arith.mulf %1206, %1206 : vector<8x128xf32>
    %1255 = arith.mulf %1208, %1208 : vector<8x128xf32>
    %1256 = arith.addf %1254, %1255 : vector<8x128xf32>
    %1257 = arith.mulf %1210, %1210 : vector<8x128xf32>
    %1258 = arith.mulf %1212, %1212 : vector<8x128xf32>
    %1259 = arith.addf %1257, %1258 : vector<8x128xf32>
    %1260 = arith.mulf %1214, %1214 : vector<8x128xf32>
    %1261 = arith.mulf %1216, %1216 : vector<8x128xf32>
    %1262 = arith.addf %1260, %1261 : vector<8x128xf32>
    %1263 = vector.broadcast %1176 : f32 to vector<8x128xf32>
    %1264 = arith.mulf %1206, %1263 : vector<8x128xf32>
    %1265 = vector.broadcast %1177 : f32 to vector<8x128xf32>
    %1266 = arith.mulf %1208, %1265 : vector<8x128xf32>
    %1267 = arith.addf %1264, %1266 : vector<8x128xf32>
    %1268 = vector.broadcast %1200 : f32 to vector<8x128xf32>
    %1269 = arith.mulf %1267, %1268 : vector<8x128xf32>
    %1270 = arith.mulf %1231, %1231 : vector<8x128xf32>
    %1271 = vector.broadcast %1200 : f32 to vector<8x128xf32>
    %1272 = arith.mulf %1270, %1271 : vector<8x128xf32>
    %cst_226 = arith.constant 0.000000e+00 : f32
    %1273 = vector.broadcast %cst_226 : f32 to vector<8x128xf32>
    %1274 = arith.cmpf ole, %1269, %1273 : vector<8x128xf32>
    %cst_227 = arith.constant 1.000000e+00 : f32
    %1275 = vector.broadcast %cst_227 : f32 to vector<8x128xf32>
    %1276 = arith.cmpf oge, %1269, %1275 : vector<8x128xf32>
    %1277 = arith.select %1276, %1259, %1272 : vector<8x128xi1>, vector<8x128xf32>
    %1278 = arith.select %1274, %1256, %1277 : vector<8x128xi1>, vector<8x128xf32>
    %1279 = arith.select %1196, %1259, %1278 : vector<8x128xf32>
    %1280 = vector.broadcast %1178 : f32 to vector<8x128xf32>
    %1281 = arith.mulf %1206, %1280 : vector<8x128xf32>
    %1282 = vector.broadcast %1179 : f32 to vector<8x128xf32>
    %1283 = arith.mulf %1208, %1282 : vector<8x128xf32>
    %1284 = arith.addf %1281, %1283 : vector<8x128xf32>
    %1285 = vector.broadcast %1202 : f32 to vector<8x128xf32>
    %1286 = arith.mulf %1284, %1285 : vector<8x128xf32>
    %1287 = arith.mulf %1226, %1226 : vector<8x128xf32>
    %1288 = vector.broadcast %1202 : f32 to vector<8x128xf32>
    %1289 = arith.mulf %1287, %1288 : vector<8x128xf32>
    %cst_228 = arith.constant 0.000000e+00 : f32
    %1290 = vector.broadcast %cst_228 : f32 to vector<8x128xf32>
    %1291 = arith.cmpf ole, %1286, %1290 : vector<8x128xf32>
    %cst_229 = arith.constant 1.000000e+00 : f32
    %1292 = vector.broadcast %cst_229 : f32 to vector<8x128xf32>
    %1293 = arith.cmpf oge, %1286, %1292 : vector<8x128xf32>
    %1294 = arith.select %1293, %1262, %1289 : vector<8x128xi1>, vector<8x128xf32>
    %1295 = arith.select %1291, %1256, %1294 : vector<8x128xi1>, vector<8x128xf32>
    %1296 = arith.select %1197, %1262, %1295 : vector<8x128xf32>
    %1297 = vector.broadcast %1180 : f32 to vector<8x128xf32>
    %1298 = arith.mulf %1210, %1297 : vector<8x128xf32>
    %1299 = vector.broadcast %1181 : f32 to vector<8x128xf32>
    %1300 = arith.mulf %1212, %1299 : vector<8x128xf32>
    %1301 = arith.addf %1298, %1300 : vector<8x128xf32>
    %1302 = vector.broadcast %1204 : f32 to vector<8x128xf32>
    %1303 = arith.mulf %1301, %1302 : vector<8x128xf32>
    %1304 = arith.mulf %1221, %1221 : vector<8x128xf32>
    %1305 = vector.broadcast %1204 : f32 to vector<8x128xf32>
    %1306 = arith.mulf %1304, %1305 : vector<8x128xf32>
    %cst_230 = arith.constant 0.000000e+00 : f32
    %1307 = vector.broadcast %cst_230 : f32 to vector<8x128xf32>
    %1308 = arith.cmpf ole, %1303, %1307 : vector<8x128xf32>
    %cst_231 = arith.constant 1.000000e+00 : f32
    %1309 = vector.broadcast %cst_231 : f32 to vector<8x128xf32>
    %1310 = arith.cmpf oge, %1303, %1309 : vector<8x128xf32>
    %1311 = arith.select %1310, %1262, %1306 : vector<8x128xi1>, vector<8x128xf32>
    %1312 = arith.select %1308, %1259, %1311 : vector<8x128xi1>, vector<8x128xf32>
    %1313 = arith.select %1198, %1262, %1312 : vector<8x128xf32>
    %1314 = arith.minimumf %1279, %1296 : vector<8x128xf32>
    %1315 = arith.minimumf %1314, %1313 : vector<8x128xf32>
    %1316 = math.absf %1184 : f32
    %cst_232 = arith.constant 9.99999993E-9 : f32
    %1317 = arith.cmpf ogt, %1316, %cst_232 : f32
    %cst_233 = arith.constant 0.000000e+00 : f32
    %1318 = vector.broadcast %cst_233 : f32 to vector<8x128xf32>
    %1319 = arith.cmpf oge, %1253, %1318 : vector<8x128xf32>
    %1320 = arith.andi %1245, %1319 : vector<8x128xi1>
    %1321 = vector.broadcast %1317 : i1 to vector<8x128xi1>
    %1322 = arith.andi %1320, %1321 : vector<8x128xi1>
    %1323 = arith.cmpf olt, %1253, %1140 : vector<8x128xf32>
    %1324 = arith.andi %1322, %1323 : vector<8x128xi1>
    %1325 = arith.select %1324, %1253, %1140 : vector<8x128xi1>, vector<8x128xf32>
    %1326 = vector.broadcast %c6_i32_201 : i32 to vector<8x128xi32>
    %1327 = arith.select %1324, %1326, %1142 : vector<8x128xi1>, vector<8x128xi32>
    %1328 = arith.select %1324, %1233, %1143 : vector<8x128xi1>, vector<8x128xf32>
    %1329 = arith.select %1324, %1235, %1144 : vector<8x128xi1>, vector<8x128xf32>
    %1330 = arith.select %1324, %1237, %1145 : vector<8x128xi1>, vector<8x128xf32>
    %1331 = arith.select %1324, %1315, %1146 : vector<8x128xi1>, vector<8x128xf32>
    %c7_i32_234 = arith.constant 7 : i32
    %c9_i32_235 = arith.constant 9 : i32
    %1332 = arith.muli %c7_i32_234, %c9_i32_235 : i32
    %1333 = arith.addi %36, %1332 : i32
    %c0_i32_236 = arith.constant 0 : i32
    %1334 = arith.addi %1333, %c0_i32_236 : i32
    %1335 = arith.index_cast %1334 : i32 to index
    %1336 = memref.load %arg2[%1335] : memref<144xf32, #tpu.memory_space<smem>>
    %c1_i32_237 = arith.constant 1 : i32
    %1337 = arith.addi %1333, %c1_i32_237 : i32
    %1338 = arith.index_cast %1337 : i32 to index
    %1339 = memref.load %arg2[%1338] : memref<144xf32, #tpu.memory_space<smem>>
    %c2_i32_238 = arith.constant 2 : i32
    %1340 = arith.addi %1333, %c2_i32_238 : i32
    %1341 = arith.index_cast %1340 : i32 to index
    %1342 = memref.load %arg2[%1341] : memref<144xf32, #tpu.memory_space<smem>>
    %c3_i32_239 = arith.constant 3 : i32
    %1343 = arith.addi %1333, %c3_i32_239 : i32
    %1344 = arith.index_cast %1343 : i32 to index
    %1345 = memref.load %arg2[%1344] : memref<144xf32, #tpu.memory_space<smem>>
    %c4_i32_240 = arith.constant 4 : i32
    %1346 = arith.addi %1333, %c4_i32_240 : i32
    %1347 = arith.index_cast %1346 : i32 to index
    %1348 = memref.load %arg2[%1347] : memref<144xf32, #tpu.memory_space<smem>>
    %c5_i32_241 = arith.constant 5 : i32
    %1349 = arith.addi %1333, %c5_i32_241 : i32
    %1350 = arith.index_cast %1349 : i32 to index
    %1351 = memref.load %arg2[%1350] : memref<144xf32, #tpu.memory_space<smem>>
    %c6_i32_242 = arith.constant 6 : i32
    %1352 = arith.addi %1333, %c6_i32_242 : i32
    %1353 = arith.index_cast %1352 : i32 to index
    %1354 = memref.load %arg2[%1353] : memref<144xf32, #tpu.memory_space<smem>>
    %c7_i32_243 = arith.constant 7 : i32
    %1355 = arith.addi %1333, %c7_i32_243 : i32
    %1356 = arith.index_cast %1355 : i32 to index
    %1357 = memref.load %arg2[%1356] : memref<144xf32, #tpu.memory_space<smem>>
    %c8_i32_244 = arith.constant 8 : i32
    %1358 = arith.addi %1333, %c8_i32_244 : i32
    %1359 = arith.index_cast %1358 : i32 to index
    %1360 = memref.load %arg2[%1359] : memref<144xf32, #tpu.memory_space<smem>>
    %1361 = arith.subf %1345, %1336 : f32
    %1362 = arith.subf %1348, %1339 : f32
    %1363 = arith.subf %1354, %1336 : f32
    %1364 = arith.subf %1357, %1339 : f32
    %1365 = arith.subf %1354, %1345 : f32
    %1366 = arith.subf %1357, %1348 : f32
    %1367 = arith.mulf %1363, %1362 : f32
    %1368 = arith.mulf %1364, %1361 : f32
    %1369 = arith.subf %1367, %1368 : f32
    %cst_245 = arith.constant 9.99999993E-9 : f32
    %1370 = arith.addf %1369, %cst_245 : f32
    %cst_246 = arith.constant 1.000000e+00 : f32
    %1371 = arith.divf %cst_246, %1370 : f32
    %1372 = arith.mulf %1361, %1361 : f32
    %1373 = arith.mulf %1362, %1362 : f32
    %1374 = arith.addf %1372, %1373 : f32
    %1375 = arith.mulf %1363, %1363 : f32
    %1376 = arith.mulf %1364, %1364 : f32
    %1377 = arith.addf %1375, %1376 : f32
    %1378 = arith.mulf %1365, %1365 : f32
    %1379 = arith.mulf %1366, %1366 : f32
    %1380 = arith.addf %1378, %1379 : f32
    %cst_247 = arith.constant 9.99999993E-9 : f32
    %1381 = arith.cmpf ole, %1374, %cst_247 : f32
    %cst_248 = arith.constant 9.99999993E-9 : f32
    %1382 = arith.cmpf ole, %1377, %cst_248 : f32
    %cst_249 = arith.constant 9.99999993E-9 : f32
    %1383 = arith.cmpf ole, %1380, %cst_249 : f32
    %cst_250 = arith.constant 1.000000e+00 : f32
    %1384 = arith.select %1381, %cst_250, %1374 : f32
    %cst_251 = arith.constant 1.000000e+00 : f32
    %1385 = arith.divf %cst_251, %1384 : f32
    %cst_252 = arith.constant 1.000000e+00 : f32
    %1386 = arith.select %1382, %cst_252, %1377 : f32
    %cst_253 = arith.constant 1.000000e+00 : f32
    %1387 = arith.divf %cst_253, %1386 : f32
    %cst_254 = arith.constant 1.000000e+00 : f32
    %1388 = arith.select %1383, %cst_254, %1380 : f32
    %cst_255 = arith.constant 1.000000e+00 : f32
    %1389 = arith.divf %cst_255, %1388 : f32
    %1390 = vector.broadcast %1336 : f32 to vector<8x128xf32>
    %1391 = arith.subf %32, %1390 : vector<8x128xf32>
    %1392 = vector.broadcast %1339 : f32 to vector<8x128xf32>
    %1393 = arith.subf %24, %1392 : vector<8x128xf32>
    %1394 = vector.broadcast %1345 : f32 to vector<8x128xf32>
    %1395 = arith.subf %32, %1394 : vector<8x128xf32>
    %1396 = vector.broadcast %1348 : f32 to vector<8x128xf32>
    %1397 = arith.subf %24, %1396 : vector<8x128xf32>
    %1398 = vector.broadcast %1354 : f32 to vector<8x128xf32>
    %1399 = arith.subf %32, %1398 : vector<8x128xf32>
    %1400 = vector.broadcast %1357 : f32 to vector<8x128xf32>
    %1401 = arith.subf %24, %1400 : vector<8x128xf32>
    %1402 = vector.broadcast %1366 : f32 to vector<8x128xf32>
    %1403 = arith.mulf %1395, %1402 : vector<8x128xf32>
    %1404 = vector.broadcast %1365 : f32 to vector<8x128xf32>
    %1405 = arith.mulf %1397, %1404 : vector<8x128xf32>
    %1406 = arith.subf %1403, %1405 : vector<8x128xf32>
    %1407 = vector.broadcast %1363 : f32 to vector<8x128xf32>
    %1408 = arith.mulf %1401, %1407 : vector<8x128xf32>
    %1409 = vector.broadcast %1364 : f32 to vector<8x128xf32>
    %1410 = arith.mulf %1399, %1409 : vector<8x128xf32>
    %1411 = arith.subf %1408, %1410 : vector<8x128xf32>
    %1412 = vector.broadcast %1362 : f32 to vector<8x128xf32>
    %1413 = arith.mulf %1391, %1412 : vector<8x128xf32>
    %1414 = vector.broadcast %1361 : f32 to vector<8x128xf32>
    %1415 = arith.mulf %1393, %1414 : vector<8x128xf32>
    %1416 = arith.subf %1413, %1415 : vector<8x128xf32>
    %1417 = vector.broadcast %1371 : f32 to vector<8x128xf32>
    %1418 = arith.mulf %1406, %1417 : vector<8x128xf32>
    %1419 = vector.broadcast %1371 : f32 to vector<8x128xf32>
    %1420 = arith.mulf %1411, %1419 : vector<8x128xf32>
    %1421 = vector.broadcast %1371 : f32 to vector<8x128xf32>
    %1422 = arith.mulf %1416, %1421 : vector<8x128xf32>
    %cst_256 = arith.constant 0.000000e+00 : f32
    %1423 = vector.broadcast %cst_256 : f32 to vector<8x128xf32>
    %1424 = arith.cmpf ogt, %1418, %1423 : vector<8x128xf32>
    %cst_257 = arith.constant 0.000000e+00 : f32
    %1425 = vector.broadcast %cst_257 : f32 to vector<8x128xf32>
    %1426 = arith.cmpf ogt, %1420, %1425 : vector<8x128xf32>
    %1427 = arith.andi %1424, %1426 : vector<8x128xi1>
    %cst_258 = arith.constant 0.000000e+00 : f32
    %1428 = vector.broadcast %cst_258 : f32 to vector<8x128xf32>
    %1429 = arith.cmpf ogt, %1422, %1428 : vector<8x128xf32>
    %1430 = arith.andi %1427, %1429 : vector<8x128xi1>
    %1431 = vector.broadcast %1342 : f32 to vector<8x128xf32>
    %1432 = arith.mulf %1418, %1431 : vector<8x128xf32>
    %1433 = vector.broadcast %1351 : f32 to vector<8x128xf32>
    %1434 = arith.mulf %1420, %1433 : vector<8x128xf32>
    %1435 = arith.addf %1432, %1434 : vector<8x128xf32>
    %1436 = vector.broadcast %1360 : f32 to vector<8x128xf32>
    %1437 = arith.mulf %1422, %1436 : vector<8x128xf32>
    %1438 = arith.addf %1435, %1437 : vector<8x128xf32>
    %1439 = arith.mulf %1391, %1391 : vector<8x128xf32>
    %1440 = arith.mulf %1393, %1393 : vector<8x128xf32>
    %1441 = arith.addf %1439, %1440 : vector<8x128xf32>
    %1442 = arith.mulf %1395, %1395 : vector<8x128xf32>
    %1443 = arith.mulf %1397, %1397 : vector<8x128xf32>
    %1444 = arith.addf %1442, %1443 : vector<8x128xf32>
    %1445 = arith.mulf %1399, %1399 : vector<8x128xf32>
    %1446 = arith.mulf %1401, %1401 : vector<8x128xf32>
    %1447 = arith.addf %1445, %1446 : vector<8x128xf32>
    %1448 = vector.broadcast %1361 : f32 to vector<8x128xf32>
    %1449 = arith.mulf %1391, %1448 : vector<8x128xf32>
    %1450 = vector.broadcast %1362 : f32 to vector<8x128xf32>
    %1451 = arith.mulf %1393, %1450 : vector<8x128xf32>
    %1452 = arith.addf %1449, %1451 : vector<8x128xf32>
    %1453 = vector.broadcast %1385 : f32 to vector<8x128xf32>
    %1454 = arith.mulf %1452, %1453 : vector<8x128xf32>
    %1455 = arith.mulf %1416, %1416 : vector<8x128xf32>
    %1456 = vector.broadcast %1385 : f32 to vector<8x128xf32>
    %1457 = arith.mulf %1455, %1456 : vector<8x128xf32>
    %cst_259 = arith.constant 0.000000e+00 : f32
    %1458 = vector.broadcast %cst_259 : f32 to vector<8x128xf32>
    %1459 = arith.cmpf ole, %1454, %1458 : vector<8x128xf32>
    %cst_260 = arith.constant 1.000000e+00 : f32
    %1460 = vector.broadcast %cst_260 : f32 to vector<8x128xf32>
    %1461 = arith.cmpf oge, %1454, %1460 : vector<8x128xf32>
    %1462 = arith.select %1461, %1444, %1457 : vector<8x128xi1>, vector<8x128xf32>
    %1463 = arith.select %1459, %1441, %1462 : vector<8x128xi1>, vector<8x128xf32>
    %1464 = arith.select %1381, %1444, %1463 : vector<8x128xf32>
    %1465 = vector.broadcast %1363 : f32 to vector<8x128xf32>
    %1466 = arith.mulf %1391, %1465 : vector<8x128xf32>
    %1467 = vector.broadcast %1364 : f32 to vector<8x128xf32>
    %1468 = arith.mulf %1393, %1467 : vector<8x128xf32>
    %1469 = arith.addf %1466, %1468 : vector<8x128xf32>
    %1470 = vector.broadcast %1387 : f32 to vector<8x128xf32>
    %1471 = arith.mulf %1469, %1470 : vector<8x128xf32>
    %1472 = arith.mulf %1411, %1411 : vector<8x128xf32>
    %1473 = vector.broadcast %1387 : f32 to vector<8x128xf32>
    %1474 = arith.mulf %1472, %1473 : vector<8x128xf32>
    %cst_261 = arith.constant 0.000000e+00 : f32
    %1475 = vector.broadcast %cst_261 : f32 to vector<8x128xf32>
    %1476 = arith.cmpf ole, %1471, %1475 : vector<8x128xf32>
    %cst_262 = arith.constant 1.000000e+00 : f32
    %1477 = vector.broadcast %cst_262 : f32 to vector<8x128xf32>
    %1478 = arith.cmpf oge, %1471, %1477 : vector<8x128xf32>
    %1479 = arith.select %1478, %1447, %1474 : vector<8x128xi1>, vector<8x128xf32>
    %1480 = arith.select %1476, %1441, %1479 : vector<8x128xi1>, vector<8x128xf32>
    %1481 = arith.select %1382, %1447, %1480 : vector<8x128xf32>
    %1482 = vector.broadcast %1365 : f32 to vector<8x128xf32>
    %1483 = arith.mulf %1395, %1482 : vector<8x128xf32>
    %1484 = vector.broadcast %1366 : f32 to vector<8x128xf32>
    %1485 = arith.mulf %1397, %1484 : vector<8x128xf32>
    %1486 = arith.addf %1483, %1485 : vector<8x128xf32>
    %1487 = vector.broadcast %1389 : f32 to vector<8x128xf32>
    %1488 = arith.mulf %1486, %1487 : vector<8x128xf32>
    %1489 = arith.mulf %1406, %1406 : vector<8x128xf32>
    %1490 = vector.broadcast %1389 : f32 to vector<8x128xf32>
    %1491 = arith.mulf %1489, %1490 : vector<8x128xf32>
    %cst_263 = arith.constant 0.000000e+00 : f32
    %1492 = vector.broadcast %cst_263 : f32 to vector<8x128xf32>
    %1493 = arith.cmpf ole, %1488, %1492 : vector<8x128xf32>
    %cst_264 = arith.constant 1.000000e+00 : f32
    %1494 = vector.broadcast %cst_264 : f32 to vector<8x128xf32>
    %1495 = arith.cmpf oge, %1488, %1494 : vector<8x128xf32>
    %1496 = arith.select %1495, %1447, %1491 : vector<8x128xi1>, vector<8x128xf32>
    %1497 = arith.select %1493, %1444, %1496 : vector<8x128xi1>, vector<8x128xf32>
    %1498 = arith.select %1383, %1447, %1497 : vector<8x128xf32>
    %1499 = arith.minimumf %1464, %1481 : vector<8x128xf32>
    %1500 = arith.minimumf %1499, %1498 : vector<8x128xf32>
    %1501 = math.absf %1369 : f32
    %cst_265 = arith.constant 9.99999993E-9 : f32
    %1502 = arith.cmpf ogt, %1501, %cst_265 : f32
    %cst_266 = arith.constant 0.000000e+00 : f32
    %1503 = vector.broadcast %cst_266 : f32 to vector<8x128xf32>
    %1504 = arith.cmpf oge, %1438, %1503 : vector<8x128xf32>
    %1505 = arith.andi %1430, %1504 : vector<8x128xi1>
    %1506 = vector.broadcast %1502 : i1 to vector<8x128xi1>
    %1507 = arith.andi %1505, %1506 : vector<8x128xi1>
    %1508 = arith.cmpf olt, %1438, %1325 : vector<8x128xf32>
    %1509 = arith.andi %1507, %1508 : vector<8x128xi1>
    %1510 = arith.select %1509, %1438, %1325 : vector<8x128xi1>, vector<8x128xf32>
    %1511 = vector.broadcast %c7_i32_234 : i32 to vector<8x128xi32>
    %1512 = arith.select %1509, %1511, %1327 : vector<8x128xi1>, vector<8x128xi32>
    %1513 = arith.select %1509, %1418, %1328 : vector<8x128xi1>, vector<8x128xf32>
    %1514 = arith.select %1509, %1420, %1329 : vector<8x128xi1>, vector<8x128xf32>
    %1515 = arith.select %1509, %1422, %1330 : vector<8x128xi1>, vector<8x128xf32>
    %1516 = arith.select %1509, %1500, %1331 : vector<8x128xi1>, vector<8x128xf32>
    %c8_i32_267 = arith.constant 8 : i32
    %c0_i32_268 = arith.constant 0 : i32
    %1517 = vector.broadcast %c0_i32_268 : i32 to vector<8x128xi32>
    %1518 = arith.cmpi sge, %1512, %1517 : vector<8x128xi32>
    %c8_i32_269 = arith.constant 8 : i32
    %1519 = arith.muli %arg0, %c8_i32_269 : i32
    %1520 = vector.broadcast %1519 : i32 to vector<8x128xi32>
    %1521 = arith.addi %1520, %1512 : vector<8x128xi32>
    %c-1_i32_270 = arith.constant -1 : i32
    %1522 = vector.broadcast %c-1_i32_270 : i32 to vector<8x128xi32>
    %1523 = arith.select %1518, %1521, %1522 : vector<8x128xi1>, vector<8x128xi32>
    %c0 = arith.constant 0 : index
    %c0_271 = arith.constant 0 : index
    %c0_272 = arith.constant 0 : index
    %1524 = vector.load %arg3[%c0, %c0_271, %c0_272] : memref<1x8x128xi32, #tpu.memory_space<vmem>>, vector<1x8x128xi32>
    %1525 = vector.shape_cast %1524 : vector<1x8x128xi32> to vector<8x128xi32>
    %1526 = vector.shape_cast %1523 : vector<8x128xi32> to vector<1x8x128xi32>
    tpu.vector_store %arg3[%c0, %c0_271, %c0_272], %1526 {strides = array<i32>} : memref<1x8x128xi32, #tpu.memory_space<vmem>>, vector<1x8x128xi32>,
    %cst_273 = arith.constant -1.000000e+00 : f32
    %1527 = vector.broadcast %cst_273 : f32 to vector<8x128xf32>
    %1528 = arith.select %1518, %1510, %1527 : vector<8x128xi1>, vector<8x128xf32>
    %c0_274 = arith.constant 0 : index
    %c0_275 = arith.constant 0 : index
    %c0_276 = arith.constant 0 : index
    %c0_277 = arith.constant 0 : index
    %1529 = vector.load %arg4[%c0_274, %c0_275, %c0_276, %c0_277] : memref<1x5x8x128xf32, #tpu.memory_space<vmem>>, vector<1x1x8x128xf32>
    %1530 = vector.shape_cast %1529 : vector<1x1x8x128xf32> to vector<8x128xf32>
    %1531 = vector.shape_cast %1528 : vector<8x128xf32> to vector<1x1x8x128xf32>
    tpu.vector_store %arg4[%c0_274, %c0_275, %c0_276, %c0_277], %1531 {strides = array<i32>} : memref<1x5x8x128xf32, #tpu.memory_space<vmem>>, vector<1x1x8x128xf32>,
    %cst_278 = arith.constant -1.000000e+00 : f32
    %1532 = vector.broadcast %cst_278 : f32 to vector<8x128xf32>
    %1533 = arith.select %1518, %1513, %1532 : vector<8x128xi1>, vector<8x128xf32>
    %c0_279 = arith.constant 0 : index
    %c1 = arith.constant 1 : index
    %c0_280 = arith.constant 0 : index
    %c0_281 = arith.constant 0 : index
    %1534 = vector.load %arg4[%c0_279, %c1, %c0_280, %c0_281] : memref<1x5x8x128xf32, #tpu.memory_space<vmem>>, vector<1x1x8x128xf32>
    %1535 = vector.shape_cast %1534 : vector<1x1x8x128xf32> to vector<8x128xf32>
    %1536 = vector.shape_cast %1533 : vector<8x128xf32> to vector<1x1x8x128xf32>
    tpu.vector_store %arg4[%c0_279, %c1, %c0_280, %c0_281], %1536 {strides = array<i32>} : memref<1x5x8x128xf32, #tpu.memory_space<vmem>>, vector<1x1x8x128xf32>,
    %cst_282 = arith.constant -1.000000e+00 : f32
    %1537 = vector.broadcast %cst_282 : f32 to vector<8x128xf32>
    %1538 = arith.select %1518, %1514, %1537 : vector<8x128xi1>, vector<8x128xf32>
    %c0_283 = arith.constant 0 : index
    %c2 = arith.constant 2 : index
    %c0_284 = arith.constant 0 : index
    %c0_285 = arith.constant 0 : index
    %1539 = vector.load %arg4[%c0_283, %c2, %c0_284, %c0_285] : memref<1x5x8x128xf32, #tpu.memory_space<vmem>>, vector<1x1x8x128xf32>
    %1540 = vector.shape_cast %1539 : vector<1x1x8x128xf32> to vector<8x128xf32>
    %1541 = vector.shape_cast %1538 : vector<8x128xf32> to vector<1x1x8x128xf32>
    tpu.vector_store %arg4[%c0_283, %c2, %c0_284, %c0_285], %1541 {strides = array<i32>} : memref<1x5x8x128xf32, #tpu.memory_space<vmem>>, vector<1x1x8x128xf32>,
    %cst_286 = arith.constant -1.000000e+00 : f32
    %1542 = vector.broadcast %cst_286 : f32 to vector<8x128xf32>
    %1543 = arith.select %1518, %1515, %1542 : vector<8x128xi1>, vector<8x128xf32>
    %c0_287 = arith.constant 0 : index
    %c3 = arith.constant 3 : index
    %c0_288 = arith.constant 0 : index
    %c0_289 = arith.constant 0 : index
    %1544 = vector.load %arg4[%c0_287, %c3, %c0_288, %c0_289] : memref<1x5x8x128xf32, #tpu.memory_space<vmem>>, vector<1x1x8x128xf32>
    %1545 = vector.shape_cast %1544 : vector<1x1x8x128xf32> to vector<8x128xf32>
    %1546 = vector.shape_cast %1543 : vector<8x128xf32> to vector<1x1x8x128xf32>
    tpu.vector_store %arg4[%c0_287, %c3, %c0_288, %c0_289], %1546 {strides = array<i32>} : memref<1x5x8x128xf32, #tpu.memory_space<vmem>>, vector<1x1x8x128xf32>,
    %cst_290 = arith.constant 0.000000e+00 : f32
    %1547 = vector.broadcast %cst_290 : f32 to vector<8x128xf32>
    %1548 = arith.subf %1547, %1516 : vector<8x128xf32>
    %cst_291 = arith.constant -1.000000e+00 : f32
    %1549 = vector.broadcast %cst_291 : f32 to vector<8x128xf32>
    %1550 = arith.select %1518, %1548, %1549 : vector<8x128xi1>, vector<8x128xf32>
    %c0_292 = arith.constant 0 : index
    %c4 = arith.constant 4 : index
    %c0_293 = arith.constant 0 : index
    %c0_294 = arith.constant 0 : index
    %1551 = vector.load %arg4[%c0_292, %c4, %c0_293, %c0_294] : memref<1x5x8x128xf32, #tpu.memory_space<vmem>>, vector<1x1x8x128xf32>
    %1552 = vector.shape_cast %1551 : vector<1x1x8x128xf32> to vector<8x128xf32>
    %1553 = vector.shape_cast %1550 : vector<8x128xf32> to vector<1x1x8x128xf32>
    tpu.vector_store %arg4[%c0_292, %c4, %c0_293, %c0_294], %1553 {strides = array<i32>} : memref<1x5x8x128xf32, #tpu.memory_space<vmem>>, vector<1x1x8x128xf32>,
    return
  }
  func.func @transform_0(%arg0: i32, %arg1: i32) -> i32 {
    %c0_i32 = arith.constant 0 : i32
    %c0_i32_0 = arith.constant 0 : i32
    return %c0_i32 : i32
  }
  func.func @transform_1(%arg0: i32, %arg1: i32) -> (i32, i32, i32) {
    %c0_i32 = arith.constant 0 : i32
    %c0_i32_0 = arith.constant 0 : i32
    return %arg0, %arg1, %c0_i32 : i32, i32, i32
  }
  func.func @transform_2(%arg0: i32, %arg1: i32) -> (i32, i32, i32, i32) {
    %c0_i32 = arith.constant 0 : i32
    %c0_i32_0 = arith.constant 0 : i32
    %c0_i32_1 = arith.constant 0 : i32
    return %arg0, %c0_i32, %arg1, %c0_i32_0 : i32, i32, i32, i32
  }
}

</mosaic_0001>

<bundles_post_ra>
// kernel: tpu_custom_call.1
= control target key start
LH: loop header
LB: loop body
LE: loop exit
PB: predicated region body
PF: predicated region fallthrough
CT: control target
= control target key end

     0   :  { %s4601_s0 = inlined_call_operand.hbm [shape: f32[144], index: 0, kind: input, shape index: {}]   ;;  %s4602_s1 = inlined_call_operand.hbm [shape: s32[2,8,128], index: 1, kind: output, shape index: {0}]   ;;  %s4603_s2 = inlined_call_operand.hbm [shape: f32[2,5,8,128], index: 2, kind: output, shape index: {1}]  }
   0x1   :  { %4748 = sst [smem:[#allocation103_spill]] %s4601_s0 }
   0x2   :  { %4749 = sst [smem:[#allocation104_spill]] %s4602_s1 }
   0x3   :  { %4750 = sst [smem:[#allocation105_spill]] %s4603_s2 }
   0x4   :  { %8 = vsyncpa [#allocation4], 0 }
   0x5   :  { %9 = vsyncpa [#allocation3], 0 }
   0x6   :  { %11 = vsyncpa [#allocation3 + $0x1], 0 }
   0x7   :  { %12 = vsyncpa [#allocation7], 0 }
   0x8   :  { %14 = vsyncpa [#allocation7 + $0x1], 0  ;;  %s2078_s9 = smov 0   ;;  %s2080_s10 = smov 0  }
   0x9   :  { %s2082_s11 = smov 0   ;;  %s2084_s12 = smov 0  }
   0xa   :  { %s2086_s13 = smov 0   ;;  %s2088_s14 = smov 0  }
   0xb LB: > { %4751 = sst [smem:[#allocation11_spill]] %s2035_s9  ;;  %s1713_s15 = sadd.s32 4294967295, %s2055_s14   ;;  %s2055_s14 = sphi %s2088_s14, %s20_s14   ;;  %s2051_s13 = sphi %s2086_s13, %s5143_s13   ;;  %s2047_s12 = sphi %s2084_s12, %s5142_s12   ;;  %s2043_s11 = sphi %s2082_s11, %s5141_s11   ;;  %s2039_s10 = sphi %s2080_s10, %s5140_s10   ;;  %s2035_s9 = sphi %s2078_s9, %s5139_s9  }
   0xc   : > { %4752 = sst [smem:[#allocation12_spill]] %s2039_s10  ;;  %s1714_s16 = sadd.s32 4294967294, %s2055_s14  }
   0xd   : > { %4753 = sst [smem:[#allocation13_spill]] %s2043_s11  ;;  %s32_s17 = sadd.s32 1, %s2051_s13 }
   0xe   : > { %4754 = sst [smem:[#allocation14_spill]] %s2047_s12  ;;  %s62_s18 = sadd.s32 1, %s2043_s11 }
   0xf   : > { %4755 = sst [smem:[#allocation15_spill]] %s2051_s13  ;;  %p34_p0 = scmp.ge.s32.totalorder %s32_s17, 2 }
  0x10   : > { %4756 = sst [smem:[#allocation16_spill]] %s2055_s14  ;;  %p72_p1 = scmp.ne.s32.totalorder %s2043_s11, %s2039_s10 }
  0x11   : > { %p73_p2 = scmp.eq.s32.totalorder %s1713_s15, 1  ;;  %p78_p3 = scmp.ne.s32.totalorder %s2039_s10, %s2035_s9 }
  0x12   : > { %s5145_s17 = smov (%p34_p0, %s32_s17), 0  ;;  %p79_p5 = scmp.eq.s32.totalorder %s1714_s16, 1 }
  0x13   : > { %4757 = sst [smem:[#allocation17_spill]] %s5145_s17  ;;  %p2118_p4 = por %p73_p2, %p72_p1 }
  0x14   : > { %s57_s20 = ssub.s32 %s2051_s13, %s5145_s17  ;;  %p1715_p6 = scmp.ge.s32.totalorder %s2055_s14, 1 }
  0x15   : > { %s4758_s19 = scalar_select %p2118_p4, 1, 0 }
  0x16   : > { %p60_p7 = scmp.eq.s32.totalorder %s57_s20, 0  ;;  %p2125_p8 = por %p79_p5, %p78_p3 }
  0x17   : > { %4759 = sst [smem:[#allocation18_spill]] %s4758_s19  ;;  %p114_p9 = scmp.lt.s32.totalorder %s2055_s14, 3 }
  0x18   : > { %s4760_s21 = scalar_select %p2125_p8, 1, 0 }
  0x19   : > { %s2131_s22 = scalar_select %p60_p7, %s2043_s11, %s62_s18  }
  0x1a   : > { %4761 = sst [smem:[#allocation19_spill]] %s4760_s21  ;;  %p115_p10 = pnand %p1715_p6, %p114_p9 }
  0x1b   : > { %4762 = sst [smem:[#allocation20_spill]] %s2131_s22  ;;  %p1815_p11 = scmp.eq.s32.totalorder %s1713_s15, 0 }
  0x1c   : > { %p1804_p12 = pneg %p115_p10  ;;  %s2057_s23 = smov [#allocation2]  }
  0x1d   : > { %s4763_s0 = sld [smem:[#allocation103_spill]] }
  0x1e   : > { %p1805_p13 = pnand %p1815_p11, %p1804_p12 }
  0x1f   : > { %138 = sbr.rel (%p115_p10) target bundleno = 475 (0x1db), region = 24 }
  0x23   : > { %1807 = dma.hbm_to_smem (!%p1805_p13), %s4763_s0, 32, %s2057_s23, [#allocation4]  }
  0x24   : > { %2022 = dma.done.wait (%p1815_p11), [#allocation4], 32  }
  0x25   : > { %2024 = vsyncadd (%p1815_p11), [#allocation4], 4294967264 }
  0x26   : > { %144 = sfence }
  0x27   : > { %s2137_s26 = smul.u32 72, %s2047_s12  ;;  %v161_v12 = vlaneseq }
  0x29   : > { %s2140_s27 = sld [smem:[#allocation2 + %s2137_s26]]  ;;  %s187_s28 = sadd.s32 1, %s2137_s26  ;;  %v162_v14 = vshrl.u32 %v161_v12, 7  ;;  %v167_v16 = vand.u32 127, %v161_v12 }
  0x2a   : > { %s2143_s29 = sld [smem:[#allocation2 + %s187_s28]]  ;;  %s191_s30 = sadd.s32 3, %s2137_s26 }
  0x2b   : > { %s2146_s3 = sld [smem:[#allocation2 + %s191_s30]]  ;;  %s193_s4 = sadd.s32 4, %s2137_s26  ;;  %v168_v17 = vmul.u32 128, %v162_v14 }
  0x2c   : > { %s2149_s5 = sld [smem:[#allocation2 + %s193_s4]]  ;;  %s197_s6 = sadd.s32 6, %s2137_s26 }
  0x2d   : > { %s2152_s7 = sld [smem:[#allocation2 + %s197_s6]]  ;;  %s199_s8 = sadd.s32 7, %s2137_s26  ;;  %v169_v18 = vadd.s32 %v168_v17, %v167_v16 }
  0x2e   : > { %s2155_s15 = sld [smem:[#allocation2 + %s199_s8]]  ;;  %s356_s16 = sadd.s32 9, %s2137_s26 }
  0x2f   : > { %4764 = sst [smem:[#allocation21_spill]] %s2140_s27  ;;  %s358_s20 = sadd.s32 10, %s2137_s26  ;;  %v170_v22 = vcvt.s32.f32 %v169_v18  ;;  %v240_v26 = vstv %s2140_s27 }
  0x30   : > { %4765 = sst [smem:[#allocation22_spill]] %s2143_s29  ;;  %s4786_s1 = sadd.s32 15, %s2137_s26  ;;  %v242_v27 = vstv %s2143_s29 }
  0x31   : > { %4766 = sst [smem:[#allocation23_spill]] %s2146_s3  ;;  %v171_v23 = vadd.f32 0.5, %v170_v22  ;;  %v244_v29 = vstv %s2146_s3 }
  0x32   : > { %4767 = sst [smem:[#allocation24_spill]] %s2149_s5  ;;  %v246_v30 = vstv %s2149_s5 }
  0x33   : > { %4768 = sst [smem:[#allocation25_spill]] %s2152_s7  ;;  %v173_v28 = vmul.f32 0.0625, %v171_v23  ;;  %v248_v31 = vstv %s2152_s7 }
  0x34   : > { %4769 = sst [smem:[#allocation26_spill]] %s2155_s15  ;;  %v250_v33 = vstv %s2155_s15 }
  0x35   : > { %s2158_s18 = sld [smem:[#allocation2 + %s356_s16]]  ;;  %v174_v36 = vfloor.f32 %v173_v28 }
  0x36   : > { %s2161_s23 = sld [smem:[#allocation2 + %s358_s20]] }
  0x37   : > { %s2166_s25 = ssub.f32 %s2146_s3, %s2140_s27  ;;  %v175_v43 = vmul.f32 16.0, %v174_v36  ;;  %v177_v44 = vmul.f32 2.0, %v174_v36 }
  0x38   : > { %s2171_s30 = ssub.f32 %s2149_s5, %s2143_s29 }
  0x39   : > { %4772 = sst [smem:[#allocation29_spill]] %s2166_s25  ;;  %s216_s8 = smul.f32 %s2166_s25, %s2166_s25  ;;  %v176_v52 = vsub.f32 %v170_v22, %v175_v43  ;;  %v178_v53 = vadd.f32 1.0, %v177_v44 }
  0x3a   : > { %4773 = sst [smem:[#allocation30_spill]] %s2171_s30  ;;  %s217_s20 = smul.f32 %s2171_s30, %s2171_s30  ;;  %v262_v39 = vstv %s2171_s30 }
  0x3b   : > { %4770 = sst [smem:[#allocation27_spill]] %s2158_s18  ;;  %v179_v58 = vmul.f32 0.0625, %v178_v53  ;;  %v181_v59 = vmul.f32 2.0, %v176_v52 }
  0x3c   : > { %4771 = sst [smem:[#allocation28_spill]] %s2161_s23 }
  0x3d   : > { %s2176_s6 = ssub.f32 %s2152_s7, %s2140_s27 }
  0x3e   : > { %s2182_s16 = ssub.f32 %s2155_s15, %s2143_s29 }
  0x3f   : > { %4774 = sst [smem:[#allocation31_spill]] %s2176_s6  ;;  %s209_s24 = smul.f32 %s2176_s6, %s2171_s30  ;;  %v257_v37 = vstv %s2176_s6 }
  0x40   : > { %4775 = sst [smem:[#allocation32_spill]] %s2182_s16  ;;  %s210_s28 = smul.f32 %s2182_s16, %s2166_s25  ;;  %v259_v38 = vstv %s2182_s16 }
  0x41   : > { %s2190_s0 = ssub.f32 %s2152_s7, %s2146_s3  ;;  %s219_s4 = smul.f32 %s2176_s6, %s2176_s6 }
  0x42   : > { %s2194_s17 = sadd.f32 %s217_s20, %s216_s8  ;;  %s220_s11 = smul.f32 %s2182_s16, %s2182_s16 }
  0x43   : > { %4776 = sst [smem:[#allocation33_spill]] %s2190_s0  ;;  %s222_s21 = smul.f32 %s2190_s0, %s2190_s0  ;;  %v254_v35 = vstv %s2190_s0 }
  0x44   : > { %4777 = sst [smem:[#allocation34_spill]] %s2194_s17  ;;  %p225_p0 = scmp.le.f32.partialorder %s2194_s17, 1e-08 }
  0x45   : > { %s2200_s13 = ssub.f32 %s2155_s15, %s2149_s5  ;;  %s4830_s3 = sadd.s32 33, %s2137_s26 }
  0x46   : > { %s211_s22 = ssub.f32 %s209_s24, %s210_s28  ;;  %s4784_s28 = sadd.s32 13, %s2137_s26 }
  0x47   : > { %4778 = sst [smem:[#allocation35_spill]] %s2200_s13  ;;  %v252_v34 = vstv %s2200_s13 }
  0x48   : > { %s212_s9 = sadd.f32 1e-08, %s211_s22  ;;  %s340_s8 = sand.u32 2147483647, %s211_s22 }
  0x49   : > { %p2207_p1 = scmp.gt.f32.partialorder %s340_s8, 1e-08  ;;  %s2211_s14 = sadd.f32 %s220_s11, %s219_s4 }
  0x4a   : > { %v213_v0 = vstv %s212_s9  ;;  %s228_s24 = scalar_select %p225_p0, 1.0, %s2194_s17 }
  0x4b   : > { %4780 = sst [smem:[#allocation36_spill]] %s2211_s14  ;;  %1870 = vrcp.f32 %v213_v0  ;;  %p226_p2 = scmp.le.f32.partialorder %s2211_s14, 1e-08 }
  0x4c   : > { %v229_v1 = vstv %s228_s24  ;;  %s223_s22 = smul.f32 %s2200_s13, %s2200_s13  ;;  %s4781_s11 = sadd.s32 12, %s2137_s26 }
  0x4d   : > { %1872 = vrcp.f32 %v229_v1  ;;  %s2223_s4 = sld [smem:[#allocation2 + %s4781_s11]]  ;;  %s370_s8 = sadd.s32 16, %s2137_s26 }
  0x4e   : > { %s232_s9 = scalar_select %p226_p2, 1.0, %s2211_s14 }
  0x4f   : > { %s2229_s2 = sadd.f32 %s223_s22, %s222_s21  ;;  %s527_s24 = sadd.s32 18, %s2137_s26 }
  0x50   : > { %v233_v2 = vstv %s232_s9  ;;  %s2234_s19 = sld [smem:[#allocation2 + %s4784_s28]] }
  0x51   : > { %4783 = sst [smem:[#allocation38_spill]] %s2229_s2  ;;  %1874 = vrcp.f32 %v233_v2  ;;  %p227_p3 = scmp.le.f32.partialorder %s2229_s2, 1e-08 }
  0x52   : > { %s2240_s12 = sld [smem:[#allocation2 + %s4786_s1]] }
  0x53   : > { %4782 = sst [smem:[#allocation37_spill]] %s2223_s4 }
  0x54   : > { %s2242_s21 = sld [smem:[#allocation2 + %s370_s8]] }
  0x55   : > { %s236_s9 = scalar_select %p227_p3, 1.0, %s2229_s2 }
  0x56   : > { %4785 = sst [smem:[#allocation39_spill]] %s2234_s19 }
  0x57   : > { %s2250_s28 = ssub.f32 %s2223_s4, %s2158_s18  ;;  %v237_v3 = vstv %s236_s9 }
  0x58   : > { %4787 = sst [smem:[#allocation40_spill]] %s2240_s12  ;;  %1876 = vrcp.f32 %v237_v3  ;;  %v1871_v4 = vpop.eup %1870 }
  0x59   : > { %4789 = sst [smem:[#allocation42_spill]] %s2250_s28  ;;  %s387_s8 = smul.f32 %s2250_s28, %s2250_s28  ;;  %1731 = vpush %v1871_v4  ;;  %v2496_v4 = vsub.f32 1.0, %v179_v58 }
  0x5a   : > { %4788 = sst [smem:[#allocation41_spill]] %s2242_s21  ;;  %v1873_v5 = vpop.eup %1872 }
  0x5b   : > { %s2253_s10 = sld [smem:[#allocation2 + %s527_s24]]  ;;  %1733 = vpush %v1873_v5  ;;  %4853 = vst [vmem:[#allocation68_spill] sm:$0xff] %v2496_v4  ;;  %v182_v5 = vadd.f32 1.0, %v181_v59  ;;  %v247_v14 = vsub.f32 %v2496_v4, %v246_v30 }
  0x5c   : > { %s2258_s1 = ssub.f32 %s2234_s19, %s2161_s23 }
  0x5d   : > { %s2264_s22 = ssub.f32 %s2240_s12, %s2158_s18  ;;  %v183_v12 = vmul.f32 0.0625, %v182_v5  ;;  %v288_v30 = vmul.f32 %v247_v14, %v247_v14 }
  0x5e   : > { %4791 = sst [smem:[#allocation44_spill]] %s2258_s1  ;;  %s388_s24 = smul.f32 %s2258_s1, %s2258_s1  ;;  %v1875_v6 = vpop.eup %1874 }
  0x5f   : > { %4792 = sst [smem:[#allocation45_spill]] %s2264_s22  ;;  %s380_s14 = smul.f32 %s2264_s22, %s2258_s1  ;;  %1735 = vpush %v1875_v6 }
  0x60   : > { %s2269_s9 = ssub.f32 %s2242_s21, %s2161_s23  ;;  %s390_s2 = smul.f32 %s2264_s22, %s2264_s22 }
  0x61   : > { %4790 = sst [smem:[#allocation43_spill]] %s2253_s10  ;;  %v582_v60 = vstv %s2253_s10 }
  0x62   : > { %4793 = sst [smem:[#allocation46_spill]] %s2269_s9  ;;  %s381_s17 = smul.f32 %s2269_s9, %s2250_s28 }
  0x63   : > { %s2277_s11 = ssub.f32 %s2240_s12, %s2223_s4  ;;  %s391_s1 = smul.f32 %s2269_s9, %s2269_s9 }
  0x64   : > { %s2281_s18 = sadd.f32 %s388_s24, %s387_s8  ;;  %s4798_s28 = sadd.s32 19, %s2137_s26 }
  0x65   : > { %4794 = sst [smem:[#allocation47_spill]] %s2277_s11  ;;  %s393_s22 = smul.f32 %s2277_s11, %s2277_s11  ;;  %v1877_v9 = vpop.eup %1876 }
  0x66   : > { %4795 = sst [smem:[#allocation48_spill]] %s2281_s18  ;;  %p396_p5 = scmp.le.f32.partialorder %s2281_s18, 1e-08  ;;  %1737 = vpush %v1877_v9 }
  0x67   : > { %s2287_s23 = ssub.f32 %s2242_s21, %s2234_s19  ;;  %s698_s9 = sadd.s32 27, %s2137_s26 }
  0x68   : > { %s2289_s25 = ssub.f32 %s380_s14, %s381_s17 }
  0x69   : > { %4796 = sst [smem:[#allocation49_spill]] %s2287_s23  ;;  %s394_s17 = smul.f32 %s2287_s23, %s2287_s23 }
  0x6a   : > { %4797 = sst [smem:[#allocation50_spill]] %s2289_s25 }
  0x6b   : > { %s2296_s8 = sld [smem:[#allocation2 + %s4798_s28]]  ;;  %s4801_s28 = sadd.s32 21, %s2137_s26 }
  0x6c   : > { %s383_s24 = sadd.f32 1e-08, %s2289_s25 }
  0x6d   : > { %s399_s21 = scalar_select %p396_p5, 1.0, %s2281_s18 }
  0x6e   : > { %v384_v7 = vstv %s383_s24  ;;  %s2304_s14 = sadd.f32 %s391_s1, %s390_s2  ;;  %s4804_s1 = sadd.s32 22, %s2137_s26 }
  0x6f   : > { %1878 = vrcp.f32 %v384_v7  ;;  %v400_v8 = vstv %s399_s21  ;;  %s2310_s25 = sld [smem:[#allocation2 + %s4801_s28]]  ;;  %s4806_s18 = sadd.s32 24, %s2137_s26 }
  0x70   : > { %4800 = sst [smem:[#allocation52_spill]] %s2304_s14  ;;  %1880 = vrcp.f32 %v400_v8  ;;  %p397_p6 = scmp.le.f32.partialorder %s2304_s14, 1e-08 }
  0x71   : > { %4799 = sst [smem:[#allocation51_spill]] %s2296_s8 }
  0x72   : > { %s2314_s2 = sadd.f32 %s394_s17, %s393_s22  ;;  %s4807_s22 = sadd.s32 25, %s2137_s26 }
  0x73   : > { %s2318_s24 = sld [smem:[#allocation2 + %s4804_s1]] }
  0x74   : > { %4803 = sst [smem:[#allocation54_spill]] %s2314_s2  ;;  %p398_p7 = scmp.le.f32.partialorder %s2314_s2, 1e-08 }
  0x75   : > { %4802 = sst [smem:[#allocation53_spill]] %s2310_s25  ;;  %v586_v63 = vstv %s2310_s25 }
  0x76   : > { %s403_s28 = scalar_select %p397_p6, 1.0, %s2304_s14 }
  0x77   : > { %s2327_s11 = sld [smem:[#allocation2 + %s4806_s18]] }
  0x78   : > { %v404_v10 = vstv %s403_s28  ;;  %s2331_s17 = sld [smem:[#allocation2 + %s4807_s22]] }
  0x79   : > { %4805 = sst [smem:[#allocation55_spill]] %s2318_s24  ;;  %1882 = vrcp.f32 %v404_v10  ;;  %v588_v0 = vstv %s2318_s24 }
  0x7a   : > { %s407_s21 = scalar_select %p398_p7, 1.0, %s2314_s2 }
  0x7b   : > { %s2339_s23 = ssub.f32 %s2310_s25, %s2253_s10 }
  0x7c   : > { %v408_v11 = vstv %s407_s21  ;;  %s2344_s18 = ssub.f32 %s2318_s24, %s2296_s8  ;;  %v1879_v13 = vpop.eup %1878 }
  0x7d   : > { %4809 = sst [smem:[#allocation57_spill]] %s2339_s23  ;;  %1884 = vrcp.f32 %v408_v11  ;;  %s558_s22 = smul.f32 %s2339_s23, %s2339_s23  ;;  %v1881_v15 = vpop.eup %1880  ;;  %1739 = vpush %v1879_v13  ;;  %v590_v1 = vstv %s2327_s11  ;;  %v243_v13 = vsub.f32 %v2496_v4, %v242_v27 }
  0x7e   : > { %4808 = sst [smem:[#allocation56_spill]] %s2331_s17  ;;  %s559_s2 = smul.f32 %s2344_s18, %s2344_s18  ;;  %1741 = vpush %v1881_v15  ;;  %v592_v2 = vstv %s2331_s17  ;;  %v251_v15 = vsub.f32 %v2496_v4, %v250_v33 }
  0x7f   : > { %4810 = sst [smem:[#allocation58_spill]] %s2344_s18  ;;  %v285_v28 = vmul.f32 %v243_v13, %v243_v13  ;;  %v309_v43 = vmul.f32 %v259_v38, %v243_v13 }
  0x80   : > { %s2349_s1 = sld [smem:[#allocation2 + %s698_s9]]  ;;  %v258_v22 = vmul.f32 %v257_v37, %v251_v15  ;;  %v291_v27 = vmul.f32 %v251_v15, %v251_v15 }
  0x81   : > { %s2353_s12 = ssub.f32 %s2327_s11, %s2253_s10 }
  0x82   : > { %s2359_s14 = ssub.f32 %s2331_s17, %s2296_s8 }
  0x83   : > { %4812 = sst [smem:[#allocation60_spill]] %s2353_s12  ;;  %s551_s19 = smul.f32 %s2353_s12, %s2344_s18 }
  0x84   : > { %4813 = sst [smem:[#allocation61_spill]] %s2359_s14  ;;  %s552_s9 = smul.f32 %s2359_s14, %s2339_s23 }
  0x85   : > { %s2364_s4 = sadd.f32 %s559_s2, %s558_s22  ;;  %s561_s8 = smul.f32 %s2353_s12, %s2353_s12 }
  0x86   : > { %4811 = sst [smem:[#allocation59_spill]] %s2349_s1  ;;  %s562_s22 = smul.f32 %s2359_s14, %s2359_s14  ;;  %v1883_v20 = vpop.eup %1882 }
  0x87   : > { %4814 = sst [smem:[#allocation62_spill]] %s2364_s4  ;;  %p567_p9 = scmp.le.f32.partialorder %s2364_s4, 1e-08  ;;  %1743 = vpush %v1883_v20  ;;  %v2544_v20 = vsub.f32 1.0, %v183_v12 }
  0x88   : > { %s2370_s28 = ssub.f32 %s2327_s11, %s2310_s25 }
  0x89   : > { %s2375_s2 = ssub.f32 %s551_s19, %s552_s9  ;;  %4865 = vst [vmem:[#allocation69_spill] sm:$0xff] %v2544_v20  ;;  %v241_v33 = vsub.f32 %v2544_v20, %v240_v26  ;;  %v245_v36 = vsub.f32 %v2544_v20, %v244_v29 }
  0x8a   : > { %s570_s21 = scalar_select %p567_p9, 1.0, %s2364_s4  ;;  %v1885_v24 = vpop.eup %1884  ;;  %v596_v7 = vstv %s2370_s28 }
  0x8b   : > { %4815 = sst [smem:[#allocation63_spill]] %s2375_s2  ;;  %s564_s18 = smul.f32 %s2370_s28, %s2370_s28  ;;  %1745 = vpush %v1885_v24  ;;  %v284_v52 = vmul.f32 %v241_v33, %v241_v33  ;;  %v287_v58 = vmul.f32 %v245_v36, %v245_v36 }
  0x8c   : > { %s554_s23 = sadd.f32 1e-08, %s2375_s2  ;;  %v571_v19 = vstv %s570_s21 }
  0x8d   : > { %s2385_s12 = sadd.f32 %s562_s22, %s561_s8  ;;  %1886 = vrcp.f32 %v571_v19  ;;  %s4817_s8 = sadd.s32 28, %s2137_s26 }
  0x8e   : > { %v555_v21 = vstv %s554_s23  ;;  %s2390_s9 = ssub.f32 %s2331_s17, %s2318_s24  ;;  %s4819_s23 = sadd.s32 30, %s2137_s26 }
  0x8f   : > { %4816 = sst [smem:[#allocation64_spill]] %s2385_s12  ;;  %1888 = vrcp.f32 %v555_v21  ;;  %p568_p10 = scmp.le.f32.partialorder %s2385_s12, 1e-08  ;;  %v255_v21 = vmul.f32 %v254_v35, %v247_v14 }
  0x90   : > { %s2396_s21 = sld [smem:[#allocation2 + %s4817_s8]]  ;;  %s565_s22 = smul.f32 %s2390_s9, %s2390_s9  ;;  %v594_v6 = vstv %s2390_s9 }
  0x91   : > { %s2402_s19 = sld [smem:[#allocation2 + %s4819_s23]]  ;;  %s4904_s9 = sadd.s32 51, %s2137_s26 }
  0x92   : > { %s4821_s4 = scalar_select %p2207_p1, 1, 0 }
  0x93   : > { %s574_s2 = scalar_select %p568_p10, 1.0, %s2385_s12 }
  0x94   : > { %v2407_v25 = vstv %s4821_s4  ;;  %s2414_s8 = sadd.f32 %s565_s22, %s564_s18  ;;  %s4824_s4 = sadd.s32 31, %s2137_s26 }
  0x95   : > { %s4823_s20 = sld [smem:[#allocation29_spill]]  ;;  %v575_v32 = vstv %s574_s2  ;;  %s4834_s18 = sadd.s32 34, %s2137_s26 }
  0x96   : > { %4818 = sst [smem:[#allocation65_spill]] %s2396_s21  ;;  %1890 = vrcp.f32 %v575_v32  ;;  %p569_p11 = scmp.le.f32.partialorder %s2414_s8, 1e-08  ;;  %v294_v32 = vmul.f32 %v262_v39, %v243_v13 }
  0x97   : > { %4820 = sst [smem:[#allocation66_spill]] %s2402_s19 }
  0x98   : > { %4822 = sst [smem:[#allocation67_spill]] %s2414_s8 }
  0x99   : > { %s4825_s12 = sld [smem:[#allocation27_spill]] }
  0x9a   : > { %s2422_s27 = sld [smem:[#allocation2 + %s4824_s4]]  ;;  %v1887_v62 = vpop.eup %1886 }
  0x9b   : > { %s4827_s29 = sld [smem:[#allocation28_spill]]  ;;  %v264_v40 = vstv %s4823_s20 }
  0x9c   : > { %s4828_s22 = sld [smem:[#allocation37_spill]]  ;;  %v1889_v3 = vpop.eup %1888  ;;  %v265_v23 = vmul.f32 %v264_v40, %v243_v13  ;;  %v293_v59 = vmul.f32 %v264_v40, %v241_v33  ;;  %v2631_v40 = vadd.f32 %v288_v30, %v287_v58 }
  0x9d   : > { %s4829_s23 = sld [smem:[#allocation39_spill]]  ;;  %1747 = vpush %v1889_v3  ;;  %v308_v3 = vmul.f32 %v257_v37, %v241_v33  ;;  %v323_v37 = vmul.f32 %v254_v35, %v245_v36 }
  0x9e   : > { %s2431_s7 = sld [smem:[#allocation2 + %s4830_s3]]  ;;  %1749 = vpush %v1887_v62  ;;  %v2622_v62 = vadd.f32 %v285_v28, %v284_v52  ;;  %v2633_v5 = vadd.f32 %v294_v32, %v293_v59 }
  0x9f   : > { %s4832_s2 = sld [smem:[#allocation40_spill]]  ;;  %v411_v41 = vstv %s4825_s12  ;;  %v2650_v15 = vadd.f32 %v309_v43, %v308_v3 }
  0xa0   : > { %4826 = sst [smem:[#allocation29_spill]] %s2422_s27  ;;  %v2583_v26 = vsub.f32 %v2544_v20, %v411_v41  ;;  %v263_v41 = vmul.f32 %v262_v39, %v241_v33 }
  0xa1   : > { %s4833_s4 = sld [smem:[#allocation41_spill]]  ;;  %v413_v42 = vstv %s4827_s29  ;;  %s4843_s29 = sadd.s32 36, %s2137_s26 }
  0xa2   : > { %s4835_s5 = sld [smem:[#allocation49_spill]]  ;;  %v415_v45 = vstv %s4828_s22  ;;  %v2527_v16 = vsub.f32 %v2496_v4, %v413_v42  ;;  %v249_v42 = vsub.f32 %v2544_v20, %v248_v31  ;;  %v2618_v39 = vsub.f32 %v263_v41, %v265_v23 }
  0xa3   : > { %s2437_s15 = sld [smem:[#allocation2 + %s4834_s18]]  ;;  %v417_v46 = vstv %s4829_s23  ;;  %v1891_v24 = vpop.eup %1890  ;;  %v2588_v29 = vsub.f32 %v2544_v20, %v415_v45 }
  0xa4   : > { %4831 = sst [smem:[#allocation27_spill]] %s2431_s7  ;;  %v2530_v17 = vsub.f32 %v2496_v4, %v417_v46  ;;  %1751 = vpush %v1891_v24  ;;  %v324_v46 = vmul.f32 %v252_v34, %v247_v14  ;;  %v290_v45 = vmul.f32 %v249_v42, %v249_v42  ;;  %v2648_v14 = vmul.f32 %v2618_v39, %v2618_v39 }
  0xa5   : > { %s4837_s13 = sld [smem:[#allocation47_spill]]  ;;  %v419_v47 = vstv %s4832_s2 }
  0xa6   : > { %s578_s3 = scalar_select %p569_p11, 1.0, %s2414_s8 }
  0xa7   : > { %s4838_s14 = sld [smem:[#allocation45_spill]]  ;;  %v421_v48 = vstv %s4833_s4 }
  0xa8   : > { %s4839_s16 = sld [smem:[#allocation46_spill]]  ;;  %v423_v49 = vstv %s4835_s5  ;;  %v579_v51 = vstv %s578_s3  ;;  %v2533_v18 = vsub.f32 %v2496_v4, %v421_v48  ;;  %v253_v48 = vmul.f32 %v252_v34, %v245_v36  ;;  %s4901_s5 = sadd.s32 49, %s2137_s26 }
  0xa9   : > { %4836 = sst [smem:[#allocation28_spill]] %s2437_s15  ;;  %1892 = vrcp.f32 %v579_v51  ;;  %v260_v51 = vmul.f32 %v259_v38, %v249_v42  ;;  %v424_v23 = vmul.f32 %v423_v49, %v2588_v29 }
  0xaa   : > { %s2451_s18 = ssub.f32 %s2402_s19, %s2349_s1  ;;  %v2609_v34 = vsub.f32 %v253_v48, %v255_v21  ;;  %v2659_v21 = vadd.f32 %v324_v46, %v323_v37  ;;  %v462_v36 = vmul.f32 %v2533_v18, %v2533_v18  ;;  %v458_v48 = vmul.f32 %v2588_v29, %v2588_v29 }
  0xab   : > { %s4841_s0 = sld [smem:[#allocation44_spill]]  ;;  %v425_v50 = vstv %s4837_s13  ;;  %v2611_v38 = vsub.f32 %v258_v22, %v260_v51  ;;  %v420_v22 = vsub.f32 %v2544_v20, %v419_v47  ;;  %v459_v51 = vmul.f32 %v2530_v17, %v2530_v17 }
  0xac   : > { %4840 = sst [smem:[#allocation39_spill]] %s2451_s18  ;;  %s729_s4 = smul.f32 %s2451_s18, %s2451_s18  ;;  %v2654_v35 = vmul.f32 %v2609_v34, %v2609_v34  ;;  %v426_v24 = vmul.f32 %v425_v50, %v2530_v17 }
  0xad   : > { %s4842_s6 = sld [smem:[#allocation42_spill]]  ;;  %v428_v54 = vstv %s4838_s14  ;;  %v2637_v12 = vmul.f32 %v2611_v38, %v2611_v38  ;;  %v461_v33 = vmul.f32 %v420_v22, %v420_v22  ;;  %v2758_v3 = vadd.f32 %v459_v51, %v458_v48 }
  0xae   : > { %s2460_s8 = sld [smem:[#allocation2 + %s4843_s29]]  ;;  %v430_v55 = vstv %s4839_s16  ;;  %v2699_v42 = vsub.f32 %v424_v23, %v426_v24  ;;  %v479_v58 = vmul.f32 %v428_v54, %v2583_v26 }
  0xaf   : > { %s4844_s23 = sld [smem:[#allocation51_spill]]  ;;  %v431_v32 = vmul.f32 %v430_v55, %v420_v22  ;;  %v2713_v46 = vadd.f32 %v462_v36, %v461_v33 }
  0xb0   : > { %s2466_s30 = ssub.f32 %s2422_s27, %s2396_s21 }
  0xb1   : > { %v433_v56 = vstv %s4841_s0  ;;  %s2475_s3 = ssub.f32 %s2431_s7, %s2349_s1 }
  0xb2   : > { %4845 = sst [smem:[#allocation40_spill]] %s2466_s30  ;;  %v434_v28 = vmul.f32 %v433_v56, %v2583_v26 }
  0xb3   : > { %v435_v57 = vstv %s4842_s6  ;;  %s2482_s22 = ssub.f32 %s2437_s15, %s2396_s21  ;;  %s730_s6 = smul.f32 %s2466_s30, %s2466_s30 }
  0xb4   : > { %s4847_s16 = sld [smem:[#allocation60_spill]]  ;;  %v436_v47 = vmul.f32 %v435_v57, %v2527_v16  ;;  %v464_v41 = vmul.f32 %v435_v57, %v2583_v26  ;;  %v480_v57 = vmul.f32 %v430_v55, %v2527_v16  ;;  %v495_v55 = vmul.f32 %v423_v49, %v2530_v17 }
  0xb5   : > { %v584_v61 = vstv %s4844_s23  ;;  %4846 = sst [smem:[#allocation41_spill]] %s2482_s22  ;;  %s722_s23 = smul.f32 %s2475_s3, %s2466_s30  ;;  %v583_v49 = vsub.f32 %v2544_v20, %v582_v60  ;;  %v591_v60 = vsub.f32 %v2544_v20, %v590_v1 }
  0xb6   : > { %s4848_s0 = sld [smem:[#allocation61_spill]]  ;;  %s723_s24 = smul.f32 %s2482_s22, %s2451_s18  ;;  %v2536_v19 = vsub.f32 %v2496_v4, %v584_v61  ;;  %v1893_v53 = vpop.eup %1892  ;;  %v2620_v61 = vadd.f32 %v291_v27, %v290_v45  ;;  %v429_v27 = vmul.f32 %v428_v54, %v2533_v18  ;;  %v2701_v43 = vsub.f32 %v434_v28, %v436_v47 }
  0xb7   : > { %s4849_s1 = sld [smem:[#allocation58_spill]]  ;;  %s733_s13 = smul.f32 %s2482_s22, %s2482_s22  ;;  %1753 = vpush %v1893_v53  ;;  %v465_v45 = vmul.f32 %v433_v56, %v2527_v16  ;;  %v494_v54 = vmul.f32 %v425_v50, %v2588_v29  ;;  %v587_v50 = vsub.f32 %v2544_v20, %v586_v63  ;;  %v589_v29 = vsub.f32 %v2496_v4, %v588_v0 }
  0xb8   : > { %s4850_s14 = sld [smem:[#allocation57_spill]]  ;;  %s4874_s18 = sadd.s32 42, %s2137_s26  ;;  %v2711_v18 = vsub.f32 %v429_v27, %v431_v32  ;;  %v2734_v52 = vmul.f32 %v2701_v43, %v2701_v43  ;;  %v593_v63 = vsub.f32 %v2496_v4, %v592_v2  ;;  %v626_v27 = vmul.f32 %v583_v49, %v583_v49 }
  0xb9   : > { %s2494_s29 = ssub.f32 %s2431_s7, %s2402_s19  ;;  %s4871_s7 = sadd.s32 39, %s2137_s26  ;;  %v2760_v37 = vadd.f32 %v465_v45, %v464_v41  ;;  %v2787_v17 = vadd.f32 %v495_v55, %v494_v54  ;;  %v595_v22 = vmul.f32 %v594_v6, %v587_v50  ;;  %v597_v0 = vmul.f32 %v596_v7, %v589_v29 }
  0xba   : > { %s2502_s25 = sadd.f32 %s730_s6, %s729_s4  ;;  %v599_v8 = vstv %s4847_s16  ;;  %v2750_v56 = vmul.f32 %v2711_v18, %v2711_v18  ;;  %v632_v28 = vmul.f32 %v591_v60, %v591_v60  ;;  %v633_v32 = vmul.f32 %v593_v63, %v593_v63 }
  0xbb   : > { %4851 = sst [smem:[#allocation49_spill]] %s2494_s29  ;;  %v600_v1 = vmul.f32 %v599_v8, %v593_v63  ;;  %v627_v33 = vmul.f32 %v2536_v19, %v2536_v19  ;;  %v629_v45 = vmul.f32 %v587_v50, %v587_v50 }
  0xbc   : > { %4856 = sst [smem:[#allocation51_spill]] %s2502_s25  ;;  %v601_v9 = vstv %s4848_s0  ;;  %p738_p12 = scmp.le.f32.partialorder %s2502_s25, 1e-08  ;;  %v2838_v51 = vadd.f32 %v633_v32, %v632_v28 }
  0xbd   : > { %v604_v10 = vstv %s4849_s1  ;;  %s2512_s17 = ssub.f32 %s2437_s15, %s2422_s27  ;;  %v602_v2 = vmul.f32 %v601_v9, %v591_v60  ;;  %v2840_v41 = vadd.f32 %v627_v33, %v626_v27  ;;  %v651_v60 = vmul.f32 %v601_v9, %v2536_v19 }
  0xbe   : > { %v606_v11 = vstv %s4850_s14  ;;  %s2523_s6 = ssub.f32 %s722_s23, %s723_s24  ;;  %s4862_s24 = sadd.s32 37, %s2137_s26  ;;  %v605_v23 = vmul.f32 %v604_v10, %v583_v49  ;;  %4892 = vst [vmem:[#allocation70_spill] sm:$0xff] %v2838_v51  ;;  %v666_v9 = vmul.f32 %v594_v6, %v589_v29 }
  0xbf   : > { %s2542_s23 = sld [smem:[#allocation2 + %s4862_s24]]  ;;  %s735_s24 = smul.f32 %s2494_s29, %s2494_s29  ;;  %v607_v24 = vmul.f32 %v606_v11, %v2536_v19  ;;  %v2831_v48 = vsub.f32 %v600_v1, %v602_v2  ;;  %4893 = vst [vmem:[#allocation71_spill] sm:$0xff] %v2840_v41  ;;  %v765_v33 = vstv %s2512_s17 }
  0xc0   : > { %4859 = sst [smem:[#allocation60_spill]] %s2523_s6 }
  0xc1   : > { %s725_s22 = sadd.f32 1e-08, %s2523_s6  ;;  %s4869_s6 = smul.f32 %s2475_s3, %s2475_s3 }
  0xc2   : > { %s741_s0 = scalar_select %p738_p12, 1.0, %s2502_s25 }
  0xc3   : > { %v726_v44 = vstv %s725_s22  ;;  %s2574_s29 = sadd.f32 %s733_s13, %s4869_s6  ;;  %s736_s25 = smul.f32 %s2512_s17, %s2512_s17 }
  0xc4   : > { %1894 = vrcp.f32 %v726_v44  ;;  %v742_v31 = vstv %s741_s0  ;;  %s2592_s22 = sld [smem:[#allocation2 + %s4871_s7]]  ;;  %s4873_s0 = sadd.s32 40, %s2137_s26  ;;  %v455_v44 = vmul.f32 %v2583_v26, %v2583_v26  ;;  %v2771_v26 = vadd.f32 %v480_v57, %v479_v58 }
  0xc5   : > { %4870 = sst [smem:[#allocation58_spill]] %s2574_s29  ;;  %1896 = vrcp.f32 %v742_v31  ;;  %p4712_p13 = scmp.le.f32.partialorder %s2574_s29, 1e-08  ;;  %v456_v31 = vmul.f32 %v2527_v16, %v2527_v16  ;;  %v630_v58 = vmul.f32 %v589_v29, %v589_v29  ;;  %v635_v57 = vmul.f32 %v606_v11, %v583_v49 }
  0xc6   : > { %s2600_s12 = sadd.f32 %s736_s25, %s735_s24  ;;  %s4878_s13 = sadd.s32 43, %s2137_s26  ;;  %v2867_v11 = vmul.f32 %v2831_v48, %v2831_v48 }
  0xc7   : > { %s2606_s27 = sld [smem:[#allocation2 + %s4873_s0]]  ;;  %s4882_s7 = sadd.s32 45, %s2137_s26  ;;  %v2740_v53 = vadd.f32 %v456_v31, %v455_v44  ;;  %v2829_v31 = vsub.f32 %v595_v22, %v597_v0  ;;  %v2877_v63 = vadd.f32 %v630_v58, %v629_v45 }
  0xc8   : > { %4872 = sst [smem:[#allocation57_spill]] %s2600_s12  ;;  %p4696_p1 = scmp.le.f32.partialorder %s2600_s12, 1e-08 }
  0xc9   : > { %s745_s25 = scalar_select %p4712_p13, 1.0, %s2574_s29 }
  0xca   : > { %s2629_s20 = sld [smem:[#allocation2 + %s4874_s18]] }
  0xcb   : > { %v746_v13 = vstv %s745_s25  ;;  %s2643_s24 = sld [smem:[#allocation2 + %s4878_s13]] }
  0xcc   : > { %1898 = vrcp.f32 %v746_v13  ;;  %s749_s0 = scalar_select %p4696_p1, 1.0, %s2600_s12  ;;  %v2775_v13 = vmul.f32 %v2699_v42, %v2699_v42 }
  0xcd   : > { %s2669_s25 = ssub.f32 %s2592_s22, %s2460_s8 }
  0xce   : > { %v750_v30 = vstv %s749_s0  ;;  %s2686_s2 = ssub.f32 %s2606_s27, %s2542_s23 }
  0xcf   : > { %4881 = sst [smem:[#allocation22_spill]] %s2669_s25  ;;  %1900 = vrcp.f32 %v750_v30  ;;  %s900_s18 = smul.f32 %s2669_s25, %s2669_s25  ;;  %v2820_v30 = vsub.f32 %v605_v23, %v607_v24 }
  0xd0   : > { %s2697_s0 = sld [smem:[#allocation2 + %s4882_s7]]  ;;  %s901_s15 = smul.f32 %s2686_s2, %s2686_s2 }
  0xd1   : > { %s2707_s13 = ssub.f32 %s2629_s20, %s2460_s8  ;;  %v1895_v59 = vpop.eup %1894  ;;  %v2855_v54 = vmul.f32 %v2820_v30, %v2820_v30 }
  0xd2   : > { %s2721_s7 = ssub.f32 %s2643_s24, %s2542_s23  ;;  %v1897_v16 = vpop.eup %1896  ;;  %1755 = vpush %v1895_v59  ;;  %v636_v59 = vmul.f32 %v604_v10, %v2536_v19  ;;  %v665_v10 = vmul.f32 %v596_v7, %v587_v50  ;;  %v2885_v19 = vmul.f32 %v2829_v31, %v2829_v31 }
  0xd3   : > { %s893_s12 = smul.f32 %s2707_s13, %s2686_s2  ;;  %s2738_s29 = sadd.f32 %s901_s15, %s900_s18  ;;  %1757 = vpush %v1897_v16  ;;  %v650_v16 = vmul.f32 %v599_v8, %v583_v49 }
  0xd4   : > { %s894_s6 = smul.f32 %s2721_s7, %s2669_s25  ;;  %s2756_s15 = ssub.f32 %s2629_s20, %s2592_s22  ;;  %v2879_v8 = vadd.f32 %v636_v59, %v635_v57  ;;  %4899 = vst [vmem:[#allocation72_spill] sm:$0xff] %v2885_v19  ;;  %v2901_v6 = vadd.f32 %v666_v9, %v665_v10 }
  0xd5   : > { %4883 = sst [smem:[#allocation24_spill]] %s2738_s29  ;;  %p4698_p1 = scmp.le.f32.partialorder %s2738_s29, 1e-08  ;;  %v2892_v49 = vadd.f32 %v651_v60, %v650_v16 }
  0xd6   : > { %s903_s30 = smul.f32 %s2707_s13, %s2707_s13  ;;  %s2783_s4 = ssub.f32 %s893_s12, %s894_s6 }
  0xd7   : > { %s904_s25 = smul.f32 %s2721_s7, %s2721_s7  ;;  %s2826_s18 = ssub.f32 %s2643_s24, %s2606_s27 }
  0xd8   : > { %4889 = sst [smem:[#allocation26_spill]] %s2783_s4  ;;  %s906_s11 = smul.f32 %s2756_s15, %s2756_s15 }
  0xd9   : > { %s912_s21 = scalar_select %p4698_p1, 1.0, %s2738_s29  ;;  %v1899_v36 = vpop.eup %1898 }
  0xda   : > { %s896_s6 = sadd.f32 1e-08, %s2783_s4  ;;  %1759 = vpush %v1899_v36 }
  0xdb   : > { %v913_v47 = vstv %s912_s21  ;;  %s2817_s12 = sadd.f32 %s904_s25, %s903_s30  ;;  %s4891_s25 = sadd.s32 46, %s2137_s26 }
  0xdc   : > { %v897_v44 = vstv %s896_s6  ;;  %1902 = vrcp.f32 %v913_v47  ;;  %s2836_s30 = sld [smem:[#allocation2 + %s4891_s25]]  ;;  %s907_s21 = smul.f32 %s2826_s18, %s2826_s18  ;;  %v1901_v55 = vpop.eup %1900 }
  0xdd   : > { %4890 = sst [smem:[#allocation33_spill]] %s2817_s12  ;;  %1904 = vrcp.f32 %v897_v44  ;;  %p4700_p1 = scmp.le.f32.partialorder %s2817_s12, 1e-08  ;;  %1761 = vpush %v1901_v55  ;;  %v770_v44 = vstv %s2475_s3 }
  0xde   : > { %s4894_s6 = sadd.s32 48, %s2137_s26  ;;  %s4895_s10 = sld [smem:[#allocation59_spill]] }
  0xdf   : > { %s2846_s19 = sld [smem:[#allocation2 + %s4894_s6]] }
  0xe0   : > { %s916_s25 = scalar_select %p4700_p1, 1.0, %s2817_s12 }
  0xe1   : > { %s4896_s6 = sld [smem:[#allocation65_spill]] }
  0xe2   : > { %s2874_s14 = sadd.f32 %s907_s21, %s906_s11  ;;  %v917_v7 = vstv %s916_s25 }
  0xe3   : > { %s4898_s16 = sld [smem:[#allocation66_spill]]  ;;  %1906 = vrcp.f32 %v917_v7 }
  0xe4   : > { %4897 = sst [smem:[#allocation31_spill]] %s2874_s14  ;;  %v753_v50 = vstv %s4895_s10  ;;  %p4706_p1 = scmp.le.f32.partialorder %s2874_s14, 1e-08 }
  0xe5   : > { %s4900_s28 = sld [smem:[#allocation29_spill]]  ;;  %v754_v29 = vsub.f32 %v2544_v20, %v753_v50 }
  0xe6   : > { %s4902_s11 = sld [smem:[#allocation27_spill]] }
  0xe7   : > { %s2889_s21 = sld [smem:[#allocation2 + %s4901_s5]]  ;;  %v755_v22 = vstv %s4896_s6  ;;  %s4906_s5 = sadd.s32 52, %s2137_s26  ;;  %v821_v19 = vmul.f32 %v770_v44, %v754_v29 }
  0xe8   : > { %s4903_s1 = sld [smem:[#allocation28_spill]]  ;;  %v756_v23 = vsub.f32 %v2496_v4, %v755_v22 }
  0xe9   : > { %s2899_s29 = sld [smem:[#allocation2 + %s4904_s9]]  ;;  %v757_v24 = vstv %s4898_s16 }
  0xea   : > { %s4905_s25 = sld [smem:[#allocation49_spill]]  ;;  %v758_v2 = vsub.f32 %v2544_v20, %v757_v24  ;;  %v1903_v24 = vpop.eup %1902 }
  0xeb   : > { %s2907_s10 = sld [smem:[#allocation2 + %s4906_s5]]  ;;  %v759_v27 = vstv %s4900_s28  ;;  %v1905_v51 = vpop.eup %1904 }
  0xec   : > { %s4907_s6 = sld [smem:[#allocation41_spill]]  ;;  %v761_v0 = vstv %s4902_s11  ;;  %v760_v28 = vsub.f32 %v2496_v4, %v759_v27  ;;  %v766_v57 = vmul.f32 %v765_v33, %v758_v2  ;;  %1763 = vpush %v1905_v51 }
  0xed   : > { %s920_s9 = scalar_select %p4706_p1, 1.0, %s2874_s14  ;;  %v762_v47 = vsub.f32 %v2544_v20, %v761_v0  ;;  %1765 = vpush %v1903_v24 }
  0xee   : > { %v763_v1 = vstv %s4903_s1  ;;  %s2923_s5 = ssub.f32 %s2846_s19, %s2697_s0  ;;  %s4911_s1 = sadd.s32 54, %s2137_s26 }
  0xef   : > { %v764_v32 = vsub.f32 %v2496_v4, %v763_v1  ;;  %s4909_s16 = sld [smem:[#allocation40_spill]]  ;;  %v921_v58 = vstv %s920_s9  ;;  %v803_v22 = vmul.f32 %v762_v47, %v762_v47  ;;  %v797_v1 = vmul.f32 %v754_v29, %v754_v29  ;;  %s4918_s14 = sadd.s32 55, %s2137_s26 }
  0xf0   : > { %4908 = sst [smem:[#allocation30_spill]] %s2923_s5  ;;  %v767_v36 = vstv %s4905_s25  ;;  %1908 = vrcp.f32 %v921_v58  ;;  %s1071_s17 = smul.f32 %s2923_s5, %s2923_s5  ;;  %v798_v58 = vmul.f32 %v756_v23, %v756_v23 }
  0xf1   : > { %s4910_s12 = sld [smem:[#allocation39_spill]]  ;;  %v768_v59 = vmul.f32 %v767_v36, %v760_v28  ;;  %v771_v55 = vmul.f32 %v770_v44, %v764_v32  ;;  %v804_v0 = vmul.f32 %v764_v32, %v764_v32  ;;  %v836_v44 = vmul.f32 %v767_v36, %v758_v2 }
  0xf2   : > { %v772_v45 = vstv %s4907_s6  ;;  %s2932_s11 = sld [smem:[#allocation2 + %s4911_s1]] }
  0xf3   : > { %s2937_s28 = ssub.f32 %s2889_s21, %s2836_s30  ;;  %v773_v16 = vmul.f32 %v772_v45, %v762_v47  ;;  %v2948_v9 = vsub.f32 %v766_v57, %v768_v59  ;;  %v800_v57 = vmul.f32 %v758_v2, %v758_v2  ;;  %v801_v59 = vmul.f32 %v760_v28, %v760_v28 }
  0xf4   : > { %s2945_s3 = ssub.f32 %s2899_s29, %s2697_s0  ;;  %v2970_v32 = vadd.f32 %v804_v0, %v803_v22  ;;  %v926_v2 = vstv %s2542_s23  ;;  %v930_v0 = vstv %s2606_s27  ;;  %s4923_s27 = sadd.s32 57, %s2137_s26 }
  0xf5   : > { %v775_v60 = vstv %s4909_s16  ;;  %s2952_s6 = ssub.f32 %s2907_s10, %s2836_s30  ;;  %s1072_s9 = smul.f32 %s2937_s28, %s2937_s28  ;;  %v2956_v27 = vsub.f32 %v771_v55, %v773_v16  ;;  %v2972_v55 = vadd.f32 %v798_v58, %v797_v1  ;;  %v2980_v51 = vadd.f32 %v801_v59, %v800_v57 }
  0xf6   : > { %v776_v7 = vmul.f32 %v775_v60, %v754_v29  ;;  %s2962_s16 = ssub.f32 %s2899_s29, %s2846_s19  ;;  %4912 = vst [vmem:[#allocation73_spill] sm:$0xff] %v2970_v32  ;;  %v807_v16 = vmul.f32 %v775_v60, %v756_v23  ;;  %v2997_v22 = vmul.f32 %v2948_v9, %v2948_v9  ;;  %v3017_v24 = vsub.f32 %v2496_v4, %v926_v2  ;;  %s4921_s23 = smul.f32 %s2945_s3, %s2945_s3 }
  0xf7   : > { %v777_v10 = vstv %s4910_s12  ;;  %s1064_s12 = smul.f32 %s2945_s3, %s2937_s28  ;;  %s2968_s25 = sadd.f32 %s1072_s9, %s1071_s17  ;;  %4913 = vst [vmem:[#allocation74_spill] sm:$0xff] %v2972_v55  ;;  %4914 = vst [vmem:[#allocation75_spill] sm:$0xff] %v2980_v51  ;;  %v2988_v60 = vmul.f32 %v2956_v27, %v2956_v27  ;;  %v932_v1 = vstv %s2629_s20  ;;  %v934_v58 = vstv %s2643_s24 }
  0xf8   : > { %v778_v50 = vmul.f32 %v777_v10, %v756_v23  ;;  %v806_v41 = vmul.f32 %v777_v10, %v754_v29  ;;  %s1065_s1 = smul.f32 %s2952_s6, %s2923_s5  ;;  %s2978_s4 = ssub.f32 %s2907_s10, %s2889_s21  ;;  %4917 = vst [vmem:[#allocation78_spill] sm:$0xff] %v2997_v22  ;;  %v4709_v57 = vstv %s2826_s18  ;;  %v938_v2 = vstv %s2756_s15 }
  0xf9   : > { %4916 = vst [vmem:[#allocation77_spill] sm:$0xff] %v2988_v60  ;;  %p4708_p1 = scmp.le.f32.partialorder %s2968_s25, 1e-08  ;;  %s1075_s9 = smul.f32 %s2952_s6, %s2952_s6 }
  0xfa   : > { %v2964_v47 = vsub.f32 %v776_v7, %v778_v50  ;;  %v822_v7 = vmul.f32 %v772_v45, %v756_v23  ;;  %s2990_s17 = ssub.f32 %s1064_s12, %s1065_s1  ;;  %v2993_v29 = vadd.f32 %v807_v16, %v806_v41  ;;  %v837_v50 = vmul.f32 %v765_v33, %v760_v28  ;;  %v1907_v33 = vpop.eup %1906  ;;  %s1077_s1 = smul.f32 %s2962_s16, %s2962_s16 }
  0xfb   : > { %s3003_s5 = sld [smem:[#allocation2 + %s4918_s14]]  ;;  %v924_v41 = vstv %s2460_s8  ;;  %v928_v28 = vstv %s2592_s22  ;;  %1767 = vpush %v1907_v33  ;;  %s1078_s14 = smul.f32 %s2978_s4, %s2978_s4  ;;  %v931_v16 = vsub.f32 %v2496_v4, %v930_v0  ;;  %v941_v33 = vstv %s2707_s13 }
  0xfc   : > { %v2984_v10 = vmul.f32 %v2964_v47, %v2964_v47  ;;  %v3005_v23 = vadd.f32 %v822_v7, %v821_v19  ;;  %s1067_s12 = sadd.f32 1e-08, %s2990_s17  ;;  %v3013_v36 = vadd.f32 %v837_v50, %v836_v44  ;;  %v925_v45 = vsub.f32 %v2544_v20, %v924_v41  ;;  %s4927_s13 = sadd.s32 60, %s2137_s26 }
  0xfd   : > { %v3020_v19 = vsub.f32 %v2544_v20, %v928_v28  ;;  %s1083_s8 = scalar_select %p4708_p1, 1.0, %s2968_s25  ;;  %v933_v7 = vsub.f32 %v2544_v20, %v932_v1  ;;  %v935_v44 = vsub.f32 %v2496_v4, %v934_v58  ;;  %v939_v28 = vmul.f32 %v938_v2, %v931_v16  ;;  %v1909_v1 = vpop.eup %1908 }
  0xfe   : > { %4915 = vst [vmem:[#allocation76_spill] sm:$0xff] %v2984_v10  ;;  %4919 = vst [vmem:[#allocation79_spill] sm:$0xff] %v3005_v23  ;;  %v1068_v59 = vstv %s1067_s12  ;;  %s3032_s22 = sadd.f32 %s1075_s9, %s4921_s23  ;;  %v943_v0 = vstv %s2721_s7  ;;  %v968_v60 = vmul.f32 %v925_v45, %v925_v45 }
  0xff   : > { %4920 = vst [vmem:[#allocation80_spill] sm:$0xff] %v3013_v36  ;;  %1910 = vrcp.f32 %v1068_v59  ;;  %v1084_v50 = vstv %s1083_s8  ;;  %s3041_s20 = sld [smem:[#allocation2 + %s4923_s27]]  ;;  %v937_v41 = vmul.f32 %v4709_v57, %v3020_v19  ;;  %s4926_s8 = sadd.s32 58, %s2137_s26  ;;  %v942_v58 = vmul.f32 %v941_v33, %v935_v44  ;;  %1769 = vpush %v1909_v1 }
 0x100   : > { %4922 = sst [smem:[#allocation21_spill]] %s3032_s22  ;;  %1912 = vrcp.f32 %v1084_v50  ;;  %p4743_p1 = scmp.le.f32.partialorder %s3032_s22, 1e-08  ;;  %v944_v59 = vmul.f32 %v943_v0, %v933_v7  ;;  %v946_v57 = vstv %s2686_s2  ;;  %v974_v55 = vmul.f32 %v933_v7, %v933_v7 }
 0x101   : > { %s4924_s24 = sld [smem:[#allocation22_spill]]  ;;  %v3063_v50 = vsub.f32 %v937_v41, %v939_v28  ;;  %v947_v32 = vmul.f32 %v946_v57, %v925_v45  ;;  %v975_v1 = vmul.f32 %v935_v44, %v935_v44  ;;  %v969_v41 = vmul.f32 %v3017_v24, %v3017_v24  ;;  %s4928_s2 = sadd.s32 61, %s2137_s26 }
 0x102   : > { %s3049_s12 = sadd.f32 %s1078_s14, %s1077_s1  ;;  %v3071_v51 = vsub.f32 %v942_v58, %v944_v59  ;;  %v971_v58 = vmul.f32 %v3020_v19, %v3020_v19  ;;  %v972_v59 = vmul.f32 %v931_v16, %v931_v16 }
 0x103   : > { %s3055_s23 = sld [smem:[#allocation2 + %s4926_s8]]  ;;  %v3087_v44 = vadd.f32 %v975_v1, %v974_v55  ;;  %v3089_v23 = vadd.f32 %v969_v41, %v968_v60  ;;  %v992_v55 = vmul.f32 %v941_v33, %v925_v45  ;;  %v1007_v1 = vmul.f32 %v938_v2, %v3020_v19 }
 0x104   : > { %4925 = sst [smem:[#allocation23_spill]] %s3049_s12  ;;  %p4715_p13 = scmp.le.f32.partialorder %s3049_s12, 1e-08  ;;  %v4936_v33 = vstv %s2826_s18  ;;  %v1095_v2 = vstv %s2697_s0 }
 0x105   : > { %s1087_s15 = scalar_select %p4743_p1, 1.0, %s3032_s22  ;;  %4929 = vst [vmem:[#allocation81_spill] sm:$0xff] %v3087_v44  ;;  %4930 = vst [vmem:[#allocation82_spill] sm:$0xff] %v3089_v23  ;;  %v1008_v41 = vmul.f32 %v4936_v33, %v931_v16  ;;  %v1099_v16 = vstv %s2846_s19 }
 0x106   : > { %s3069_s7 = sld [smem:[#allocation2 + %s4927_s13]] }
 0x107   : > { %v948_v22 = vstv %s4924_s24  ;;  %v1088_v28 = vstv %s1087_s15  ;;  %s3077_s1 = sld [smem:[#allocation2 + %s4928_s2]] }
 0x108   : > { %v949_v36 = vmul.f32 %v948_v22, %v3017_v24  ;;  %1914 = vrcp.f32 %v1088_v28  ;;  %s1091_s24 = scalar_select %p4715_p13, 1.0, %s3049_s12  ;;  %v977_v10 = vmul.f32 %v948_v22, %v925_v45  ;;  %v993_v22 = vmul.f32 %v943_v0, %v3017_v24 }
 0x109   : > { %s3093_s8 = ssub.f32 %s3041_s20, %s2932_s11  ;;  %v3143_v0 = vadd.f32 %v1008_v41, %v1007_v1  ;;  %v1105_v1 = vstv %s2907_s10 }
 0x10a   : > { %v3080_v7 = vsub.f32 %v947_v32, %v949_v36  ;;  %v3096_v32 = vadd.f32 %v972_v59, %v971_v58  ;;  %v978_v36 = vmul.f32 %v946_v57, %v3017_v24  ;;  %v1092_v60 = vstv %s1091_s24  ;;  %s3105_s13 = ssub.f32 %s3055_s23, %s3003_s5  ;;  %s4934_s24 = sadd.s32 63, %s2137_s26 }
 0x10b   : > { %v3111_v57 = vmul.f32 %v3071_v51, %v3071_v51  ;;  %1916 = vrcp.f32 %v1092_v60  ;;  %s1242_s15 = smul.f32 %s3093_s8, %s3093_s8  ;;  %s3118_s14 = sld [smem:[#allocation2 + %s4934_s24]]  ;;  %v3126_v24 = vmul.f32 %v3063_v50, %v3063_v50  ;;  %v3134_v19 = vadd.f32 %v993_v22, %v992_v55  ;;  %4939 = vst [vmem:[#allocation89_spill] sm:$0xff] %v3143_v0 }
 0x10c   : > { %4931 = vst [vmem:[#allocation83_spill] sm:$0xff] %v3096_v32  ;;  %v3101_v28 = vmul.f32 %v3080_v7, %v3080_v7  ;;  %v3120_v45 = vadd.f32 %v978_v36, %v977_v10  ;;  %s3130_s2 = ssub.f32 %s3069_s7, %s2932_s11  ;;  %s1243_s27 = smul.f32 %s3105_s13, %s3105_s13  ;;  %v1097_v10 = vstv %s2836_s30  ;;  %v3146_v58 = vsub.f32 %v2544_v20, %v1095_v2  ;;  %v1911_v33 = vpop.eup %1910 }
 0x10d   : > { %4933 = vst [vmem:[#allocation85_spill] sm:$0xff] %v3111_v57  ;;  %4937 = vst [vmem:[#allocation87_spill] sm:$0xff] %v3126_v24  ;;  %s3141_s18 = ssub.f32 %s3077_s1, %s3003_s5  ;;  %s1732_s24 = spop %1731  ;;  %v3149_v59 = vsub.f32 %v2496_v4, %v1097_v10  ;;  %v3152_v36 = vsub.f32 %v2544_v20, %v1099_v16  ;;  %v1101_v60 = vstv %s2889_s21  ;;  %v1103_v22 = vstv %s2899_s29  ;;  %v1913_v44 = vpop.eup %1912 }
 0x10e   : > { %4932 = vst [vmem:[#allocation84_spill] sm:$0xff] %v3101_v28  ;;  %4935 = vst [vmem:[#allocation86_spill] sm:$0xff] %v3120_v45  ;;  %s1235_s0 = smul.f32 %s3130_s2, %s3105_s13  ;;  %s3156_s30 = sadd.f32 %s1243_s27, %s1242_s15  ;;  %v267_v55 = vstv %s1732_s24  ;;  %v3177_v16 = vsub.f32 %v2496_v4, %v1101_v60 }
 0x10f   : > { %4938 = vst [vmem:[#allocation88_spill] sm:$0xff] %v3134_v19  ;;  %s1236_s19 = smul.f32 %s3141_s18, %s3093_s8  ;;  %s3165_s9 = ssub.f32 %s3069_s7, %s3041_s20  ;;  %v3168_v41 = vmul.f32 %v267_v55, %v2609_v34  ;;  %v3171_v2 = vmul.f32 %v267_v55, %v2611_v38  ;;  %v3174_v10 = vmul.f32 %v267_v55, %v2618_v39  ;;  %1771 = vpush %v1911_v33  ;;  %v4716_v39 = vstv %s2978_s4 }
 0x110   : > { %4940 = sst [smem:[#allocation25_spill]] %s3156_s30  ;;  %p4724_p13 = scmp.le.f32.partialorder %s3156_s30, 1e-08  ;;  %v1104_v34 = vsub.f32 %v2544_v20, %v1103_v22  ;;  %v1106_v38 = vsub.f32 %v2496_v4, %v1105_v1  ;;  %v4718_v55 = vstv %s2962_s16  ;;  %1773 = vpush %v1913_v44  ;;  %v1108_v60 = vmul.f32 %v4716_v39, %v3152_v36 }
 0x111   : > { %s1245_s29 = smul.f32 %s3130_s2, %s3130_s2  ;;  %s3186_s21 = ssub.f32 %s1235_s0, %s1236_s19  ;;  %vm271_vm0 = vcmp.gt.f32.partialorder %v3168_v41, 0.0  ;;  %vm272_vm1 = vcmp.gt.f32.partialorder %v3171_v2, 0.0  ;;  %vm274_vm2 = vcmp.gt.f32.partialorder %v3174_v10, 0.0  ;;  %v1110_v44 = vmul.f32 %v4718_v55, %v3177_v16 }
 0x112   : > { %s1246_s10 = smul.f32 %s3141_s18, %s3141_s18  ;;  %s4942_s27 = sld [smem:[#allocation30_spill]]  ;;  %vm273_vm3 = vmand %vm271_vm0, %vm272_vm1  ;;  %v4721_v22 = vstv %s2945_s3  ;;  %v4722_v1 = vstv %s2952_s6  ;;  %v4723_v33 = vstv %s2937_s28  ;;  %v1145_v28 = vmul.f32 %v1104_v34, %v1104_v34 }
 0x113   : > { %4941 = sst [smem:[#allocation32_spill]] %s3186_s21  ;;  %vm3208_vm4 = vmand %vm273_vm3, %vm274_vm2  ;;  %v1113_v39 = vmul.f32 %v4721_v22, %v1106_v38  ;;  %v1115_v0 = vmul.f32 %v4722_v1, %v1104_v34  ;;  %v1118_v23 = vmul.f32 %v4723_v33, %v3146_v58  ;;  %v3222_v19 = vsub.f32 %v1108_v60, %v1110_v44 }
 0x114   : > { %s1254_s15 = scalar_select %p4724_p13, 1.0, %s3156_s30  ;;  %v1146_v44 = vmul.f32 %v1106_v38, %v1106_v38  ;;  %vm346_vm0 = vcmp.eq.s32.totalorder %v2407_v25, 1 }
 0x115   : > { %s1238_s24 = sadd.f32 1e-08, %s3186_s21  ;;  %s1734_s30 = spop %1733  ;;  %v1915_v45 = vpop.eup %1914  ;;  %v3229_v33 = vsub.f32 %v1113_v39, %v1115_v0 }
 0x116   : > { %v1255_v57 = vstv %s1254_s15  ;;  %s3220_s19 = sadd.f32 %s1246_s10, %s1245_s29  ;;  %v296_v1 = vstv %s1734_s30  ;;  %1775 = vpush %v1915_v45  ;;  %s4947_s29 = sadd.s32 64, %s2137_s26 }
 0x117   : > { %v1239_v22 = vstv %s1238_s24  ;;  %1918 = vrcp.f32 %v1255_v57  ;;  %s3227_s0 = ssub.f32 %s3077_s1, %s3055_s23  ;;  %4946 = vst [vmem:[#allocation90_spill] sm:$0xff] %v3229_v33  ;;  %v297_v34 = vmul.f32 %v296_v1, %v2633_v5  ;;  %v299_v57 = vmul.f32 %v2648_v14, %v296_v1  ;;  %s4948_s15 = sadd.s32 66, %s2137_s26 }
 0x118   : > { %v1119_v55 = vstv %s4942_s27  ;;  %4945 = sst [smem:[#allocation35_spill]] %s3220_s19  ;;  %s1736_s27 = spop %1735  ;;  %1920 = vrcp.f32 %v1239_v22  ;;  %v1917_v22 = vpop.eup %1916  ;;  %v1139_v5 = vmul.f32 %v3146_v58, %v3146_v58  ;;  %v1140_v14 = vmul.f32 %v3149_v59, %v3149_v59 }
 0x119   : > { %v1120_v32 = vmul.f32 %v1119_v55, %v3149_v59  ;;  %p4728_p13 = scmp.le.f32.partialorder %s3220_s19, 1e-08  ;;  %s3234_s10 = sld [smem:[#allocation2 + %s4947_s29]]  ;;  %v311_v60 = vstv %s1736_s27  ;;  %vm300_vm5 = vcmp.le.f32.partialorder %v297_v34, 0.0  ;;  %vm301_vm6 = vcmp.ge.f32.partialorder %v297_v34, 1.0  ;;  %1777 = vpush %v1917_v22 }
 0x11a   : > { %s1249_s30 = smul.f32 %s3227_s0, %s3227_s0  ;;  %s3242_s24 = sld [smem:[#allocation2 + %s4948_s15]]  ;;  %v312_v0 = vmul.f32 %v311_v60, %v2650_v15  ;;  %v314_v45 = vmul.f32 %v2637_v12, %v311_v60  ;;  %v302_v12 = vsel %vm301_vm6, %v2631_v40, %v299_v57  ;;  %v3261_v15 = vadd.f32 %v1146_v44, %v1145_v28 }
 0x11b   : > { %v3246_v39 = vsub.f32 %v1118_v23, %v1120_v32  ;;  %s1258_s29 = scalar_select %p4728_p13, 1.0, %s3220_s19  ;;  %v3268_v32 = vsel %vm300_vm5, %v2622_v62, %v302_v12  ;;  %v3287_v60 = vadd.f32 %v1140_v14, %v1139_v5  ;;  %v4960_v5 = vstv %s2945_s3 }
 0x11c   : > { %s4950_s27 = smul.f32 %s3165_s9, %s3165_s9  ;;  %vm315_vm7 = vcmp.le.f32.partialorder %v312_v0, 0.0  ;;  %vm316_vm8 = vcmp.ge.f32.partialorder %v312_v0, 1.0  ;;  %s1738_s19 = spop %1737  ;;  %4952 = vst [vmem:[#allocation92_spill] sm:$0xff] %v3261_v15  ;;  %v1142_v0 = vmul.f32 %v3152_v36, %v3152_v36  ;;  %v1163_v14 = vmul.f32 %v4960_v5, %v3146_v58 }
 0x11d   : > { %4949 = vst [vmem:[#allocation91_spill] sm:$0xff] %v3246_v39  ;;  %v1259_v23 = vstv %s1258_s29  ;;  %s4953_s21 = sadd.s32 67, %s2137_s26  ;;  %v317_v38 = vsel %vm316_vm8, %v2620_v61, %v314_v45  ;;  %v326_v1 = vstv %s1738_s19  ;;  %4956 = vst [vmem:[#allocation93_spill] sm:$0xff] %v3287_v60  ;;  %v1148_v45 = vmul.f32 %v1119_v55, %v3146_v58  ;;  %s1740_s29 = spop %1739 }
 0x11e   : > { %s3258_s15 = sadd.f32 %s1249_s30, %s4950_s27  ;;  %1922 = vrcp.f32 %v1259_v23  ;;  %s4954_s27 = sadd.s32 69, %s2137_s26  ;;  %v3278_v28 = vsel %vm315_vm7, %v2622_v62, %v317_v38  ;;  %v327_v34 = vmul.f32 %v326_v1, %v2659_v21  ;;  %v329_v57 = vmul.f32 %v2654_v35, %v326_v1 }
 0x11f   : > { %s3265_s12 = sld [smem:[#allocation2 + %s4953_s21]]  ;;  %s4955_s21 = sadd.s32 70, %s2137_s26  ;;  %v1143_v62 = vmul.f32 %v3177_v16, %v3177_v16  ;;  %v4957_v35 = vstv %s2937_s28  ;;  %v3302_v44 = vmul.f32 %v3246_v39, %v3246_v39  ;;  %v4961_v12 = vstv %s2952_s6 }
 0x120   : > { %4951 = sst [smem:[#allocation37_spill]] %s3258_s15  ;;  %p4731_p13 = scmp.le.f32.partialorder %s3258_s15, 1e-08  ;;  %vm330_vm9 = vcmp.le.f32.partialorder %v327_v34, 0.0  ;;  %vm331_vm10 = vcmp.ge.f32.partialorder %v327_v34, 1.0  ;;  %v1149_v21 = vmul.f32 %v4957_v35, %v3149_v59  ;;  %v1164_v23 = vmul.f32 %v4961_v12, %v3149_v59 }
 0x121   : > { %s3275_s22 = sld [smem:[#allocation2 + %s4954_s27]]  ;;  %4958 = vst [vmem:[#allocation94_spill] sm:$0xff] %v3302_v44  ;;  %v332_v22 = vsel %vm331_vm10, %v2620_v61, %v329_v57  ;;  %v3310_v55 = vadd.f32 %v1143_v62, %v1142_v0  ;;  %s4962_s28 = sadd.s32 2, %s2137_s26  ;;  %v3329_v58 = vmul.f32 %v3229_v33, %v3229_v33  ;;  %v438_v59 = vstv %s1740_s29 }
 0x122   : > { %s3284_s19 = sld [smem:[#allocation2 + %s4955_s21]]  ;;  %v3323_v1 = vsel %vm330_vm9, %v2631_v40, %v332_v22  ;;  %v3325_v34 = vadd.f32 %v1149_v21, %v1148_v45  ;;  %v3337_v57 = vadd.f32 %v1164_v23, %v1163_v14  ;;  %v4967_v0 = vstv %s2962_s16 }
 0x123   : > { %s1262_s27 = scalar_select %p4731_p13, 1.0, %s3258_s15  ;;  %4959 = vst [vmem:[#allocation95_spill] sm:$0xff] %v3310_v55  ;;  %4965 = vst [vmem:[#allocation97_spill] sm:$0xff] %v3329_v58  ;;  %v1178_v62 = vmul.f32 %v4967_v0, %v3152_v36  ;;  %v3347_v45 = vmul.f32 %v438_v59, %v2699_v42  ;;  %v3350_v35 = vmul.f32 %v438_v59, %v2711_v18  ;;  %v4968_v22 = vstv %s2978_s4 }
 0x124   : > { %s3306_s21 = ssub.f32 %s3242_s24, %s3118_s14  ;;  %4964 = vst [vmem:[#allocation96_spill] sm:$0xff] %v3325_v34  ;;  %4966 = vst [vmem:[#allocation98_spill] sm:$0xff] %v3337_v57  ;;  %v3353_v21 = vmul.f32 %v438_v59, %v2701_v43  ;;  %v1179_v5 = vmul.f32 %v4968_v22, %v3177_v16  ;;  %v1919_v36 = vpop.eup %1918  ;;  %v3367_v42 = vmul.f32 %v3222_v19, %v3222_v19  ;;  %v1266_v18 = vstv %s2932_s11 }
 0x125   : > { %v1263_v38 = vstv %s1262_s27  ;;  %s4963_s30 = sld [smem:[#allocation50_spill]]  ;;  %v1268_v14 = vstv %s3003_s5  ;;  %v1270_v43 = vstv %s3041_s20  ;;  %v1921_v12 = vpop.eup %1920  ;;  %vm442_vm11 = vcmp.gt.f32.partialorder %v3347_v45, 0.0 }
 0x126   : > { %s3320_s15 = sld [smem:[#allocation2 + %s4962_s28]]  ;;  %1924 = vrcp.f32 %v1263_v38  ;;  %s1413_s6 = smul.f32 %s3306_s21, %s3306_s21  ;;  %4969 = vst [vmem:[#allocation99_spill] sm:$0xff] %v3367_v42  ;;  %vm443_vm12 = vcmp.gt.f32.partialorder %v3350_v35, 0.0  ;;  %vm445_vm13 = vcmp.gt.f32.partialorder %v3353_v21, 0.0  ;;  %v3381_v16 = vadd.f32 %v1179_v5, %v1178_v62  ;;  %1779 = vpush %v1921_v12 }
 0x127   : > { %s3333_s3 = ssub.f32 %s3265_s12, %s3234_s10  ;;  %vm444_vm14 = vmand %vm442_vm11, %vm443_vm12  ;;  %v3388_v23 = vsub.f32 %v2544_v20, %v1266_v18  ;;  %v3391_v38 = vsub.f32 %v2496_v4, %v1268_v14  ;;  %v3394_v59 = vsub.f32 %v2544_v20, %v1270_v43  ;;  %v1272_v0 = vstv %s3055_s23  ;;  %1781 = vpush %v1919_v36 }
 0x128   : > { %s3344_s27 = ssub.f32 %s3275_s22, %s3118_s14  ;;  %4970 = vst [vmem:[#allocation100_spill] sm:$0xff] %v3381_v16  ;;  %vm3404_vm15 = vmand %vm444_vm14, %vm445_vm13  ;;  %v3409_v5 = vsub.f32 %v2496_v4, %v1272_v0  ;;  %v1274_v18 = vstv %s3069_s7  ;;  %v1276_v14 = vstv %s3077_s1  ;;  %v4738_v15 = vstv %s3227_s0  ;;  %s4973_s7 = sadd.s32 5, %s2137_s26 }
 0x129   : > { %s3361_s16 = ssub.f32 %s3284_s19, %s3234_s10  ;;  %s1414_s28 = smul.f32 %s3333_s3, %s3333_s3  ;;  %v1275_v43 = vsub.f32 %v2544_v20, %v1274_v18  ;;  %v1277_v12 = vsub.f32 %v2496_v4, %v1276_v14  ;;  %v1279_v0 = vmul.f32 %v4738_v15, %v3394_v59  ;;  %v4740_v42 = vstv %s3165_s9 }
 0x12a   : > { %s1406_s29 = smul.f32 %s3344_s27, %s3333_s3  ;;  %s3376_s4 = ssub.f32 %s3275_s22, %s3242_s24  ;;  %v1283_v16 = vstv %s3130_s2  ;;  %v1281_v14 = vmul.f32 %v4740_v42, %v3409_v5  ;;  %v1288_v60 = vstv %s3105_s13  ;;  %v1290_v58 = vstv %s3093_s8 }
 0x12b   : > { %s1407_s5 = smul.f32 %s3361_s16, %s3306_s21  ;;  %s3385_s11 = sadd.f32 %s1414_s28, %s1413_s6  ;;  %v1923_v18 = vpop.eup %1922  ;;  %v1284_v4 = vmul.f32 %v1283_v16, %v1277_v12  ;;  %v1289_v15 = vmul.f32 %v1288_v60, %v3388_v23  ;;  %v1316_v57 = vmul.f32 %v1275_v43, %v1275_v43  ;;  %v1317_v55 = vmul.f32 %v1277_v12, %v1277_v12 }
 0x12c   : > { %s1416_s20 = smul.f32 %s3344_s27, %s3344_s27  ;;  %s3401_s6 = ssub.f32 %s3284_s19, %s3265_s12  ;;  %v276_v62 = vstv %s3320_s15  ;;  %1783 = vpush %v1923_v18  ;;  %v3451_v42 = vsub.f32 %v1279_v0, %v1281_v14  ;;  %v1291_v18 = vmul.f32 %v1290_v58, %v3391_v38  ;;  %v1313_v12 = vmul.f32 %v3394_v59, %v3394_v59 }
 0x12d   : > { %s3413_s23 = ssub.f32 %s1406_s29, %s1407_s5  ;;  %p4742_p13 = scmp.le.f32.partialorder %s3385_s11, 1e-08  ;;  %v277_v36 = vmul.f32 %v276_v62, %v3168_v41  ;;  %v1285_v62 = vstv %s3141_s18  ;;  %v1320_v0 = vmul.f32 %v1288_v60, %v3391_v38  ;;  %v1334_v33 = vmul.f32 %v1283_v16, %v3388_v23 }
 0x12e   : > { %s1417_s15 = smul.f32 %s3361_s16, %s3361_s16  ;;  %s3424_s1 = sld [smem:[#allocation2 + %s4973_s7]]  ;;  %v1286_v20 = vmul.f32 %v1285_v62, %v1275_v43  ;;  %v3466_v43 = vadd.f32 %v1317_v55, %v1316_v57 }
 0x12f   : > { %s1409_s29 = sadd.f32 1e-08, %s3413_s23  ;;  %s1419_s28 = smul.f32 %s3376_s4, %s3376_s4 }
 0x130   : > { %s1425_s5 = scalar_select %p4742_p13, 1.0, %s3385_s11  ;;  %v3453_v34 = vsub.f32 %v1284_v4, %v1286_v20  ;;  %4978 = vst [vmem:[#allocation101_spill] sm:$0xff] %v3466_v43  ;;  %v1310_v4 = vmul.f32 %v3388_v23, %v3388_v23  ;;  %v3473_v20 = vsub.f32 %v1289_v15, %v1291_v18  ;;  %v1319_v15 = vmul.f32 %v1290_v58, %v3388_v23 }
 0x131   : > { %v1410_v44 = vstv %s1409_s29  ;;  %s3447_s2 = sadd.f32 %s1417_s15, %s1416_s20  ;;  %s1420_s18 = smul.f32 %s3401_s6, %s3401_s6 }
 0x132   : > { %1926 = vrcp.f32 %v1410_v44  ;;  %v1426_v39 = vstv %s1425_s5  ;;  %s4975_s8 = sadd.s32 8, %s2137_s26  ;;  %s4976_s29 = sand.u32 2147483647, %s4963_s30  ;;  %v1311_v44 = vmul.f32 %v3391_v38, %v3391_v38  ;;  %v3495_v43 = vmul.f32 %v3473_v20, %v3473_v20 }
 0x133   : > { %s3458_s7 = sld [smem:[#allocation2 + %s4975_s8]]  ;;  %p3462_p13 = scmp.gt.f32.partialorder %s4976_s29, 1e-08  ;;  %1928 = vrcp.f32 %v1426_v39  ;;  %v1925_v55 = vpop.eup %1924  ;;  %v1314_v39 = vmul.f32 %v3409_v5, %v3409_v5  ;;  %v3516_v16 = vmul.f32 %v3453_v34, %v3453_v34 }
 0x134   : > { %p1423_p1 = scmp.le.f32.partialorder %s3447_s2, 1e-08  ;;  %s3471_s15 = sadd.f32 %s1420_s18, %s1419_s28  ;;  %v278_v57 = vstv %s3424_s1  ;;  %1785 = vpush %v1925_v55  ;;  %v3491_v18 = vadd.f32 %v1311_v44, %v1310_v4  ;;  %v3505_v55 = vadd.f32 %v1320_v0, %v1319_v15  ;;  %v1335_v4 = vmul.f32 %v1285_v62, %v3391_v38 }
 0x135   : > { %s304_s30 = scalar_select %p225_p0, 1, 0  ;;  %v279_v14 = vmul.f32 %v278_v57, %v3171_v2  ;;  %v3503_v60 = vadd.f32 %v1314_v39, %v1313_v12  ;;  %v4985_v39 = vstv %s3165_s9  ;;  %v4986_v0 = vstv %s3227_s0 }
 0x136   : > { %s1429_s5 = scalar_select %p1423_p1, 1.0, %s3447_s2  ;;  %4980 = vst [vmem:[#allocation102_spill] sm:$0xff] %v3491_v18  ;;  %v1349_v15 = vmul.f32 %v4985_v39, %v3394_v59 }
 0x137   : > { %p1424_p0 = scmp.le.f32.partialorder %s3471_s15, 1e-08  ;;  %v305_v58 = vstv %s304_s30  ;;  %s4981_s1 = sadd.s32 11, %s2137_s26  ;;  %v280_v57 = vadd.f32 %v279_v14, %v277_v36  ;;  %v3526_v36 = vadd.f32 %v1335_v4, %v1334_v33  ;;  %v1350_v14 = vmul.f32 %v4986_v0, %v3409_v5 }
 0x138   : > { %s3501_s18 = sld [smem:[#allocation2 + %s4981_s1]]  ;;  %v1430_v44 = vstv %s1429_s5  ;;  %vm3508_vm1 = vcmp.eq.s32.totalorder %v305_v58, 1  ;;  %s1742_s5 = spop %1741 }
 0x139   : > { %s319_s8 = scalar_select %p226_p2, 1, 0  ;;  %1930 = vrcp.f32 %v1430_v44  ;;  %v281_v23 = vstv %s3458_s7  ;;  %v307_v38 = vsel %vm3508_vm1, %v2631_v40, %v3268_v32  ;;  %v3543_v40 = vmul.f32 %v3451_v42, %v3451_v42 }
 0x13a   : > { %s1433_s29 = scalar_select %p1424_p0, 1.0, %s3471_s15  ;;  %v282_v62 = vmul.f32 %v281_v23, %v3174_v10  ;;  %v467_v44 = vstv %s1742_s5  ;;  %v3579_v39 = vadd.f32 %v1350_v14, %v1349_v15 }
 0x13b   : > { %v320_v12 = vstv %s319_s8  ;;  %s334_s30 = scalar_select %p227_p3, 1, 0 }
 0x13c   : > { %v1434_v58 = vstv %s1433_s29  ;;  %vm321_vm2 = vcmp.eq.s32.totalorder %v320_v12, 1  ;;  %s4987_s7 = sadd.s32 14, %s2137_s26  ;;  %v283_v32 = vadd.f32 %v282_v62, %v280_v57  ;;  %s4989_s9 = sadd.s32 17, %s2137_s26  ;;  %v468_v62 = vmul.f32 %v467_v44, %v2760_v37 }
 0x13d   : > { %s3539_s28 = sld [smem:[#allocation2 + %s4987_s7]]  ;;  %1932 = vrcp.f32 %v1434_v58  ;;  %v322_v59 = vsel %vm321_vm2, %v2620_v61, %v3278_v28  ;;  %v335_v18 = vstv %s334_s30  ;;  %s3552_s13 = spop %1743  ;;  %v470_v12 = vmul.f32 %v2734_v52, %v467_v44 }
 0x13e   : > { %s3550_s0 = sld [smem:[#allocation2 + %s4989_s9]]  ;;  %v338_v5 = vmin.f32 %v307_v38, %v322_v59  ;;  %vm336_vm3 = vcmp.eq.s32.totalorder %v335_v18, 1  ;;  %v447_v4 = vstv %s3501_s18  ;;  %vm342_vm5 = vcmp.ge.f32.partialorder %v283_v32, 0.0  ;;  %s531_s7 = sadd.s32 20, %s2137_s26 }
 0x13f   : > { %s515_s29 = scalar_select %p3462_p13, 1, 0  ;;  %vm348_vm6 = vcmp.lt.f32.partialorder %v283_v32, inf  ;;  %v337_v28 = vsel %vm336_vm3, %v2620_v61, %v3323_v1  ;;  %v448_v57 = vmul.f32 %v447_v4, %v3347_v45  ;;  %vm343_vm7 = vmand %vm3208_vm4, %vm342_vm5  ;;  %v1927_v61 = vpop.eup %1926  ;;  %v482_v1 = vstv %s3552_s13 }
 0x140   : > { %s475_s30 = scalar_select %p396_p5, 1, 0  ;;  %v3564_v23 = vmin.f32 %v338_v5, %v337_v28  ;;  %vm347_vm8 = vmand %vm343_vm7, %vm346_vm0  ;;  %v1929_v0 = vpop.eup %1928  ;;  %1787 = vpush %v1927_v61  ;;  %vm471_vm10 = vcmp.le.f32.partialorder %v468_v62, 0.0  ;;  %vm472_vm11 = vcmp.ge.f32.partialorder %v468_v62, 1.0  ;;  %v483_v61 = vmul.f32 %v482_v1, %v2771_v26 }
 0x141   : > { %v3566_v38 = vstv %s515_s29  ;;  %s3572_s18 = scalar_select %p397_p6, 1, 0  ;;  %vm3582_vm4 = vmand %vm347_vm8, %vm348_vm6  ;;  %1789 = vpush %v1929_v0  ;;  %v473_v4 = vsel %vm472_vm11, %v2758_v3, %v470_v12 }
 0x142   : > { %vm517_vm9 = vcmp.eq.s32.totalorder %v3566_v38, 1  ;;  %v476_v24 = vstv %s475_s30  ;;  %s3593_s5 = scalar_select %p398_p7, 1, 0  ;;  %v3597_v15 = vsel %vm3582_vm4, %v283_v32, inf  ;;  %v352_v14 = vsel %vm3582_vm4, %v3168_v41, -1.0 }
 0x143   : > { %v449_v37 = vstv %s3539_s28  ;;  %vm3587_vm12 = vcmp.eq.s32.totalorder %v476_v24, 1  ;;  %v353_v58 = vsel %vm3582_vm4, %v3171_v2, -1.0  ;;  %v354_v59 = vsel %vm3582_vm4, %v3174_v10, -1.0  ;;  %s3608_s28 = sld [smem:[#allocation2 + %s531_s7]]  ;;  %s537_s1 = sadd.s32 23, %s2137_s26 }
 0x144   : > { %v355_v32 = vsel %vm3582_vm4, %v3564_v23, -1.0  ;;  %s4996_s9 = sld [smem:[#allocation63_spill]]  ;;  %v450_v18 = vmul.f32 %v449_v37, %v3350_v35  ;;  %v452_v5 = vstv %s3550_s0  ;;  %s543_s8 = sadd.s32 26, %s2137_s26  ;;  %v474_v28 = vsel %vm471_vm10, %v2740_v53, %v473_v4 }
 0x145   : > { %s3617_s13 = sld [smem:[#allocation2 + %s537_s1]]  ;;  %v453_v44 = vmul.f32 %v452_v5, %v3353_v21  ;;  %v485_v24 = vmul.f32 %v2750_v56, %v482_v1  ;;  %s1746_s29 = spop %1745  ;;  %v478_v12 = vsel %vm3587_vm12, %v2758_v3, %v474_v28  ;;  %v491_v37 = vstv %s3572_s18 }
 0x146   : > { %s3625_s30 = sld [smem:[#allocation2 + %s543_s8]]  ;;  %v451_v0 = vadd.f32 %v450_v18, %v448_v57  ;;  %v497_v33 = vstv %s1746_s29  ;;  %v1931_v5 = vpop.eup %1930  ;;  %vm486_vm13 = vcmp.le.f32.partialorder %v483_v61, 0.0  ;;  %vm487_vm14 = vcmp.ge.f32.partialorder %v483_v61, 1.0  ;;  %s1748_s18 = spop %1747 }
 0x147   : > { %vm3632_vm0 = vcmp.eq.s32.totalorder %v491_v37, 1  ;;  %v498_v56 = vmul.f32 %v497_v33, %v2787_v17  ;;  %1791 = vpush %v1931_v5  ;;  %v488_v57 = vsel %vm487_vm14, %v2713_v46, %v485_v24  ;;  %v500_v1 = vmul.f32 %v2775_v13, %v497_v33  ;;  %s3688_s8 = scalar_select %p568_p10, 1, 0  ;;  %v5015_v17 = vld [vmem:[#allocation71_spill] sm:$0xff] }
 0x148   : > { %v454_v26 = vadd.f32 %v453_v44, %v451_v0  ;;  %v506_v25 = vstv %s3593_s5  ;;  %v489_v18 = vsel %vm486_vm13, %v2740_v53, %v488_v57  ;;  %v609_v28 = vstv %s1748_s18  ;;  %s702_s29 = sadd.s32 29, %s2137_s26  ;;  %s708_s20 = sadd.s32 32, %s2137_s26 }
 0x149   : > { %vm501_vm1 = vcmp.le.f32.partialorder %v498_v56, 0.0  ;;  %vm502_vm2 = vcmp.ge.f32.partialorder %v498_v56, 1.0  ;;  %vm3645_vm3 = vcmp.eq.s32.totalorder %v506_v25, 1  ;;  %v493_v13 = vsel %vm3632_vm0, %v2713_v46, %v489_v18  ;;  %s5009_s18 = sld [smem:[#allocation60_spill]]  ;;  %p5072_p13 = scmp.le.f32.partialorder %s2968_s25, 1e-08 }
 0x14a   : > { %s682_s0 = sand.u32 2147483647, %s4996_s9  ;;  %v1933_v4 = vpop.eup %1932  ;;  %vm513_vm5 = vcmp.ge.f32.partialorder %v454_v26, 0.0  ;;  %vm519_vm6 = vcmp.lt.f32.partialorder %v454_v26, %v3597_v15  ;;  %v503_v53 = vsel %vm502_vm2, %v2713_v46, %v500_v1  ;;  %v509_v33 = vmin.f32 %v478_v12, %v493_v13  ;;  %s3755_s5 = sld [smem:[#allocation2 + %s702_s29]]  ;;  %v5016_v13 = vld [vmem:[#allocation70_spill] sm:$0xff]  ;;  %v5028_v1 = vld [vmem:[#allocation76_spill] sm:$0xff] }
 0x14b   : > { %p3637_p2 = scmp.gt.f32.partialorder %s682_s0, 1e-08  ;;  %1793 = vpush %v1933_v4  ;;  %vm514_vm7 = vmand %vm3404_vm15, %vm513_vm5  ;;  %v504_v44 = vsel %vm501_vm1, %v2758_v3, %v503_v53  ;;  %v618_v61 = vstv %s3608_s28  ;;  %v3666_v0 = vmul.f32 %v609_v28, %v2829_v31  ;;  %v3669_v22 = vmul.f32 %v609_v28, %v2831_v48 }
 0x14c   : > { %vm518_vm8 = vmand %vm514_vm7, %vm517_vm9  ;;  %v508_v24 = vsel %vm3645_vm3, %v2713_v46, %v504_v44  ;;  %v3672_v12 = vmul.f32 %v609_v28, %v2820_v30  ;;  %s3676_s9 = scalar_select %p567_p9, 1, 0  ;;  %v620_v38 = vstv %s3617_s13  ;;  %v623_v31 = vstv %s3625_s30 }
 0x14d   : > { %s686_s7 = scalar_select %p3637_p2, 1, 0  ;;  %vm3680_vm15 = vmand %vm518_vm8, %vm519_vm6  ;;  %v510_v46 = vmin.f32 %v509_v33, %v508_v24  ;;  %vm613_vm9 = vcmp.gt.f32.partialorder %v3666_v0, 0.0  ;;  %vm614_vm10 = vcmp.gt.f32.partialorder %v3669_v22, 0.0  ;;  %v619_v10 = vmul.f32 %v618_v61, %v3666_v0 }
 0x14e   : > { %v3693_v30 = vsel %vm3680_vm15, %v454_v26, %v3597_v15  ;;  %v3702_v48 = vsel %vm3680_vm15, %v3347_v45, %v352_v14  ;;  %v3711_v5 = vsel %vm3680_vm15, %v3350_v35, %v353_v58  ;;  %v3720_v41 = vsel %vm3680_vm15, %v3353_v21, %v354_v59  ;;  %s1750_s13 = spop %1749  ;;  %vm615_vm12 = vmand %vm613_vm9, %vm614_vm10 }
 0x14f   : > { %v687_v37 = vstv %s686_s7  ;;  %v3729_v2 = vsel %vm3680_vm15, %v510_v46, %v355_v32  ;;  %vm616_vm11 = vcmp.gt.f32.partialorder %v3672_v12, 0.0  ;;  %s3736_s30 = scalar_select %p569_p11, 1, 0  ;;  %v621_v45 = vmul.f32 %v620_v38, %v3669_v22 }
 0x150   : > { %v624_v35 = vmul.f32 %v623_v31, %v3672_v12  ;;  %vm688_vm13 = vcmp.eq.s32.totalorder %v687_v37, 1  ;;  %s1752_s0 = spop %1751  ;;  %vm3742_vm14 = vmand %vm615_vm12, %vm616_vm11  ;;  %v638_v23 = vstv %s1750_s13  ;;  %v647_v15 = vstv %s3676_s9  ;;  %s714_s7 = sadd.s32 35, %s2137_s26 }
 0x151   : > { %v653_v14 = vstv %s1752_s0  ;;  %v662_v58 = vstv %s3688_s8  ;;  %v622_v59 = vadd.f32 %v621_v45, %v619_v10  ;;  %v639_v32 = vmul.f32 %v638_v23, %v2879_v8  ;;  %s1754_s1 = spop %1753  ;;  %s3763_s9 = sld [smem:[#allocation2 + %s708_s20]] }
 0x152   : > { %v641_v62 = vmul.f32 %v2855_v54, %v638_v23  ;;  %vm3751_vm0 = vcmp.eq.s32.totalorder %v647_v15, 1  ;;  %v654_v26 = vmul.f32 %v653_v14, %v2892_v49  ;;  %v656_v57 = vmul.f32 %v2867_v11, %v653_v14  ;;  %s853_s28 = sand.u32 2147483647, %s5009_s18  ;;  %s3767_s8 = sld [smem:[#allocation2 + %s714_s7]]  ;;  %v5014_v11 = vld [vmem:[#allocation72_spill] sm:$0xff] }
 0x153   : > { %vm3759_vm1 = vcmp.eq.s32.totalorder %v662_v58, 1  ;;  %v668_v25 = vstv %s1754_s1  ;;  %v625_v54 = vadd.f32 %v624_v35, %v622_v59  ;;  %vm642_vm2 = vcmp.le.f32.partialorder %v639_v32, 0.0  ;;  %s1756_s13 = spop %1755  ;;  %p3774_p3 = scmp.gt.f32.partialorder %s853_s28, 1e-08 }
 0x154   : > { %vm643_vm3 = vcmp.ge.f32.partialorder %v639_v32, 1.0  ;;  %v669_v8 = vmul.f32 %v668_v25, %v2901_v6  ;;  %vm657_vm5 = vcmp.le.f32.partialorder %v654_v26, 0.0  ;;  %vm658_vm6 = vcmp.ge.f32.partialorder %v654_v26, 1.0  ;;  %s3800_s20 = scalar_select %p738_p12, 1, 0 }
 0x155   : > { %v644_v18 = vsel %vm643_vm3, %v2877_v63, %v641_v62  ;;  %v671_v49 = vmul.f32 %v5014_v11, %v668_v25  ;;  %vm684_vm7 = vcmp.ge.f32.partialorder %v625_v54, 0.0  ;;  %vm690_vm8 = vcmp.lt.f32.partialorder %v625_v54, %v3693_v30  ;;  %s857_s18 = scalar_select %p3774_p3, 1, 0 }
 0x156   : > { %v645_v4 = vsel %vm642_vm2, %v5015_v17, %v644_v18  ;;  %v659_v53 = vsel %vm658_vm6, %v5016_v13, %v656_v57  ;;  %vm685_vm9 = vmand %vm3742_vm14, %vm684_vm7  ;;  %vm672_vm10 = vcmp.le.f32.partialorder %v669_v8, 0.0  ;;  %vm673_vm11 = vcmp.ge.f32.partialorder %v669_v8, 1.0  ;;  %s5022_s7 = sld [smem:[#allocation57_spill]]  ;;  %s1758_s1 = spop %1757 }
 0x157   : > { %v649_v6 = vsel %vm3751_vm0, %v2877_v63, %v645_v4  ;;  %v660_v33 = vsel %vm657_vm5, %v5015_v17, %v659_v53  ;;  %vm689_vm12 = vmand %vm685_vm9, %vm688_vm13  ;;  %v674_v28 = vsel %vm673_vm11, %v5016_v13, %v671_v49  ;;  %v677_v61 = vstv %s3736_s30  ;;  %s5021_s30 = sld [smem:[#allocation58_spill]]  ;;  %s873_s28 = sadd.s32 38, %s2137_s26  ;;  %v5031_v17 = vld [vmem:[#allocation79_spill] sm:$0xff] }
 0x158   : > { %v664_v44 = vsel %vm3759_vm1, %v5016_v13, %v660_v33  ;;  %v780_v24 = vstv %s1756_s13  ;;  %vm3790_vm14 = vmand %vm689_vm12, %vm690_vm8  ;;  %v675_v31 = vsel %vm672_vm10, %v2877_v63, %v674_v28  ;;  %vm678_vm0 = vcmp.eq.s32.totalorder %v677_v61, 1  ;;  %s1760_s29 = spop %1759  ;;  %s879_s0 = sadd.s32 41, %s2137_s26  ;;  %v5036_v61 = vld [vmem:[#allocation74_spill] sm:$0xff] }
 0x159   : > { %v680_v38 = vmin.f32 %v649_v6, %v664_v44  ;;  %v3796_v37 = vmul.f32 %v780_v24, %v2948_v9  ;;  %v694_v10 = vsel %vm3790_vm14, %v3666_v0, %v3702_v48  ;;  %v695_v63 = vsel %vm3790_vm14, %v3669_v22, %v3711_v5  ;;  %v5033_v6 = vld [vmem:[#allocation75_spill] sm:$0xff] }
 0x15a   : > { %v696_v9 = vsel %vm3790_vm14, %v3672_v12, %v3720_v41  ;;  %v679_v45 = vsel %vm678_vm0, %v5016_v13, %v675_v31  ;;  %v3822_v21 = vsel %vm3790_vm14, %v625_v54, %v3693_v30  ;;  %v3825_v23 = vmul.f32 %v780_v24, %v2956_v27  ;;  %v5032_v13 = vld [vmem:[#allocation77_spill] sm:$0xff] }
 0x15b   : > { %v3817_v35 = vmin.f32 %v680_v38, %v679_v45  ;;  %v3828_v15 = vmul.f32 %v780_v24, %v2964_v47  ;;  %vm784_vm13 = vcmp.gt.f32.partialorder %v3796_v37, 0.0  ;;  %v789_v14 = vstv %s3755_s5  ;;  %v5037_v38 = vld [vmem:[#allocation80_spill] sm:$0xff] }
 0x15c   : > { %v791_v58 = vstv %s3763_s9  ;;  %v794_v59 = vstv %s3767_s8  ;;  %vm785_vm1 = vcmp.gt.f32.partialorder %v3825_v23, 0.0  ;;  %v790_v47 = vmul.f32 %v789_v14, %v3796_v37  ;;  %p5024_p6 = scmp.le.f32.partialorder %s5022_s7, 1e-08  ;;  %s3852_s9 = sld [smem:[#allocation2 + %s873_s28]]  ;;  %v5038_v14 = vld [vmem:[#allocation73_spill] sm:$0xff] }
 0x15d   : > { %p5023_p5 = scmp.le.f32.partialorder %s5021_s30, 1e-08  ;;  %v697_v27 = vsel %vm3790_vm14, %v3817_v35, %v3729_v2  ;;  %vm787_vm2 = vcmp.gt.f32.partialorder %v3828_v15, 0.0  ;;  %vm786_vm3 = vmand %vm784_vm13, %vm785_vm1  ;;  %v792_v30 = vmul.f32 %v791_v58, %v3825_v23  ;;  %v795_v32 = vmul.f32 %v794_v59, %v3828_v15  ;;  %s5027_s8 = sld [smem:[#allocation26_spill]]  ;;  %v5051_v2 = vld [vmem:[#allocation86_spill] sm:$0xff] }
 0x15e   : > { %s3848_s5 = scalar_select %p5024_p6, 1, 0  ;;  %v858_v62 = vstv %s857_s18  ;;  %v809_v56 = vstv %s1758_s1  ;;  %vm3854_vm5 = vmand %vm786_vm3, %vm787_vm2  ;;  %v818_v54 = vstv %s3800_s20  ;;  %v824_v11 = vstv %s1760_s29 }
 0x15f   : > { %s3837_s13 = scalar_select %p5023_p5, 1, 0  ;;  %vm859_vm6 = vcmp.eq.s32.totalorder %v858_v62, 1  ;;  %v810_v57 = vmul.f32 %v809_v56, %v2993_v29  ;;  %v812_v25 = vmul.f32 %v5028_v1, %v809_v56  ;;  %v793_v8 = vadd.f32 %v792_v30, %v790_v47  ;;  %v5040_v47 = vld [vmem:[#allocation78_spill] sm:$0xff] }
 0x160   : > { %vm3862_vm7 = vcmp.eq.s32.totalorder %v818_v54, 1  ;;  %s885_s30 = sadd.s32 44, %s2137_s26  ;;  %v825_v4 = vmul.f32 %v824_v11, %v5031_v17  ;;  %v827_v53 = vmul.f32 %v5032_v13, %v824_v11  ;;  %s1762_s18 = spop %1761  ;;  %v848_v56 = vstv %s3848_s5 }
 0x161   : > { %v833_v49 = vstv %s3837_s13  ;;  %vm813_vm8 = vcmp.le.f32.partialorder %v810_v57, 0.0  ;;  %vm814_vm9 = vcmp.ge.f32.partialorder %v810_v57, 1.0  ;;  %v796_v29 = vadd.f32 %v795_v32, %v793_v8  ;;  %s3876_s20 = sld [smem:[#allocation2 + %s879_s0]]  ;;  %s1764_s28 = spop %1763 }
 0x162   : > { %v815_v33 = vsel %vm814_vm9, %v5033_v6, %v812_v25  ;;  %vm3872_vm10 = vcmp.eq.s32.totalorder %v833_v49, 1  ;;  %v839_v28 = vstv %s1762_s18  ;;  %vm828_vm11 = vcmp.le.f32.partialorder %v825_v4, 0.0  ;;  %s3880_s1 = sld [smem:[#allocation2 + %s885_s30]]  ;;  %s3909_s0 = spop %1765 }
 0x163   : > { %s1024_s7 = sand.u32 2147483647, %s5027_s8  ;;  %v816_v24 = vsel %vm813_vm8, %v5036_v61, %v815_v33  ;;  %vm829_vm12 = vcmp.ge.f32.partialorder %v825_v4, 1.0  ;;  %v840_v31 = vmul.f32 %v839_v28, %v5037_v38  ;;  %vm855_vm0 = vcmp.ge.f32.partialorder %v796_v29, 0.0  ;;  %s5041_s8 = sld [smem:[#allocation24_spill]]  ;;  %v5055_v33 = vld [vmem:[#allocation83_spill] sm:$0xff] }
 0x164   : > { %vm861_vm13 = vcmp.lt.f32.partialorder %v796_v29, %v3822_v21  ;;  %v820_v45 = vsel %vm3862_vm7, %v5033_v6, %v816_v24  ;;  %v830_v58 = vsel %vm829_vm12, %v5038_v14, %v827_v53  ;;  %p3887_p7 = scmp.gt.f32.partialorder %s1024_s7, 1e-08  ;;  %vm856_vm1 = vmand %vm3854_vm5, %vm855_vm0  ;;  %v842_v30 = vmul.f32 %v5040_v47, %v839_v28  ;;  %s5044_s29 = sld [smem:[#allocation33_spill]]  ;;  %v5056_v28 = vld [vmem:[#allocation88_spill] sm:$0xff]  ;;  %v5057_v24 = vld [vmem:[#allocation85_spill] sm:$0xff] }
 0x165   : > { %v831_v59 = vsel %vm828_vm11, %v5036_v61, %v830_v58  ;;  %vm843_vm2 = vcmp.le.f32.partialorder %v840_v31, 0.0  ;;  %vm844_vm3 = vcmp.ge.f32.partialorder %v840_v31, 1.0  ;;  %vm860_vm8 = vmand %vm856_vm1, %vm859_vm6  ;;  %v951_v57 = vstv %s1764_s28  ;;  %s5046_s30 = sld [smem:[#allocation31_spill]]  ;;  %s1768_s7 = spop %1767  ;;  %v5061_v58 = vld [vmem:[#allocation89_spill] sm:$0xff]  ;;  %v5080_v31 = vld [vmem:[#allocation94_spill] sm:$0xff] }
 0x166   : > { %v835_v32 = vsel %vm3872_vm10, %v5038_v14, %v831_v59  ;;  %v960_v1 = vstv %s3852_s9  ;;  %vm3901_vm7 = vmand %vm860_vm8, %vm861_vm13  ;;  %v845_v54 = vsel %vm844_vm3, %v5038_v14, %v842_v30  ;;  %vm849_vm5 = vcmp.eq.s32.totalorder %v848_v56, 1  ;;  %s1028_s5 = scalar_select %p3887_p7, 1, 0  ;;  %v5062_v30 = vld [vmem:[#allocation87_spill] sm:$0xff]  ;;  %v5064_v56 = vld [vmem:[#allocation81_spill] sm:$0xff] }
 0x167   : > { %v851_v25 = vmin.f32 %v820_v45, %v835_v32  ;;  %v3907_v62 = vmul.f32 %v951_v57, %v3063_v50  ;;  %v3919_v8 = vsel %vm3901_vm7, %v3796_v37, %v694_v10  ;;  %v3929_v50 = vsel %vm3901_vm7, %v3825_v23, %v695_v63  ;;  %s1044_s28 = sadd.s32 47, %s2137_s26  ;;  %s1050_s13 = sadd.s32 50, %s2137_s26  ;;  %v5060_v45 = vld [vmem:[#allocation82_spill] sm:$0xff] }
 0x168   : > { %v3939_v0 = vsel %vm3901_vm7, %v3828_v15, %v696_v9  ;;  %v846_v48 = vsel %vm843_vm2, %v5033_v6, %v845_v54  ;;  %v3949_v5 = vsel %vm3901_vm7, %v796_v29, %v3822_v21  ;;  %v3952_v12 = vmul.f32 %v951_v57, %v3071_v51 }
 0x169   : > { %v850_v22 = vsel %vm849_vm5, %v5038_v14, %v846_v48  ;;  %v3955_v41 = vmul.f32 %v951_v57, %v3080_v7  ;;  %p5045_p9 = scmp.le.f32.partialorder %s5041_s8, 1e-08  ;;  %vm955_vm6 = vcmp.gt.f32.partialorder %v3907_v62, 0.0  ;;  %v961_v10 = vmul.f32 %v960_v1, %v3907_v62  ;;  %s1056_s8 = sadd.s32 53, %s2137_s26 }
 0x16a   : > { %v852_v37 = vmin.f32 %v851_v25, %v850_v22  ;;  %v962_v63 = vstv %s3876_s20  ;;  %p5047_p10 = scmp.le.f32.partialorder %s5044_s29, 1e-08  ;;  %vm956_vm9 = vcmp.gt.f32.partialorder %v3952_v12, 0.0  ;;  %v965_v7 = vstv %s3880_s1  ;;  %s1770_s1 = spop %1769 }
 0x16b   : > { %s3959_s9 = scalar_select %p5045_p9, 1, 0  ;;  %vm958_vm10 = vcmp.gt.f32.partialorder %v3955_v41, 0.0  ;;  %v963_v51 = vmul.f32 %v962_v63, %v3952_v12  ;;  %vm957_vm11 = vmand %vm955_vm6, %vm956_vm9  ;;  %v966_v21 = vmul.f32 %v965_v7, %v3955_v41  ;;  %v1029_v23 = vstv %s1028_s5 }
 0x16c   : > { %s3966_s18 = scalar_select %p5047_p10, 1, 0  ;;  %v3980_v9 = vsel %vm3901_vm7, %v852_v37, %v697_v27  ;;  %v980_v15 = vstv %s3909_s0  ;;  %vm3988_vm12 = vmand %vm957_vm11, %vm958_vm10  ;;  %vm1030_vm0 = vcmp.eq.s32.totalorder %v1029_v23, 1  ;;  %v5052_v27 = vld [vmem:[#allocation84_spill] sm:$0xff]  ;;  %v995_v4 = vstv %s1768_s7 }
 0x16d   : > { %p5048_p11 = scmp.le.f32.partialorder %s5046_s30, 1e-08  ;;  %v964_v11 = vadd.f32 %v963_v51, %v961_v10  ;;  %v981_v35 = vmul.f32 %v980_v15, %v5051_v2  ;;  %v983_v49 = vmul.f32 %v5052_v27, %v980_v15  ;;  %v989_v17 = vstv %s3959_s9  ;;  %s4002_s29 = sld [smem:[#allocation2 + %s1044_s28]]  ;;  %v5070_v2 = vld [vmem:[#allocation90_spill] sm:$0xff]  ;;  %v5071_v27 = vld [vmem:[#allocation91_spill] sm:$0xff] }
 0x16e   : > { %v1004_v13 = vstv %s3966_s18  ;;  %v1010_v53 = vstv %s1770_s1  ;;  %vm3998_vm2 = vcmp.eq.s32.totalorder %v989_v17, 1  ;;  %s1195_s0 = sand.u32 2147483647, %s2990_s17  ;;  %v996_v61 = vmul.f32 %v995_v4, %v5056_v28  ;;  %s4012_s5 = sld [smem:[#allocation2 + %s1050_s13]] }
 0x16f   : > { %s3986_s20 = scalar_select %p5048_p11, 1, 0  ;;  %v967_v29 = vadd.f32 %v966_v21, %v964_v11  ;;  %vm984_vm13 = vcmp.le.f32.partialorder %v981_v35, 0.0  ;;  %vm985_vm1 = vcmp.ge.f32.partialorder %v981_v35, 1.0  ;;  %v998_v38 = vmul.f32 %v5057_v24, %v995_v4  ;;  %v5079_v24 = vld [vmem:[#allocation96_spill] sm:$0xff] }
 0x170   : > { %v986_v44 = vsel %vm985_vm1, %v5055_v33, %v983_v49  ;;  %vm4008_vm3 = vcmp.eq.s32.totalorder %v1004_v13, 1  ;;  %v1011_v59 = vmul.f32 %v1010_v53, %v5061_v58  ;;  %s4017_s17 = sld [smem:[#allocation2 + %s1056_s8]]  ;;  %s1772_s9 = spop %1771  ;;  %vm999_vm9 = vcmp.le.f32.partialorder %v996_v61, 0.0 }
 0x171   : > { %vm1026_vm8 = vcmp.ge.f32.partialorder %v967_v29, 0.0  ;;  %vm1032_vm5 = vcmp.lt.f32.partialorder %v967_v29, %v3949_v5  ;;  %v987_v14 = vsel %vm984_vm13, %v5060_v45, %v986_v44  ;;  %vm1000_vm10 = vcmp.ge.f32.partialorder %v996_v61, 1.0  ;;  %p4025_p12 = scmp.gt.f32.partialorder %s1195_s0, 1e-08  ;;  %s5069_s18 = sld [smem:[#allocation21_spill]] }
 0x172   : > { %vm1027_vm6 = vmand %vm3988_vm12, %vm1026_vm8  ;;  %v991_v47 = vsel %vm3998_vm2, %v5055_v33, %v987_v14  ;;  %v1013_v32 = vmul.f32 %v5062_v30, %v1010_v53  ;;  %v1001_v57 = vsel %vm1000_vm10, %v5064_v56, %v998_v38  ;;  %vm1014_vm13 = vcmp.le.f32.partialorder %v1011_v59, 0.0  ;;  %s4059_s7 = spop %1773  ;;  %s5073_s1 = sld [smem:[#allocation23_spill]] }
 0x173   : > { %vm1031_vm11 = vmand %vm1027_vm6, %vm1030_vm0  ;;  %vm1015_vm1 = vcmp.ge.f32.partialorder %v1011_v59, 1.0  ;;  %v1019_v1 = vstv %s3986_s20  ;;  %v1002_v54 = vsel %vm999_vm9, %v5060_v45, %v1001_v57  ;;  %v1122_v37 = vstv %s1772_s9  ;;  %s1199_s28 = scalar_select %p4025_p12, 1, 0 }
 0x174   : > { %vm4034_vm12 = vmand %vm1031_vm11, %vm1032_vm5  ;;  %v1016_v48 = vsel %vm1015_vm1, %v5064_v56, %v1013_v32  ;;  %vm4040_vm2 = vcmp.eq.s32.totalorder %v1019_v1, 1  ;;  %v1006_v7 = vsel %vm4008_vm3, %v5064_v56, %v1002_v54  ;;  %v4068_v18 = vmul.f32 %v1122_v37, %v3222_v19  ;;  %s4084_s20 = scalar_select %p5072_p13, 1, 0  ;;  %v5084_v1 = vld [vmem:[#allocation98_spill] sm:$0xff] }
 0x175   : > { %v1036_v10 = vsel %vm4034_vm12, %v3907_v62, %v3919_v8  ;;  %v1037_v63 = vsel %vm4034_vm12, %v3952_v12, %v3929_v50  ;;  %v1038_v51 = vsel %vm4034_vm12, %v3955_v41, %v3939_v0  ;;  %v1022_v21 = vmin.f32 %v991_v47, %v1006_v7  ;;  %s1776_s25 = spop %1775  ;;  %s1215_s8 = sadd.s32 56, %s2137_s26  ;;  %v5088_v7 = vld [vmem:[#allocation93_spill] sm:$0xff] }
 0x176   : > { %v1017_v23 = vsel %vm1014_vm13, %v5055_v33, %v1016_v48  ;;  %v4065_v15 = vsel %vm4034_vm12, %v967_v29, %v3949_v5  ;;  %v4076_v35 = vmul.f32 %v1122_v37, %v5070_v2  ;;  %v4079_v49 = vmul.f32 %v1122_v37, %v5071_v27  ;;  %s5078_s0 = sld [smem:[#allocation32_spill]]  ;;  %s1227_s9 = sadd.s32 62, %s2137_s26  ;;  %v5085_v48 = vld [vmem:[#allocation97_spill] sm:$0xff]  ;;  %v5090_v27 = vld [vmem:[#allocation99_spill] sm:$0xff] }
 0x177   : > { %v1021_v11 = vsel %vm4040_vm2, %v5064_v56, %v1017_v23  ;;  %v1131_v17 = vstv %s4002_s29  ;;  %vm1126_vm0 = vcmp.gt.f32.partialorder %v4068_v18, 0.0  ;;  %v1133_v4 = vstv %s4012_s5  ;;  %p5074_p2 = scmp.le.f32.partialorder %s5069_s18, 1e-08  ;;  %s1778_s5 = spop %1777  ;;  %v5083_v56 = vld [vmem:[#allocation95_spill] sm:$0xff]  ;;  %v5089_v23 = vld [vmem:[#allocation100_spill] sm:$0xff]  ;;  %v5111_v37 = vld [vmem:[#allocation101_spill] sm:$0xff] }
 0x178   : > { %v4086_v19 = vmin.f32 %v1022_v21, %v1021_v11  ;;  %v1132_v5 = vmul.f32 %v1131_v17, %v4068_v18  ;;  %vm1127_vm3 = vcmp.gt.f32.partialorder %v4076_v35, 0.0  ;;  %vm1129_vm8 = vcmp.gt.f32.partialorder %v4079_v49, 0.0  ;;  %p5075_p3 = scmp.le.f32.partialorder %s5073_s1, 1e-08  ;;  %s4124_s30 = sld [smem:[#allocation2 + %s1215_s8]] }
 0x179   : > { %s4093_s13 = scalar_select %p5074_p2, 1, 0  ;;  %v1134_v13 = vmul.f32 %v1133_v4, %v4076_v35  ;;  %v1136_v53 = vstv %s4017_s17  ;;  %vm1128_vm5 = vmand %vm1126_vm0, %vm1127_vm3  ;;  %v1200_v33 = vstv %s1199_s28  ;;  %v1151_v44 = vstv %s4059_s7 }
 0x17a   : > { %v1039_v29 = vsel %vm4034_vm12, %v4086_v19, %v3980_v9  ;;  %v1137_v6 = vmul.f32 %v1136_v53, %v4079_v49  ;;  %s4108_s29 = scalar_select %p5075_p3, 1, 0  ;;  %vm4110_vm6 = vmand %vm1128_vm5, %vm1129_vm8  ;;  %vm1201_vm9 = vcmp.eq.s32.totalorder %v1200_v33, 1  ;;  %v1152_v38 = vmul.f32 %v1151_v44, %v5079_v24 }
 0x17b   : > { %v1135_v61 = vadd.f32 %v1134_v13, %v1132_v5  ;;  %v1154_v45 = vmul.f32 %v5080_v31, %v1151_v44  ;;  %s1221_s17 = sadd.s32 59, %s2137_s26  ;;  %v1160_v14 = vstv %s4084_s20  ;;  %v1166_v58 = vstv %s1776_s25  ;;  %s4139_s28 = sld [smem:[#allocation2 + %s1227_s9]]  ;;  %v5092_v5 = vld [vmem:[#allocation92_spill] sm:$0xff] }
 0x17c   : > { %v1175_v59 = vstv %s4093_s13  ;;  %v1181_v47 = vstv %s1778_s5  ;;  %vm1155_vm10 = vcmp.le.f32.partialorder %v1152_v38, 0.0  ;;  %vm1156_vm11 = vcmp.ge.f32.partialorder %v1152_v38, 1.0  ;;  %s1366_s18 = sand.u32 2147483647, %s5078_s0  ;;  %s4134_s7 = sld [smem:[#allocation2 + %s1221_s17]] }
 0x17d   : > { %v1138_v30 = vadd.f32 %v1137_v6, %v1135_v61  ;;  %vm4120_vm13 = vcmp.eq.s32.totalorder %v1160_v14, 1  ;;  %v1157_v57 = vsel %vm1156_vm11, %v5083_v56, %v1154_v45  ;;  %v1167_v54 = vmul.f32 %v1166_v58, %v5084_v1  ;;  %s1780_s20 = spop %1779  ;;  %p4147_p5 = scmp.gt.f32.partialorder %s1366_s18, 1e-08 }
 0x17e   : > { %v1169_v22 = vmul.f32 %v5085_v48, %v1166_v58  ;;  %vm4130_vm1 = vcmp.eq.s32.totalorder %v1175_v59, 1  ;;  %v1158_v21 = vsel %vm1155_vm10, %v5088_v7, %v1157_v57  ;;  %v1182_v11 = vmul.f32 %v1181_v47, %v5089_v23  ;;  %s5098_s13 = sld [smem:[#allocation25_spill]]  ;;  %s1782_s8 = spop %1781 }
 0x17f   : > { %vm1197_vm2 = vcmp.ge.f32.partialorder %v1138_v30, 0.0  ;;  %v1162_v2 = vsel %vm4120_vm13, %v5083_v56, %v1158_v21  ;;  %vm1170_vm8 = vcmp.le.f32.partialorder %v1167_v54, 0.0  ;;  %vm1171_vm5 = vcmp.ge.f32.partialorder %v1167_v54, 1.0  ;;  %s5099_s25 = sld [smem:[#allocation35_spill]]  ;;  %s1784_s17 = spop %1783  ;;  %v5110_v54 = vld [vmem:[#allocation102_spill] sm:$0xff] }
 0x180   : > { %vm1198_vm3 = vmand %vm4110_vm6, %vm1197_vm2  ;;  %v1184_v17 = vmul.f32 %v5090_v27, %v1181_v47  ;;  %v1172_v4 = vsel %vm1171_vm5, %v5092_v5, %v1169_v22  ;;  %vm1185_vm11 = vcmp.le.f32.partialorder %v1182_v11, 0.0  ;;  %vm1186_vm0 = vcmp.ge.f32.partialorder %v1182_v11, 1.0  ;;  %s5102_s9 = sld [smem:[#allocation37_spill]]  ;;  %v5118_v27 = vld [vmem:[#allocation69_spill] sm:$0xff]  ;;  %p5121_p11 = scmp.le.f32.partialorder %s3385_s11, 1e-08 }
 0x181   : > { %vm1202_vm10 = vmand %vm1198_vm3, %vm1201_vm9  ;;  %v1190_v13 = vstv %s4108_s29  ;;  %vm5093_vm6 = vcmp.lt.f32.partialorder %v1138_v30, %v4065_v15  ;;  %v5094_v53 = vmov 0  ;;  %v1173_v6 = vsel %vm1170_vm8, %v5088_v7, %v1172_v4  ;;  %s1370_s29 = scalar_select %p4147_p5, 1, 0 }
 0x182   : > { %vm4156_vm2 = vmand %vm1202_vm10, %vm5093_vm6  ;;  %v1187_v44 = vsel %vm1186_vm0, %v5092_v5, %v1184_v17  ;;  %vm4162_vm13 = vcmp.eq.s32.totalorder %v1190_v13, 1  ;;  %v1293_v28 = vstv %s1780_s20  ;;  %v1177_v8 = vsel %vm4130_vm1, %v5092_v5, %v1173_v6  ;;  %s1398_s20 = sadd.s32 71, %s2137_s26  ;;  %s5129_s11 = sld [smem:[#allocation14_spill]] }
 0x183   : > { %v5095_v53 = vsel %vm4156_vm2, 4294967295, %v5094_v53  ;;  %v4174_v61 = vsel %vm4156_vm2, %v4068_v18, %v1036_v10  ;;  %v4184_v24 = vsel %vm4156_vm2, %v4076_v35, %v1037_v63  ;;  %v4194_v62 = vsel %vm4156_vm2, %v4079_v49, %v1038_v51 }
 0x184   : > { %v1193_v50 = vmin.f32 %v1162_v2, %v1177_v8  ;;  %v1188_v12 = vsel %vm1185_vm11, %v5083_v56, %v1187_v44  ;;  %v4203_v10 = vsel %vm4156_vm2, %v1138_v30, %v4065_v15  ;;  %v4206_v0 = vmul.f32 %v1293_v28, %v3451_v42  ;;  %p5100_p6 = scmp.le.f32.partialorder %s5098_s13, 1e-08 }
 0x185   : > { %v1192_v41 = vsel %vm4162_vm13, %v5092_v5, %v1188_v12  ;;  %v4214_v63 = vmul.f32 %v1293_v28, %v3453_v34  ;;  %v4217_v51 = vmul.f32 %v1293_v28, %v3473_v20  ;;  %v1302_v18 = vstv %s4124_s30  ;;  %p5101_p7 = scmp.le.f32.partialorder %s5099_s25, 1e-08  ;;  %s1786_s30 = spop %1785  ;;  %v5119_v12 = vld [vmem:[#allocation68_spill] sm:$0xff] }
 0x186   : > { %s1330_s0 = scalar_select %p5100_p6, 1, 0  ;;  %v1194_v15 = vmin.f32 %v1193_v50, %v1192_v41  ;;  %vm1297_vm9 = vcmp.gt.f32.partialorder %v4206_v0, 0.0  ;;  %v1303_v42 = vmul.f32 %v1302_v18, %v4206_v0  ;;  %v1304_v35 = vstv %s4134_s7 }
 0x187   : > { %s1345_s5 = scalar_select %p5101_p7, 1, 0  ;;  %vm1298_vm1 = vcmp.gt.f32.partialorder %v4214_v63, 0.0  ;;  %vm1300_vm0 = vcmp.gt.f32.partialorder %v4217_v51, 0.0  ;;  %v1305_v34 = vmul.f32 %v1304_v35, %v4214_v63  ;;  %v1307_v49 = vstv %s4139_s28 }
 0x188   : > { %v4238_v20 = vsel %vm4156_vm2, %v1194_v15, %v1039_v29  ;;  %vm1299_vm3 = vmand %vm1297_vm9, %vm1298_vm1  ;;  %v1308_v38 = vmul.f32 %v1307_v49, %v4217_v51  ;;  %v1371_v31 = vstv %s1370_s29  ;;  %v1322_v45 = vstv %s1782_s8  ;;  %p5107_p9 = scmp.le.f32.partialorder %s5102_s9, 1e-08  ;;  %s1386_s7 = sadd.s32 65, %s2137_s26 }
 0x189   : > { %vm4241_vm8 = vmand %vm1299_vm3, %vm1300_vm0  ;;  %v1306_v58 = vadd.f32 %v1305_v34, %v1303_v42  ;;  %vm1372_vm5 = vcmp.eq.s32.totalorder %v1371_v31, 1  ;;  %v1323_v59 = vmul.f32 %v1322_v45, %v3505_v55  ;;  %v1325_v9 = vmul.f32 %v3495_v43, %v1322_v45  ;;  %s1392_s28 = sadd.s32 68, %s2137_s26  ;;  %s4286_s1 = sld [smem:[#allocation2 + %s1386_s7]] }
 0x18a   : > { %v1331_v19 = vstv %s1330_s0  ;;  %v1337_v29 = vstv %s1784_s17  ;;  %v1346_v47 = vstv %s1345_s5  ;;  %v1352_v30 = vstv %s1786_s30  ;;  %s1360_s18 = scalar_select %p5107_p9, 1, 0 }
 0x18b   : > { %v1309_v32 = vadd.f32 %v1308_v38, %v1306_v58  ;;  %vm1326_vm10 = vcmp.le.f32.partialorder %v1323_v59, 0.0  ;;  %vm1327_vm11 = vcmp.ge.f32.partialorder %v1323_v59, 1.0  ;;  %vm4247_vm6 = vcmp.eq.s32.totalorder %v1331_v19, 1  ;;  %s1537_s26 = sand.u32 2147483647, %s3413_s23  ;;  %s4318_s23 = sld [smem:[#allocation2 + %s1398_s20]] }
 0x18c   : > { %v1328_v55 = vsel %vm1327_vm11, %v3503_v60, %v1325_v9  ;;  %v1338_v43 = vmul.f32 %v1337_v29, %v3526_v36  ;;  %v1340_v57 = vmul.f32 %v3516_v16, %v1337_v29  ;;  %vm4256_vm13 = vcmp.eq.s32.totalorder %v1346_v47, 1  ;;  %p4329_p10 = scmp.gt.f32.partialorder %s1537_s26, 1e-08  ;;  %s1720_s15 = sshll.u32 %s5129_s11, 3 }
 0x18d   : > { %vm1368_vm9 = vcmp.ge.f32.partialorder %v1309_v32, 0.0  ;;  %v1329_v48 = vsel %vm1326_vm10, %v5110_v54, %v1328_v55  ;;  %v1353_v22 = vmul.f32 %v1352_v30, %v3579_v39  ;;  %v1355_v36 = vmul.f32 %v3543_v40, %v1352_v30  ;;  %s1726_s25 = sshll.u32 %s5129_s11, 7  ;;  %s1795_s17 = smul.u32 640, %s5129_s11 }
 0x18e   : > { %vm1369_vm0 = vmand %vm4241_vm8, %vm1368_vm9  ;;  %v1333_v16 = vsel %vm4247_vm6, %v3503_v60, %v1329_v48  ;;  %vm1341_vm3 = vcmp.le.f32.partialorder %v1338_v43, 0.0  ;;  %vm1342_vm11 = vcmp.ge.f32.partialorder %v1338_v43, 1.0  ;;  %v1361_v39 = vstv %s1360_s18  ;;  %s5133_s18 = sld [smem:[#allocation104_spill]] }
 0x18f   : > { %vm1373_vm1 = vmand %vm1369_vm0, %vm1372_vm5  ;;  %v1343_v7 = vsel %vm1342_vm11, %v5111_v37, %v1340_v57  ;;  %vm1356_vm10 = vcmp.le.f32.partialorder %v1353_v22, 0.0  ;;  %vm1357_vm2 = vcmp.ge.f32.partialorder %v1353_v22, 1.0  ;;  %vm5112_vm8 = vcmp.lt.f32.partialorder %v1309_v32, %v4203_v10  ;;  %s5135_s26 = sld [smem:[#allocation105_spill]] }
 0x190   : > { %vm4276_vm9 = vmand %vm1373_vm1, %vm5112_vm8  ;;  %v1344_v23 = vsel %vm1341_vm3, %v5110_v54, %v1343_v7  ;;  %v1358_v40 = vsel %vm1357_vm2, %v5111_v37, %v1355_v36  ;;  %vm4282_vm6 = vcmp.eq.s32.totalorder %v1361_v39, 1  ;;  %v5117_v2 = vstv %s3118_s14  ;;  %s4309_s14 = sld [smem:[#allocation2 + %s1392_s28]] }
 0x191   : > { %v4291_v17 = vsub.f32 %v5118_v27, %v5117_v2  ;;  %v1378_v5 = vsel %vm4276_vm9, %v4206_v0, %v4174_v61  ;;  %v1379_v4 = vsel %vm4276_vm9, %v4214_v63, %v4184_v24  ;;  %v1380_v13 = vsel %vm4276_vm9, %v4217_v51, %v4194_v62 }
 0x192   : > { %v1348_v6 = vsel %vm4256_vm13, %v5111_v37, %v1344_v23  ;;  %v1359_v33 = vsel %vm1356_vm10, %v3503_v60, %v1358_v40  ;;  %v4316_v28 = vsel %vm4276_vm9, %v1309_v32, %v4203_v10  ;;  %v1439_v8 = vstv %s3234_s10 }
 0x193   : > { %v1364_v44 = vmin.f32 %v1333_v16, %v1348_v6  ;;  %v1363_v50 = vsel %vm4282_vm6, %v5111_v37, %v1359_v33  ;;  %v4325_v41 = vsub.f32 %v5119_v12, %v1439_v8  ;;  %v1441_v18 = vstv %s3242_s24  ;;  %s4387_s24 = scalar_select %p5121_p11, 1, 0 }
 0x194   : > { %v1443_v60 = vstv %s3265_s12  ;;  %v4336_v15 = vsub.f32 %v5118_v27, %v1441_v18  ;;  %v1445_v35 = vstv %s3275_s22  ;;  %v1447_v49 = vstv %s3284_s19  ;;  %s1788_s12 = spop %1787  ;;  %s4518_s7 = scalar_lea.hbm %s5133_s18, %s1726_s25 }
 0x195   : > { %v4333_v10 = vmin.f32 %v1364_v44, %v1363_v50  ;;  %v4339_v42 = vsub.f32 %v5119_v12, %v1443_v60  ;;  %v1446_v34 = vsub.f32 %v5118_v27, %v1445_v35  ;;  %v1449_v38 = vstv %s3401_s6  ;;  %s1541_s22 = scalar_select %p4329_p10, 1, 0 }
 0x196   : > { %v1451_v31 = vstv %s3376_s4  ;;  %v1448_v14 = vsub.f32 %v5119_v12, %v1447_v49  ;;  %v1450_v58 = vmul.f32 %v1449_v38, %v4336_v15  ;;  %v1454_v9 = vstv %s3344_s27  ;;  %s4377_s10 = spop %1789  ;;  %s5124_s27 = sld [smem:[#allocation12_spill]] }
 0x197   : > { %v1381_v45 = vsel %vm4276_vm9, %v4333_v10, %v4238_v20  ;;  %v1452_v59 = vmul.f32 %v1451_v31, %v4339_v42  ;;  %v1456_v19 = vstv %s3361_s16  ;;  %v1459_v29 = vstv %s3333_s3  ;;  %s4394_s19 = spop %1791 }
 0x198   : > { %v1461_v47 = vstv %s3306_s21  ;;  %v1455_v32 = vmul.f32 %v1454_v9, %v1448_v14  ;;  %v1457_v56 = vmul.f32 %v1456_v19, %v1446_v34  ;;  %v1460_v55 = vmul.f32 %v1459_v29, %v4291_v17  ;;  %s4401_s21 = scalar_select %p1423_p1, 1, 0 }
 0x199   : > { %v4363_v30 = vsub.f32 %v1450_v58, %v1452_v59  ;;  %v1462_v43 = vmul.f32 %v1461_v47, %v4325_v41  ;;  %v1464_v57 = vstv %s1788_s12  ;;  %v1473_v1 = vstv %s4286_s1  ;;  %s4418_s3 = spop %1793  ;;  %s2059_s12 = smov [#allocation5]  }
 0x19a   : > { %v1458_v54 = vsub.f32 %v1455_v32, %v1457_v56  ;;  %v1475_v22 = vstv %s4309_s14  ;;  %v1478_v16 = vstv %s4318_s23  ;;  %v1487_v37 = vmul.f32 %v1446_v34, %v1446_v34  ;;  %s1531_s16 = scalar_select %p1424_p0, 1, 0 }
 0x19b   : > { %v4369_v48 = vmul.f32 %v1464_v57, %v4363_v30  ;;  %v1463_v36 = vsub.f32 %v1460_v55, %v1462_v43  ;;  %v1488_v7 = vmul.f32 %v1448_v14, %v1448_v14  ;;  %v1542_v39 = vstv %s1541_s22  ;;  %s4532_s14 = scalar_lea.hbm %s5135_s26, %s1795_s17  ;;  %s1949_s22 = sshll.u32 %s2059_s12, 4  ;;  %s1950_s22 = int_to_ptr.vmem [resolvable:$false] %s1949_s22 }
 0x19c   : > { %v4373_v23 = vmul.f32 %v1464_v57, %v1458_v54  ;;  %v1481_v11 = vmul.f32 %v4291_v17, %v4291_v17  ;;  %vm1543_vm5 = vcmp.eq.s32.totalorder %v1542_v39, 1  ;;  %v1482_v27 = vmul.f32 %v4325_v41, %v4325_v41  ;;  %s4444_s4 = sand.u32 1, %s5124_s27  }
 0x19d   : > { %vm1468_vm2 = vcmp.gt.f32.partialorder %v4369_v48, 0.0  ;;  %v1474_v40 = vmul.f32 %v1473_v1, %v4369_v48  ;;  %v1467_v2 = vmul.f32 %v1464_v57, %v1463_v36  ;;  %v1484_v6 = vmul.f32 %v4336_v15, %v4336_v15  ;;  %s1719_s6 = sshll.u32 %s4444_s4, 3  ;;  %s1730_s2 = smul.u32 40, %s4444_s4 }
 0x19e   : > { %vm1469_vm13 = vcmp.gt.f32.partialorder %v4373_v23, 0.0  ;;  %v1476_v44 = vmul.f32 %v1475_v22, %v4373_v23  ;;  %v1485_v33 = vmul.f32 %v4339_v42, %v4339_v42  ;;  %v1490_v8 = vmul.f32 %v1461_v47, %v4291_v17  ;;  %s153_s8 = scalar_lea.vmem [#allocation5], %s1719_s6  ;;  %s1575_s23 = scalar_lea.sflag [#allocation3], %s4444_s4 }
 0x19f   : > { %vm1470_vm1 = vmand %vm1468_vm2, %vm1469_vm13  ;;  %vm1471_vm0 = vcmp.gt.f32.partialorder %v1467_v2, 0.0  ;;  %v1479_v50 = vmul.f32 %v1478_v16, %v1467_v2  ;;  %v4396_v12 = vadd.f32 %v1488_v7, %v1487_v37  ;;  %v1491_v18 = vmul.f32 %v1459_v29, %v4325_v41  ;;  %s1594_s29 = sshll.u32 %s153_s8, 4  ;;  %s160_s0 = scalar_lea.vmem [#allocation6], %s1730_s2  ;;  %s4520_s29 = int_to_ptr.vmem [resolvable:$true] %s1594_s29 }
 0x1a0   : > { %v1477_v60 = vadd.f32 %v1476_v44, %v1474_v40  ;;  %v1483_v35 = vadd.f32 %v1482_v27, %v1481_v11  ;;  %v1493_v34 = vstv %s4377_s10  ;;  %v1495_v49 = vmul.f32 %v1463_v36, %v1463_v36  ;;  %vm1472_vm3 = vmand %vm1470_vm1, %vm1471_vm0  ;;  %s1608_s5 = sshll.u32 %s160_s0, 4  ;;  %s1945_s13 = scalar_lea.vmem %s4520_s29, 128  ;;  %s4525_s5 = int_to_ptr.vmem [resolvable:$true] %s1608_s5 }
 0x1a1   : > { %v1492_v14 = vadd.f32 %v1491_v18, %v1490_v8  ;;  %v1502_v58 = vstv %s4387_s24  ;;  %v1505_v59 = vmul.f32 %v1454_v9, %v4291_v17  ;;  %v1506_v47 = vmul.f32 %v1456_v19, %v4325_v41  ;;  %p1946_p1 = scmp.ne.s32.totalorder %s4520_s29, %s1945_s13  ;;  %s1951_s10 = scalar_lea.vmem %s1950_s22, 256 }
 0x1a2   : > { %v4407_v32 = vadd.f32 %v1479_v50, %v1477_v60  ;;  %v1486_v56 = vadd.f32 %v1485_v33, %v1484_v6  ;;  %v1496_v29 = vmul.f32 %v1495_v49, %v1493_v34  ;;  %v1508_v55 = vstv %s4394_s19  ;;  %p1952_p13 = scmp.lt.s32.totalorder %s4520_s29, %s1950_s22  ;;  %p1953_p2 = scmp.lt.s32.totalorder %s1951_s10, %s1945_s13 }
 0x1a3   : > { %v1494_v43 = vmul.f32 %v1493_v34, %v1492_v14  ;;  %v1507_v57 = vadd.f32 %v1506_v47, %v1505_v59  ;;  %v1510_v1 = vmul.f32 %v1458_v54, %v1458_v54  ;;  %v1517_v22 = vstv %s4401_s21  ;;  %p1947_p0 = pnand %p1946_p1, %p2118_p4 }
 0x1a4   : > { %vm1539_vm11 = vcmp.ge.f32.partialorder %v4407_v32, 0.0  ;;  %vm1545_vm10 = vcmp.lt.f32.partialorder %v4407_v32, %v4316_v28  ;;  %vm4414_vm8 = vcmp.eq.s32.totalorder %v1502_v58, 1  ;;  %v1520_v41 = vmul.f32 %v1451_v31, %v4336_v15  ;;  %p1954_p3 = por %p1953_p2, %p1952_p13 }
 0x1a5   : > { %vm1540_vm6 = vmand %vm1472_vm3, %vm1539_vm11  ;;  %vm1497_vm2 = vcmp.le.f32.partialorder %v1494_v43, 0.0  ;;  %vm1498_vm13 = vcmp.ge.f32.partialorder %v1494_v43, 1.0  ;;  %v1509_v9 = vmul.f32 %v1508_v55, %v1507_v57  ;;  %v1511_v19 = vmul.f32 %v1510_v1, %v1508_v55  ;;  %p1948_p12 = pneg %p1947_p0 }
 0x1a6   : > { %vm1544_vm1 = vmand %vm1540_vm6, %vm1543_vm5  ;;  %v1499_v54 = vsel %vm1498_vm13, %v1486_v56, %v1496_v29  ;;  %vm4426_vm0 = vcmp.eq.s32.totalorder %v1517_v22, 1  ;;  %v1521_v36 = vmul.f32 %v1449_v38, %v4339_v42  ;;  %v1525_v15 = vmul.f32 %v4363_v30, %v4363_v30 }
 0x1a7   : > { %vm4438_vm3 = vmand %vm1544_vm1, %vm1545_vm10  ;;  %v1500_v37 = vsel %vm1497_vm2, %v1483_v35, %v1499_v54  ;;  %vm1512_vm5 = vcmp.le.f32.partialorder %v1509_v9, 0.0  ;;  %vm1513_vm11 = vcmp.ge.f32.partialorder %v1509_v9, 1.0  ;;  %v1523_v7 = vstv %s4418_s3  ;;  %p1955_p5 = pnand %p1954_p3, %p1948_p12 }
 0x1a8   : > { %v1547_v42 = vsel %vm4438_vm3, %v4407_v32, %v4316_v28  ;;  %v1549_v38 = vsel %vm4438_vm3, %v4369_v48, %v1378_v5  ;;  %v1550_v30 = vsel %vm4438_vm3, %v4373_v23, %v1379_v4  ;;  %v1551_v61 = vsel %vm4438_vm3, %v1467_v2, %v1380_v13 }
 0x1a9   : > { %v1514_v0 = vsel %vm1513_vm11, %v4396_v12, %v1511_v19  ;;  %v1522_v5 = vadd.f32 %v1521_v36, %v1520_v41  ;;  %v1532_v28 = vstv %s1531_s16  ;;  %v1504_v24 = vsel %vm4414_vm8, %v1486_v56, %v1500_v37 }
 0x1aa   : > { %v1515_v63 = vsel %vm1512_vm5, %v1483_v35, %v1514_v0  ;;  %v1526_v48 = vmul.f32 %v1525_v15, %v1523_v7  ;;  %v2058_v51 = vmov 4294967295   ;;  %vm4483_vm10 = vcmp.eq.s32.totalorder %v1532_v28, 1 }
 0x1ab   : > { %v1519_v4 = vsel %vm4426_vm0, %v4396_v12, %v1515_v63  ;;  %v1524_v62 = vmul.f32 %v1523_v7, %v1522_v5  ;;  %v351_v13 = vsel %vm3582_vm4, 0, %v2058_v51  ;;  %vm5132_vm4 = vnez %v5095_v53 }
 0x1ac   : > { %v522_v23 = vsel %vm3680_vm15, 1, %v351_v13  ;;  %v1535_v40 = vmin.f32 %v1504_v24, %v1519_v4  ;;  %v1555_v46 = vstv %s1720_s15 }
 0x1ad   : > { %vm1527_vm8 = vcmp.le.f32.partialorder %v1524_v62, 0.0  ;;  %vm1528_vm6 = vcmp.ge.f32.partialorder %v1524_v62, 1.0  ;;  %v693_v11 = vsel %vm3790_vm14, 2, %v522_v23 }
 0x1ae   : > { %v1529_v2 = vsel %vm1528_vm6, %v4396_v12, %v1526_v48  ;;  %v864_v52 = vsel %vm3901_vm7, 3, %v693_v11 }
 0x1af   : > { %v1530_v27 = vsel %vm1527_vm8, %v1486_v56, %v1529_v2  ;;  %v1035_v6 = vsel %vm4034_vm12, 4, %v864_v52 }
 0x1b0   : > { %v1534_v3 = vsel %vm4483_vm10, %v4396_v12, %v1530_v27  ;;  %v1206_v44 = vsel %vm5132_vm4, 5, %v1035_v6 }
 0x1b1   : > { %v1536_v33 = vmin.f32 %v1535_v40, %v1534_v3  ;;  %v1377_v26 = vsel %vm4276_vm9, 6, %v1206_v44 }
 0x1b2   : > { %v1548_v25 = vsel %vm4438_vm3, 7, %v1377_v26 }
 0x1b3   : > { %v1552_v53 = vsel %vm4438_vm3, %v1536_v33, %v1381_v45  ;;  %vm1553_vm15 = vcmp.ge.s32.totalorder %v1548_v25, 0  ;;  %v1556_v8 = vadd.s32 %v1555_v46, %v1548_v25 }
 0x1b4   : > { %v1570_v50 = vsub.f32 0.0, %v1552_v53  ;;  %v1559_v21 = vsel %vm1553_vm15, %v1547_v42, -1.0  ;;  %v1561_v20 = vsel %vm1553_vm15, %v1549_v38, -1.0  ;;  %v1564_v10 = vsel %vm1553_vm15, %v1550_v30, -1.0 }
 0x1b5   : > { %v1557_v45 = vsel %vm1553_vm15, %v1556_v8, 4294967295  ;;  %1560 = vst [vmem:[%s160_s0] sm:$0xff] %v1559_v21  ;;  %1721 = vst [vmem:[%s160_s0 + $0x8] sm:$0xff] %v1561_v20  ;;  %v1567_v12 = vsel %vm1553_vm15, %v1551_v61, -1.0 }
 0x1b6   : > { %1722 = vst [vmem:[%s160_s0 + $0x10] sm:$0xff] %v1564_v10  ;;  %1558 = vst [vmem:[%s153_s8] sm:$0xff] %v1557_v45  ;;  %v1571_v18 = vsel %vm1553_vm15, %v1570_v50, -1.0 }
 0x1b7   : > { %1723 = vst [vmem:[%s160_s0 + $0x18] sm:$0xff] %v1567_v12  ;;  %1724 = vst [vmem:[%s160_s0 + $0x20] sm:$0xff] %v1571_v18 }
 0x1b8   : > { %1958 = shalt.err (!%p1955_p5)
}
 0x1b9   : > { %s1959_s24 = scalar_lea.hbm %s4518_s7, 128  ;;  %s1963_s3 = scalar_lea.hbm %s5133_s18, 256 }
 0x1ba   : > { %p1960_p6 = scmp.ne.s32.totalorder %s4518_s7, %s1959_s24  ;;  %p1964_p10 = scmp.lt.s32.totalorder %s4518_s7, %s5133_s18 }
 0x1bb   : > { %p1965_p11 = scmp.lt.s32.totalorder %s1963_s3, %s1959_s24 }
 0x1bc   : > { %p1961_p7 = pnand %p1960_p6, %p2118_p4 }
 0x1bd   : > { %p1966_p1 = por %p1965_p11, %p1964_p10 }
 0x1be   : > { %p1962_p9 = pneg %p1961_p7 }
 0x1c0   : > { %p1967_p0 = pnand %p1966_p1, %p1962_p9 }
 0x1c2   : > { %1970 = shalt.err (!%p1967_p0)
}
 0x1c3   : > { %1800 = dma.vmem_to_hbm [thread:$0]  (%p2118_p4), %s4520_s29, 128, %s4518_s7, %s1575_s23  }
 0x1c4   : > { %s1580_s11 = scalar_lea.sflag [#allocation7], %s4444_s4  ;;  %s1971_s6 = scalar_lea.vmem %s4525_s5, 640 }
 0x1c5   : > { %p1972_p12 = scmp.ne.s32.totalorder %s4525_s5, %s1971_s6  ;;  %s2060_s2 = smov [#allocation6]  }
 0x1c6   : > { %s1975_s15 = sshll.u32 %s2060_s2, 4  ;;  %s1976_s15 = int_to_ptr.vmem [resolvable:$false] %s1975_s15 }
 0x1c7   : > { %p1973_p13 = pnand %p1972_p12, %p2118_p4  ;;  %s1977_s25 = scalar_lea.vmem %s1976_s15, 1280 }
 0x1c8   : > { %p1978_p3 = scmp.lt.s32.totalorder %s4525_s5, %s1976_s15  ;;  %p1979_p5 = scmp.lt.s32.totalorder %s1977_s25, %s1971_s6 }
 0x1c9   : > { %p1974_p2 = pneg %p1973_p13 }
 0x1ca   : > { %p1980_p6 = por %p1979_p5, %p1978_p3 }
 0x1cc   : > { %p1981_p7 = pnand %p1980_p6, %p1974_p2 }
 0x1ce   : > { %1984 = shalt.err (!%p1981_p7)
}
 0x1cf   : > { %s1985_s8 = scalar_lea.hbm %s4532_s14, 640  ;;  %s1989_s17 = scalar_lea.hbm %s5135_s26, 1280 }
 0x1d0   : > { %p1986_p9 = scmp.ne.s32.totalorder %s4532_s14, %s1985_s8  ;;  %p1990_p1 = scmp.lt.s32.totalorder %s4532_s14, %s5135_s26 }
 0x1d1   : > { %p1991_p0 = scmp.lt.s32.totalorder %s1989_s17, %s1985_s8 }
 0x1d2   : > { %p1987_p10 = pnand %p1986_p9, %p2118_p4 }
 0x1d3   : > { %p1992_p12 = por %p1991_p0, %p1990_p1 }
 0x1d4   : > { %p1988_p11 = pneg %p1987_p10 }
 0x1d6   : > { %p1993_p13 = pnand %p1992_p12, %p1988_p11 }
 0x1d8   : > { %1996 = shalt.err (!%p1993_p13)
}
 0x1d9   : > { %s2061_s7 = smov 128   ;;  %s2062_s20 = smov 8  }
 0x1da   : > { %1801 = dma.vmem_to_hbm [thread:$0]  (%p2118_p4), %s4525_s5, 640, %s4532_s14, %s1580_s11, %s2061_s7, %s2061_s7, %s2062_s20  }
 0x1db PF: > { %s5136_s1 = sld [smem:[#allocation16_spill]] }
 0x1dc   : > { %s5137_s23 = sld [smem:[#allocation11_spill]] }
 0x1e1   : > { %p1817_p2 = scmp.ge.s32.totalorder %s5136_s1, 2 }
 0x1e2   : > { %s1623_s12 = sand.u32 1, %s5137_s23  }
 0x1e3   : > { %p1809_p3 = pnand %p1817_p2, %p2125_p8  ;;  %s1624_s22 = scalar_lea.sflag [#allocation3], %s1623_s12 }
 0x1e5   : > { %p1810_p5 = pneg %p1809_p3 }
 0x1e7   : > { %2026 = dma.done.wait (%p1810_p5), %s1624_s22, 128  }
 0x1e8   : > { %2028 = vsyncadd (%p1810_p5), %s1624_s22, 4294967168  ;;  %s1633_s10 = scalar_lea.sflag [#allocation7], %s1623_s12 }
 0x1e9   : > { %2030 = dma.done.wait (%p1810_p5), %s1633_s10, 640  }
 0x1ea   : > { %2032 = vsyncadd (%p1810_p5), %s1633_s10, 4294966656  ;;  %s20_s14 = sadd.s32 1, %s5136_s1   ;;  %s5139_s9 = sld [smem:[#allocation12_spill]] }
 0x1eb   : > { %p17_p6 = scmp.ge.s32.totalorder %s20_s14, 4   ;;  %s5140_s10 = sld [smem:[#allocation13_spill]] }
 0x1ec   : > { %s5141_s11 = sld [smem:[#allocation20_spill]] }
 0x1ed   : > { %s5142_s12 = sld [smem:[#allocation15_spill]]  ;;  %19 = sbr.rel (!%p17_p6) target bundleno = 11 (0xb), region = 82 }
 0x1ee   : > { %s5143_s13 = sld [smem:[#allocation17_spill]] }
 0x1f2   :  { %1638 = vsyncpa [#allocation3], 1 }
 0x1f3   :  { %1640 = vsyncpa [#allocation3 + $0x1], 1 }
 0x1f4   :  { %1641 = vsyncpa [#allocation7], 1 }
 0x1f5   :  { %1643 = vsyncpa [#allocation7 + $0x1], 1 }
 0x1f6   :  { %1644 = vsyncpa [#allocation4], 1 }
 0x1f7   :  { %1646 = vsyncpa [#allocation4 + $0x1], 1 }

</bundles_post_ra>
